<compile_context>
chip_gen: v6e
topology: v6e:2x2x1
jax: 0.10.0
libtpu: 0.0.40
codegen_flags: <defaults>
</compile_context>

<pallas_src>
import functools

import jax
import jax.numpy as jnp
from jax.experimental import pallas as pl
from jax.experimental.pallas import tpu as pltpu

EPS = 1e-6
C = 192  # normalized feature dim (from LayerNorm((192,)))


def _layernorm_kernel(x_ref, gamma_ref, beta_ref, o_ref):
    # x_ref: (TILE_ROWS, C) block in VMEM; compute in f32 regardless of I/O dtype.
    c = x_ref.shape[-1]
    inv_c = 1.0 / c  # compile-time constant reciprocal (no per-row divide)

    x = x_ref[...].astype(jnp.float32)

    # Two-pass mean/variance (matches PyTorch numerics; compute is free here).
    mean = jnp.sum(x, axis=-1, keepdims=True) * inv_c
    xm = x - mean
    var = jnp.sum(xm * xm, axis=-1, keepdims=True) * inv_c
    inv = jax.lax.rsqrt(var + EPS)  # EUP rsqrt — separate slot, ~free

    gamma = gamma_ref[...].astype(jnp.float32)  # (1, C)
    beta = beta_ref[...].astype(jnp.float32)    # (1, C)

    y = xm * inv * gamma + beta
    o_ref[...] = y.astype(o_ref.dtype)


def _sublane_multiple(dtype):
    """Rows-per-vreg packing requirement for the I/O dtype."""
    itemsize = jnp.dtype(dtype).itemsize
    return max(8, 32 // max(itemsize, 1))  # f32->8, bf16->16, int8/fp8->32


def _pick_tile_rows(rows, dtype, preferred=784, cap=2048):
    """Largest row tile that divides `rows`, respects dtype sublane packing, <= cap."""
    sub = _sublane_multiple(dtype)
    if rows % preferred == 0 and preferred % sub == 0 and preferred <= cap:
        return preferred
    for t in range(min(cap, rows), 0, -1):
        if rows % t == 0 and (t % sub == 0 or t == rows):
            return t
    return rows


@functools.partial(jax.jit, static_argnames=("tile_rows",))
def layernorm_pallas(x, gamma, beta, tile_rows=784):
    """LayerNorm over the last dim (eps=1e-6, elementwise affine).

    x: [..., C] (f32 or bf16), gamma/beta: [C] (kept f32 inside the kernel).
    """
    orig_shape = x.shape
    c = orig_shape[-1]
    rows = 1
    for d in orig_shape[:-1]:
        rows *= d

    # Trace-time tile selection (shapes/dtypes are static under jit).
    sub = _sublane_multiple(x.dtype)
    if rows % tile_rows != 0 or tile_rows > rows or tile_rows % sub != 0:
        tile_rows = _pick_tile_rows(rows, x.dtype)
    grid = (rows // tile_rows,)

    x2 = x.reshape(rows, c)
    gamma2 = gamma.reshape(1, c).astype(jnp.float32)
    beta2 = beta.reshape(1, c).astype(jnp.float32)

    itemsize = jnp.dtype(x.dtype).itemsize
    cost = pl.CostEstimate(
        flops=8 * rows * c,                          # sums, normalize, affine
        transcendentals=rows,                        # one rsqrt per row
        bytes_accessed=2 * rows * c * itemsize + 2 * c * 4,
    )

    out = pl.pallas_call(
        _layernorm_kernel,
        out_shape=jax.ShapeDtypeStruct((rows, c), x.dtype),
        grid_spec=pltpu.PrefetchScalarGridSpec(
            num_scalar_prefetch=0,
            grid=grid,
            in_specs=[
                pl.BlockSpec((tile_rows, c), lambda i: (i, 0)),
                pl.BlockSpec((1, c), lambda i: (0, 0)),
                pl.BlockSpec((1, c), lambda i: (0, 0)),
            ],
            out_specs=pl.BlockSpec((tile_rows, c), lambda i: (i, 0)),
        ),
        compiler_params=pltpu.CompilerParams(
            dimension_semantics=("parallel",),
        ),
        cost_estimate=cost,
    )(x2, gamma2, beta2)

    return out.reshape(orig_shape)


def layernorm_ref(x, gamma, beta):
    x32 = x.astype(jnp.float32)
    mean = jnp.mean(x32, axis=-1, keepdims=True)
    var = jnp.mean((x32 - mean) ** 2, axis=-1, keepdims=True)
    y = (x32 - mean) * jax.lax.rsqrt(var + EPS) * gamma.astype(jnp.float32) \
        + beta.astype(jnp.float32)
    return y.astype(x.dtype)


if __name__ == "__main__":
    key = jax.random.PRNGKey(0)
    # Shape implied by the PyTorch module's forward: [1, 56, 56, 192], channels-last.
    x = jax.random.normal(key, (1, 56, 56, C), dtype=jnp.float32)

    # nn.LayerNorm default init: weight = ones, bias = zeros.
    gamma = jnp.ones((C,), dtype=jnp.float32)
    beta = jnp.zeros((C,), dtype=jnp.float32)

    # f32 path (matches the PyTorch module exactly).
    y = layernorm_pallas(x, gamma, beta)
    jax.block_until_ready(y)
    y_ref = layernorm_ref(x, gamma, beta)
    assert y.shape == x.shape
    assert jnp.max(jnp.abs(y - y_ref)) < 1e-4

    # bf16 I/O path (bandwidth win on v5e/v6e); tile_rows=784 is a multiple of 16.
    x_bf16 = x.astype(jnp.bfloat16)
    y_bf16 = layernorm_pallas(x_bf16, gamma, beta)
    jax.block_until_ready(y_bf16)
    y_bf16_ref = layernorm_ref(x_bf16, gamma, beta)
    assert y_bf16.dtype == jnp.bfloat16
    assert jnp.max(jnp.abs(y_bf16.astype(jnp.float32)
                           - y_bf16_ref.astype(jnp.float32))) < 5e-2

    print("KERNEL_OK")
</pallas_src>

<mosaic_0001>
module attributes {stable_mosaic.version = 11 : i64} {
  func.func @_layernorm_kernel(%arg0: i32, %arg1: memref<784x192xf32, #tpu.memory_space<vmem>>, %arg2: memref<1x192xf32, #tpu.memory_space<vmem>>, %arg3: memref<1x192xf32, #tpu.memory_space<vmem>>, %arg4: memref<784x192xf32, #tpu.memory_space<vmem>>) attributes {dimension_semantics = [#tpu.dimension_semantics<parallel>], iteration_bounds = array<i64: 4>, scalar_prefetch = 0 : i64, scratch_operands = 0 : i64, tpu.core_type = #tpu.core_type<tc>, window_params = [{transform_indices = @transform_0, window_bounds = array<i64: 784, 192>}, {pipeline_mode = #tpu.pipeline_mode<synchronous>, transform_indices = @transform_1, window_bounds = array<i64: 1, 192>}, {pipeline_mode = #tpu.pipeline_mode<synchronous>, transform_indices = @transform_2, window_bounds = array<i64: 1, 192>}, {transform_indices = @transform_3, window_bounds = array<i64: 784, 192>}]} {
    %c0 = arith.constant 0 : index
    %c0_0 = arith.constant 0 : index
    %0 = vector.load %arg1[%c0, %c0_0] : memref<784x192xf32, #tpu.memory_space<vmem>>, vector<784x192xf32>
    %cst = arith.constant dense<0.000000e+00> : vector<784xf32>
    %1 = vector.multi_reduction <add>, %0, %cst [1] : vector<784x192xf32> to vector<784xf32>
    %2 = vector.shape_cast %1 : vector<784xf32> to vector<784x1xf32>
    %cst_1 = arith.constant 0.00520833349 : f32
    %3 = vector.broadcast %cst_1 : f32 to vector<784x1xf32>
    %4 = arith.mulf %2, %3 : vector<784x1xf32>
    %5 = vector.broadcast %4 : vector<784x1xf32> to vector<784x192xf32>
    %6 = arith.subf %0, %5 : vector<784x192xf32>
    %7 = arith.mulf %6, %6 : vector<784x192xf32>
    %cst_2 = arith.constant dense<0.000000e+00> : vector<784xf32>
    %8 = vector.multi_reduction <add>, %7, %cst_2 [1] : vector<784x192xf32> to vector<784xf32>
    %9 = vector.shape_cast %8 : vector<784xf32> to vector<784x1xf32>
    %cst_3 = arith.constant 0.00520833349 : f32
    %10 = vector.broadcast %cst_3 : f32 to vector<784x1xf32>
    %11 = arith.mulf %9, %10 : vector<784x1xf32>
    %cst_4 = arith.constant 9.99999997E-7 : f32
    %12 = vector.broadcast %cst_4 : f32 to vector<784x1xf32>
    %13 = arith.addf %11, %12 : vector<784x1xf32>
    %14 = math.rsqrt %13 : vector<784x1xf32>
    %c0_5 = arith.constant 0 : index
    %c0_6 = arith.constant 0 : index
    %15 = vector.load %arg2[%c0_5, %c0_6] : memref<1x192xf32, #tpu.memory_space<vmem>>, vector<1x192xf32>
    %c0_7 = arith.constant 0 : index
    %c0_8 = arith.constant 0 : index
    %16 = vector.load %arg3[%c0_7, %c0_8] : memref<1x192xf32, #tpu.memory_space<vmem>>, vector<1x192xf32>
    %17 = vector.broadcast %14 : vector<784x1xf32> to vector<784x192xf32>
    %18 = arith.mulf %6, %17 : vector<784x192xf32>
    %19 = vector.broadcast %15 : vector<1x192xf32> to vector<784x192xf32>
    %20 = arith.mulf %18, %19 : vector<784x192xf32>
    %21 = vector.broadcast %16 : vector<1x192xf32> to vector<784x192xf32>
    %22 = arith.addf %20, %21 : vector<784x192xf32>
    %c0_9 = arith.constant 0 : index
    %c0_10 = arith.constant 0 : index
    %23 = vector.load %arg4[%c0_9, %c0_10] : memref<784x192xf32, #tpu.memory_space<vmem>>, vector<784x192xf32>
    tpu.vector_store %arg4[%c0_9, %c0_10], %22 {strides = array<i32>} : memref<784x192xf32, #tpu.memory_space<vmem>>, vector<784x192xf32>,
    return
  }
  func.func @transform_0(%arg0: i32) -> (i32, i32) {
    %c0_i32 = arith.constant 0 : i32
    %c0_i32_0 = arith.constant 0 : i32
    return %arg0, %c0_i32 : i32, i32
  }
  func.func @transform_1(%arg0: i32) -> (i32, i32) {
    %c0_i32 = arith.constant 0 : i32
    %c0_i32_0 = arith.constant 0 : i32
    %c0_i32_1 = arith.constant 0 : i32
    return %c0_i32, %c0_i32_0 : i32, i32
  }
  func.func @transform_2(%arg0: i32) -> (i32, i32) {
    %c0_i32 = arith.constant 0 : i32
    %c0_i32_0 = arith.constant 0 : i32
    %c0_i32_1 = arith.constant 0 : i32
    return %c0_i32, %c0_i32_0 : i32, i32
  }
  func.func @transform_3(%arg0: i32) -> (i32, i32) {
    %c0_i32 = arith.constant 0 : i32
    %c0_i32_0 = arith.constant 0 : i32
    return %arg0, %c0_i32 : i32, i32
  }
}

</mosaic_0001>

<bundles_post_ra>
// kernel: layernorm_pallas.1
= control target key start
LH: loop header
LB: loop body
LE: loop exit
PB: predicated region body
PF: predicated region fallthrough
CT: control target
= control target key end

     0   :  { %8 = vsyncpa [#allocation3], 0  ;;  %s6799_s0 = inlined_call_operand.hbm [shape: f32[3136,192], index: 0, kind: input, shape index: {}]   ;;  %s6800_s1 = inlined_call_operand.hbm [shape: f32[1,192], index: 1, kind: input, shape index: {}]   ;;  %s6801_s2 = inlined_call_operand.hbm [shape: f32[1,192], index: 2, kind: input, shape index: {}]   ;;  %s6802_s3 = inlined_call_operand.hbm [shape: f32[3136,192], index: 3, kind: output, shape index: {}]  }
   0x1   :  { %10 = vsyncpa [#allocation3 + $0x1], 0 }
   0x2   :  { %11 = vsyncpa [#allocation6], 0 }
   0x3   :  { %12 = vsyncpa [#allocation4], 0 }
   0x4   :  { %14 = vsyncpa [#allocation4 + $0x1], 0  ;;  %s3550_s12 = smov 0   ;;  %s3552_s13 = smov 0  }
   0x5   :  { %s3554_s14 = smov 0   ;;  %s3556_s15 = smov 0  }
   0x6 LB: > { %s3571_s16 = sadd.s32 4294967295, %s3520_s15   ;;  %s2897_s17 = sadd.s32 4294967294, %s3520_s15   ;;  %s3520_s15 = sphi %s3556_s15, %s7350_s15   ;;  %s3516_s14 = sphi %s3554_s14, %s7349_s14   ;;  %s3512_s13 = sphi %s3552_s13, %s7348_s13   ;;  %s3508_s12 = sphi %s3550_s12, %s7347_s12  }
   0x7   : > { %s3575_s18 = sadd.s32 1, %s3520_s15   ;;  %s27_s19 = sadd.s32 1, %s3516_s14 }
   0x8   : > { %s24_s20 = ssub.s32 %s3520_s15, %s3575_s18  ;;  %p34_p0 = scmp.ne.s32.totalorder %s3516_s14, %s3512_s13 }
   0x9   : > { %p25_p1 = scmp.eq.s32.totalorder %s24_s20, 0  ;;  %p35_p2 = scmp.eq.s32.totalorder %s3520_s15, 0 }
   0xa   : > { %p40_p3 = scmp.ne.s32.totalorder %s3512_s13, %s3508_s12  ;;  %p6803_p4 = scmp.eq.s32.totalorder %s3571_s16, 0 }
   0xb   : > { %s3587_s21 = scalar_select %p25_p1, %s3516_s14, %s27_s19  }
   0xc   : > { %p3589_p5 = por %p35_p2, %p34_p0  ;;  %p3595_p6 = por %p6803_p4, %p40_p3 }
   0xd   : > { %p106_p7 = scmp.eq.s32.totalorder %s3571_s16, 3  ;;  %p112_p8 = scmp.eq.s32.totalorder %s2897_s17, 3 }
   0xe   : > { %s6983_s23 = scalar_select %p3595_p6, 1, 0 }
   0xf   : > { %p2898_p9 = scmp.ge.s32.totalorder %s3520_s15, 1  ;;  %p119_p10 = scmp.lt.s32.totalorder %s3520_s15, 5 }
  0x10   : > { %p3602_p11 = por %p106_p7, %p34_p0  ;;  %p3606_p12 = por %p112_p8, %p40_p3 }
  0x11   : > { %p3610_p13 = pnand %p2898_p9, %p119_p10  ;;  %s3522_s27 = smov [#allocation5]  }
  0x12   : > { %s6984_s24 = scalar_select %p3602_p11, 1, 0 }
  0x13   : > { %s6985_s25 = scalar_select %p3606_p12, 1, 0 }
  0x14   : > { %s6986_s26 = scalar_select %p3610_p13, 1, 0 }
  0x15   : > { %p2931_p1 = pneg %p3610_p13  ;;  %s132_s28 = sshll.u32 %s3522_s27, 4  ;;  %s133_s28 = int_to_ptr.vmem [resolvable:$true] %s132_s28 }
  0x16   : > { %p2948_p2 = scmp.lt.s32.totalorder %s3520_s15, 4  ;;  %s3523_s4 = smov [#allocation7]  }
  0x17   : > { %p3619_p0 = pnand %p2931_p1, %p6803_p4  ;;  %s143_s5 = sshll.u32 %s3523_s4, 4  ;;  %s144_s5 = int_to_ptr.vmem [resolvable:$true] %s143_s5 }
  0x18   : > { %p3625_p3 = pnand %p2948_p2, %p3589_p5  ;;  %s3383_s6 = scalar_lea.vmem %s133_s28, 32 }
  0x19   : > { %p3374_p7 = pneg %p3619_p0  ;;  %p3384_p8 = scmp.ne.s32.totalorder %s133_s28, %s3383_s6 }
  0x1a   : > { %p3391_p1 = scmp.lt.s32.totalorder %s133_s28, %s133_s28  ;;  %p3392_p4 = scmp.lt.s32.totalorder %s3383_s6, %s3383_s6 }
  0x1b   : > { %p3386_p9 = pnand %p3384_p8, %p3374_p7 }
  0x1c   : > { %p3393_p12 = por %p3392_p4, %p3391_p1 }
  0x1d   : > { %p3387_p10 = pneg %p3386_p9 }
  0x1f   : > { %p3394_p11 = pnand %p3393_p12, %p3387_p10 }
  0x21   : > { %3397 = shalt.err (!%p3394_p11)
}
  0x22   : > { %2934 = dma.hbm_to_vmem [thread:$0]  (!%p3619_p0), %s6800_s1, 32, %s133_s28, [#allocation6]  }
  0x23   : > { %s154_s9 = sand.u32 1, %s3516_s14   ;;  %s3409_s10 = scalar_lea.vmem %s144_s5, 32 }
  0x24   : > { %p3410_p5 = scmp.ne.s32.totalorder %s144_s5, %s3409_s10  ;;  %p3417_p9 = scmp.lt.s32.totalorder %s144_s5, %s144_s5 }
  0x25   : > { %p3418_p6 = scmp.lt.s32.totalorder %s3409_s10, %s3409_s10 }
  0x26   : > { %p3412_p2 = pnand %p3410_p5, %p3374_p7 }
  0x27   : > { %p3419_p4 = por %p3418_p6, %p3417_p9 }
  0x28   : > { %p3413_p8 = pneg %p3412_p2 }
  0x2a   : > { %p3420_p12 = pnand %p3419_p4, %p3413_p8 }
  0x2c   : > { %3423 = shalt.err (!%p3420_p12)
}
  0x2d   : > { %2937 = dma.hbm_to_vmem [thread:$0]  (!%p3619_p0), %s6801_s2, 32, %s144_s5, [#allocation6]  }
  0x2e   : > { %s2917_s19 = smul.u32 1568, %s154_s9  ;;  %s3656_s29 = scalar_lea.sflag [#allocation3], %s154_s9 }
  0x2f   : > { %s2915_s20 = smul.u32 25088, %s3520_s15  ;;  %p3426_p11 = pneg %p3625_p3 }
  0x30   : > { %s158_s4 = scalar_lea.vmem [#allocation2], %s2917_s19  ;;  %s3429_s10 = scalar_lea.hbm %s6799_s0, 100352 }
  0x31   : > { %s3652_s28 = scalar_lea.hbm %s6799_s0, %s2915_s20  ;;  %s166_s6 = sshll.u32 %s158_s4, 4  ;;  %s3654_s6 = int_to_ptr.vmem [resolvable:$true] %s166_s6 }
  0x32   : > { %s3424_s7 = scalar_lea.hbm %s3652_s28, 25088  ;;  %p3430_p10 = scmp.lt.s32.totalorder %s3652_s28, %s6799_s0 }
  0x33   : > { %p3425_p6 = scmp.ne.s32.totalorder %s3652_s28, %s3424_s7  ;;  %p3431_p1 = scmp.lt.s32.totalorder %s3429_s10, %s3424_s7 }
  0x35   : > { %p3427_p0 = pnand %p3426_p11, %p3425_p6  ;;  %p3432_p5 = por %p3431_p1, %p3430_p10 }
  0x37   : > { %p3428_p7 = pneg %p3427_p0 }
  0x39   : > { %p3433_p2 = pnand %p3432_p5, %p3428_p7 }
  0x3b   : > { %3436 = shalt.err (!%p3433_p2)
}
  0x3c   : > { %s3437_s9 = scalar_lea.vmem %s3654_s6, 25088  ;;  %s3524_s19 = smov [#allocation2]  }
  0x3d   : > { %p3438_p8 = scmp.ne.s32.totalorder %s3654_s6, %s3437_s9  ;;  %s3442_s20 = sshll.u32 %s3524_s19, 4  ;;  %s3443_s20 = int_to_ptr.vmem [resolvable:$false] %s3442_s20 }
  0x3e   : > { %s3444_s22 = scalar_lea.vmem %s3443_s20, 50176  ;;  %p3445_p12 = scmp.lt.s32.totalorder %s3654_s6, %s3443_s20 }
  0x3f   : > { %p3440_p9 = pnand %p3438_p8, %p3426_p11  ;;  %p3446_p6 = scmp.lt.s32.totalorder %s3444_s22, %s3437_s9 }
  0x41   : > { %p3441_p4 = pneg %p3440_p9  ;;  %p3447_p0 = por %p3446_p6, %p3445_p12 }
  0x43   : > { %p3448_p13 = pnand %p3447_p0, %p3441_p4 }
  0x45   : > { %3451 = shalt.err (!%p3448_p13)
}
  0x46   : > { %s3525_s27 = smov 256   ;;  %s3526_s4 = smov 16  }
  0x47   : > { %2941 = dma.hbm_to_vmem [thread:$0]  (!%p3625_p3), %s3652_s28, 25088, %s3654_s6, %s3656_s29, %s3525_s27, %s3525_s27, %s3526_s4  }
  0x48   : > { %p6989_p11 = scmp.ne.s32.totalorder %s6986_s26, 0 }
  0x4a   : > { %178 = sbr.rel (%p6989_p11) target bundleno = 684 (0x2ac), region = 32 }
  0x4f   : > { %s3680_s7 = sand.u32 1, %s3512_s13   ;;  %p6990_p13 = scmp.ne.s32.totalorder %s6983_s23, 0 }
  0x50   : > { %s2918_s5 = smul.u32 1568, %s3680_s7  ;;  %s181_s8 = scalar_lea.sflag [#allocation3], %s3680_s7 }
  0x52   : > { %s3686_s10 = scalar_lea.vmem [#allocation2], %s2918_s5 }
  0x53   : > { %3495 = dma.done.wait (%p6990_p13), %s181_s8, 25088  }
  0x54   : > { %3497 = vsyncadd (%p6990_p13), %s181_s8, 4294942208  ;;  %p6991_p3 = scmp.eq.s32.totalorder %s3571_s16, 0 }
  0x56   : > { %3499 = dma.done.wait (%p6991_p3), [#allocation6], 64   ;;  %p6992_p7 = pmov %p6991_p3 }
  0x57   : > { %vm413_vm0 = vcmask 523264   ;;  %v3697_v0 = vld [vmem:[%s3686_s10 + $0x20] sm:$0xff]  ;;  %v3700_v1 = vld [vmem:[%s3686_s10 + $0x28] sm:$0xff]  ;;  %v3711_v5 = vld [vmem:[%s3686_s10 + $0x30] sm:$0xff]  ;;  %s5690_s23 = scalar_lea.vmem [#allocation8], %s2918_s5  ;;  %s2916_s26 = smul.u32 25088, %s3571_s16 }
  0x58   : > { %3501 = vsyncadd (%p6992_p7), [#allocation6], 4294967232  ;;  %v3703_v2 = vld [vmem:[%s3686_s10] sm:$0xff]  ;;  %v422_v3 = vsel %vm413_vm0, %v3700_v1, 0.0  ;;  %v3708_v4 = vld [vmem:[%s3686_s10 + $0x8] sm:$0xff]  ;;  %s2805_s16 = sshll.u32 %s5690_s23, 4  ;;  %s6751_s16 = int_to_ptr.vmem [resolvable:$true] %s2805_s16 }
  0x59   : > { %v3714_v6 = vld [vmem:[%s3686_s10 + $0x38] sm:$0xff]  ;;  %v423_v7 = vadd.f32 %v422_v3, %v3697_v0  ;;  %v414_v8 = vsel %vm413_vm0, %v3708_v4, 0.0  ;;  %v219_v10 = vld [vmem:[%s3686_s10 + $0x10] sm:$0xff]  ;;  %v3732_v15 = vld [vmem:[%s3686_s10 + $0x48] sm:$0xff]  ;;  %s6747_s6 = scalar_lea.hbm %s6802_s3, %s2916_s26  ;;  %s2791_s29 = scalar_lea.sflag [#allocation4], %s3680_s7 }
  0x5a   : > { %v426_v9 = vsel %vm413_vm0, %v3714_v6, 0.0  ;;  %v3723_v11 = vld [vmem:[%s3686_s10 + $0x18] sm:$0xff]  ;;  %v415_v12 = vadd.f32 %v414_v8, %v3703_v2  ;;  %v3736_v18 = vld [vmem:[%s3686_s10 + $0x50] sm:$0xff]  ;;  %v225_v20 = vld [vmem:[%s3686_s10 + $0x40] sm:$0xff]  ;;  %v430_v21 = vsel %vm413_vm0, %v3732_v15, 0.0  ;;  %s3452_s11 = scalar_lea.vmem %s6751_s16, 25088 }
  0x5b   : > { %v418_v13 = vsel %vm413_vm0, %v3723_v11, 0.0  ;;  %v3729_v14 = vld [vmem:[%s3686_s10 + $0x58] sm:$0xff]  ;;  %424 = vadd.xlane.f32.xlu1 %v423_v7  ;;  %v427_v16 = vadd.f32 %v426_v9, %v3711_v5  ;;  %v230_v23 = vld [vmem:[%s3686_s10 + $0x68] sm:$0xff]  ;;  %v431_v25 = vadd.f32 %v430_v21, %v225_v20  ;;  %v231_v26 = vld [vmem:[%s3686_s10 + $0x70] sm:$0xff]  ;;  %p3453_p10 = scmp.ne.s32.totalorder %s6751_s16, %s3452_s11  ;;  %p7345_p1 = scmp.ne.s32.totalorder %s6984_s24, 0 }
  0x5c   : > { %416 = vadd.xlane.f32.xlu0 %v415_v12  ;;  %v419_v17 = vadd.f32 %v418_v13, %v219_v10  ;;  %v434_v19 = vsel %vm413_vm0, %v3729_v14, 0.0  ;;  %v232_v22 = vld [vmem:[%s3686_s10 + $0x78] sm:$0xff]  ;;  %v229_v28 = vld [vmem:[%s3686_s10 + $0x60] sm:$0xff]  ;;  %v438_v29 = vsel %vm413_vm0, %v230_v23, 0.0  ;;  %v234_v31 = vld [vmem:[%s3686_s10 + $0x88] sm:$0xff]  ;;  %s3527_s17 = smov [#allocation8]  }
  0x5d   : > { %v435_v24 = vadd.f32 %v434_v19, %v3736_v18  ;;  %v442_v27 = vsel %vm413_vm0, %v232_v22, 0.0  ;;  %v236_v30 = vld [vmem:[%s3686_s10 + $0x98] sm:$0xff]  ;;  %v439_v33 = vadd.f32 %v438_v29, %v229_v28  ;;  %v235_v34 = vld [vmem:[%s3686_s10 + $0x90] sm:$0xff]  ;;  %v233_v36 = vld [vmem:[%s3686_s10 + $0x80] sm:$0xff]  ;;  %v446_v37 = vsel %vm413_vm0, %v234_v31, 0.0  ;;  %p3454_p5 = pnand %p3453_p10, %p7345_p1  ;;  %s3456_s9 = sshll.u32 %s3527_s17, 4  ;;  %s3457_s9 = int_to_ptr.vmem [resolvable:$false] %s3456_s9 }
  0x5e   : > { %v443_v32 = vadd.f32 %v442_v27, %v231_v26  ;;  %v450_v35 = vsel %vm413_vm0, %v236_v30, 0.0  ;;  %v240_v38 = vld [vmem:[%s3686_s10 + $0xb8] sm:$0xff]  ;;  %v238_v39 = vld [vmem:[%s3686_s10 + $0xa8] sm:$0xff]  ;;  %v447_v41 = vadd.f32 %v446_v37, %v233_v36  ;;  %v239_v42 = vld [vmem:[%s3686_s10 + $0xb0] sm:$0xff]  ;;  %s3458_s19 = scalar_lea.vmem %s3457_s9, 50176  ;;  %p3459_p8 = scmp.lt.s32.totalorder %s6751_s16, %s3457_s9 }
  0x5f   : > { %428 = vadd.xlane.f32.xlu1 %v427_v16  ;;  %v451_v40 = vadd.f32 %v450_v35, %v235_v34  ;;  %v458_v43 = vsel %vm413_vm0, %v240_v38, 0.0  ;;  %v237_v44 = vld [vmem:[%s3686_s10 + $0xa0] sm:$0xff]  ;;  %v454_v45 = vsel %vm413_vm0, %v238_v39, 0.0  ;;  %v244_v46 = vld [vmem:[%s3686_s10 + $0xd8] sm:$0xff]  ;;  %v242_v47 = vld [vmem:[%s3686_s10 + $0xc8] sm:$0xff]  ;;  %p3455_p2 = pneg %p3454_p5  ;;  %p3460_p9 = scmp.lt.s32.totalorder %s3458_s19, %s3452_s11 }
  0x60   : > { %420 = vadd.xlane.f32.xlu0 %v419_v17  ;;  %v459_v48 = vadd.f32 %v458_v43, %v239_v42  ;;  %v455_v49 = vadd.f32 %v454_v45, %v237_v44  ;;  %v243_v50 = vld [vmem:[%s3686_s10 + $0xd0] sm:$0xff]  ;;  %v466_v51 = vsel %vm413_vm0, %v244_v46, 0.0  ;;  %v241_v52 = vld [vmem:[%s3686_s10 + $0xc0] sm:$0xff]  ;;  %v462_v53 = vsel %vm413_vm0, %v242_v47, 0.0  ;;  %v248_v54 = vld [vmem:[%s3686_s10 + $0xf8] sm:$0xff] }
  0x61   : > { %v246_v55 = vld [vmem:[%s3686_s10 + $0xe8] sm:$0xff]  ;;  %v467_v56 = vadd.f32 %v466_v51, %v243_v50  ;;  %v463_v57 = vadd.f32 %v462_v53, %v241_v52  ;;  %v247_v58 = vld [vmem:[%s3686_s10 + $0xf0] sm:$0xff]  ;;  %v474_v59 = vsel %vm413_vm0, %v248_v54, 0.0  ;;  %v245_v60 = vld [vmem:[%s3686_s10 + $0xe0] sm:$0xff]  ;;  %p3461_p4 = por %p3460_p9, %p3459_p8 }
  0x62   : > { %v470_v61 = vsel %vm413_vm0, %v246_v55, 0.0  ;;  %v252_v62 = vld [vmem:[%s3686_s10 + $0x118] sm:$0xff]  ;;  %v250_v63 = vld [vmem:[%s3686_s10 + $0x108] sm:$0xff]  ;;  %v475_v3 = vadd.f32 %v474_v59, %v247_v58  ;;  %v251_v8 = vld [vmem:[%s3686_s10 + $0x110] sm:$0xff] }
  0x63   : > { %436 = vadd.xlane.f32.xlu1 %v435_v24  ;;  %v471_v7 = vadd.f32 %v470_v61, %v245_v60  ;;  %v482_v9 = vsel %vm413_vm0, %v252_v62, 0.0  ;;  %v249_v10 = vld [vmem:[%s3686_s10 + $0x100] sm:$0xff]  ;;  %v478_v12 = vsel %vm413_vm0, %v250_v63, 0.0  ;;  %v256_v13 = vld [vmem:[%s3686_s10 + $0x138] sm:$0xff]  ;;  %v254_v16 = vld [vmem:[%s3686_s10 + $0x128] sm:$0xff]  ;;  %p3462_p12 = pnand %p3461_p4, %p3455_p2 }
  0x64   : > { %432 = vadd.xlane.f32.xlu0 %v431_v25  ;;  %v483_v17 = vadd.f32 %v482_v9, %v251_v8  ;;  %v479_v19 = vadd.f32 %v478_v12, %v249_v10  ;;  %v255_v20 = vld [vmem:[%s3686_s10 + $0x130] sm:$0xff]  ;;  %v490_v21 = vsel %vm413_vm0, %v256_v13, 0.0  ;;  %v253_v22 = vld [vmem:[%s3686_s10 + $0x120] sm:$0xff]  ;;  %v486_v23 = vsel %vm413_vm0, %v254_v16, 0.0  ;;  %v260_v24 = vld [vmem:[%s3686_s10 + $0x158] sm:$0xff] }
  0x65   : > { %v258_v25 = vld [vmem:[%s3686_s10 + $0x148] sm:$0xff]  ;;  %v491_v26 = vadd.f32 %v490_v21, %v255_v20  ;;  %v487_v27 = vadd.f32 %v486_v23, %v253_v22  ;;  %v259_v28 = vld [vmem:[%s3686_s10 + $0x150] sm:$0xff]  ;;  %v498_v29 = vsel %vm413_vm0, %v260_v24, 0.0  ;;  %v257_v30 = vld [vmem:[%s3686_s10 + $0x140] sm:$0xff] }
  0x66   : > { %v494_v31 = vsel %vm413_vm0, %v258_v25, 0.0  ;;  %v499_v34 = vadd.f32 %v498_v29, %v259_v28  ;;  %v263_v36 = vld [vmem:[%s3686_s10 + $0x170] sm:$0xff]  ;;  %v261_v38 = vld [vmem:[%s3686_s10 + $0x160] sm:$0xff] }
  0x67   : > { %444 = vadd.xlane.f32.xlu1 %v443_v32  ;;  %v264_v32 = vld [vmem:[%s3686_s10 + $0x178] sm:$0xff]  ;;  %v495_v35 = vadd.f32 %v494_v31, %v257_v30  ;;  %v267_v44 = vld [vmem:[%s3686_s10 + $0x190] sm:$0xff]  ;;  %v265_v46 = vld [vmem:[%s3686_s10 + $0x180] sm:$0xff] }
  0x68   : > { %440 = vadd.xlane.f32.xlu0 %v439_v33  ;;  %v262_v33 = vld [vmem:[%s3686_s10 + $0x168] sm:$0xff]  ;;  %v506_v37 = vsel %vm413_vm0, %v264_v32, 0.0  ;;  %v271_v52 = vld [vmem:[%s3686_s10 + $0x1b0] sm:$0xff]  ;;  %v269_v54 = vld [vmem:[%s3686_s10 + $0x1a0] sm:$0xff] }
  0x69   : > { %v502_v39 = vsel %vm413_vm0, %v262_v33, 0.0  ;;  %v507_v42 = vadd.f32 %v506_v37, %v263_v36  ;;  %v275_v60 = vld [vmem:[%s3686_s10 + $0x1d0] sm:$0xff]  ;;  %v273_v62 = vld [vmem:[%s3686_s10 + $0x1c0] sm:$0xff] }
  0x6a   : > { %v503_v43 = vadd.f32 %v502_v39, %v261_v38  ;;  %v279_v10 = vld [vmem:[%s3686_s10 + $0x1f0] sm:$0xff]  ;;  %v277_v13 = vld [vmem:[%s3686_s10 + $0x1e0] sm:$0xff] }
  0x6b   : > { %452 = vadd.xlane.f32.xlu1 %v451_v40  ;;  %v268_v40 = vld [vmem:[%s3686_s10 + $0x198] sm:$0xff]  ;;  %v283_v22 = vld [vmem:[%s3686_s10 + $0x210] sm:$0xff]  ;;  %v281_v24 = vld [vmem:[%s3686_s10 + $0x200] sm:$0xff] }
  0x6c   : > { %448 = vadd.xlane.f32.xlu0 %v447_v41  ;;  %v266_v41 = vld [vmem:[%s3686_s10 + $0x188] sm:$0xff]  ;;  %v514_v45 = vsel %vm413_vm0, %v268_v40, 0.0  ;;  %v287_v30 = vld [vmem:[%s3686_s10 + $0x230] sm:$0xff]  ;;  %v285_v32 = vld [vmem:[%s3686_s10 + $0x220] sm:$0xff] }
  0x6d   : > { %v510_v47 = vsel %vm413_vm0, %v266_v41, 0.0  ;;  %v515_v50 = vadd.f32 %v514_v45, %v267_v44  ;;  %v291_v38 = vld [vmem:[%s3686_s10 + $0x250] sm:$0xff]  ;;  %v289_v40 = vld [vmem:[%s3686_s10 + $0x240] sm:$0xff] }
  0x6e   : > { %v511_v51 = vadd.f32 %v510_v47, %v265_v46  ;;  %v295_v46 = vld [vmem:[%s3686_s10 + $0x270] sm:$0xff] }
  0x6f   : > { %460 = vadd.xlane.f32.xlu1 %v459_v48  ;;  %v272_v48 = vld [vmem:[%s3686_s10 + $0x1b8] sm:$0xff] }
  0x70   : > { %456 = vadd.xlane.f32.xlu0 %v455_v49  ;;  %v270_v49 = vld [vmem:[%s3686_s10 + $0x1a8] sm:$0xff]  ;;  %v522_v53 = vsel %vm413_vm0, %v272_v48, 0.0  ;;  %v293_v48 = vld [vmem:[%s3686_s10 + $0x260] sm:$0xff] }
  0x71   : > { %v518_v55 = vsel %vm413_vm0, %v270_v49, 0.0  ;;  %v523_v58 = vadd.f32 %v522_v53, %v271_v52 }
  0x72   : > { %v519_v59 = vadd.f32 %v518_v55, %v269_v54  ;;  %v299_v54 = vld [vmem:[%s3686_s10 + $0x290] sm:$0xff] }
  0x73   : > { %468 = vadd.xlane.f32.xlu1 %v467_v56  ;;  %v276_v56 = vld [vmem:[%s3686_s10 + $0x1d8] sm:$0xff] }
  0x74   : > { %464 = vadd.xlane.f32.xlu0 %v463_v57  ;;  %v274_v57 = vld [vmem:[%s3686_s10 + $0x1c8] sm:$0xff]  ;;  %v530_v61 = vsel %vm413_vm0, %v276_v56, 0.0  ;;  %v297_v56 = vld [vmem:[%s3686_s10 + $0x280] sm:$0xff] }
  0x75   : > { %v526_v63 = vsel %vm413_vm0, %v274_v57, 0.0  ;;  %v531_v8 = vadd.f32 %v530_v61, %v275_v60 }
  0x76   : > { %v527_v9 = vadd.f32 %v526_v63, %v273_v62  ;;  %v303_v62 = vld [vmem:[%s3686_s10 + $0x2b0] sm:$0xff] }
  0x77   : > { %476 = vadd.xlane.f32.xlu1 %v475_v3  ;;  %v280_v3 = vld [vmem:[%s3686_s10 + $0x1f8] sm:$0xff] }
  0x78   : > { %472 = vadd.xlane.f32.xlu0 %v471_v7  ;;  %v278_v7 = vld [vmem:[%s3686_s10 + $0x1e8] sm:$0xff]  ;;  %v538_v12 = vsel %vm413_vm0, %v280_v3, 0.0  ;;  %v301_v3 = vld [vmem:[%s3686_s10 + $0x2a0] sm:$0xff] }
  0x79   : > { %v534_v16 = vsel %vm413_vm0, %v278_v7, 0.0  ;;  %v539_v20 = vadd.f32 %v538_v12, %v279_v10 }
  0x7a   : > { %v535_v21 = vadd.f32 %v534_v16, %v277_v13  ;;  %v307_v13 = vld [vmem:[%s3686_s10 + $0x2d0] sm:$0xff] }
  0x7b   : > { %484 = vadd.xlane.f32.xlu1 %v483_v17  ;;  %v284_v17 = vld [vmem:[%s3686_s10 + $0x218] sm:$0xff] }
  0x7c   : > { %480 = vadd.xlane.f32.xlu0 %v479_v19  ;;  %v282_v19 = vld [vmem:[%s3686_s10 + $0x208] sm:$0xff]  ;;  %v546_v23 = vsel %vm413_vm0, %v284_v17, 0.0  ;;  %v305_v17 = vld [vmem:[%s3686_s10 + $0x2c0] sm:$0xff] }
  0x7d   : > { %v542_v25 = vsel %vm413_vm0, %v282_v19, 0.0  ;;  %v547_v28 = vadd.f32 %v546_v23, %v283_v22 }
  0x7e   : > { %v543_v29 = vadd.f32 %v542_v25, %v281_v24  ;;  %v311_v24 = vld [vmem:[%s3686_s10 + $0x2f0] sm:$0xff] }
  0x7f   : > { %492 = vadd.xlane.f32.xlu1 %v491_v26  ;;  %v288_v26 = vld [vmem:[%s3686_s10 + $0x238] sm:$0xff] }
  0x80   : > { %488 = vadd.xlane.f32.xlu0 %v487_v27  ;;  %v286_v27 = vld [vmem:[%s3686_s10 + $0x228] sm:$0xff]  ;;  %v554_v31 = vsel %vm413_vm0, %v288_v26, 0.0  ;;  %v309_v26 = vld [vmem:[%s3686_s10 + $0x2e0] sm:$0xff] }
  0x81   : > { %v550_v33 = vsel %vm413_vm0, %v286_v27, 0.0  ;;  %v555_v36 = vadd.f32 %v554_v31, %v287_v30 }
  0x82   : > { %v551_v37 = vadd.f32 %v550_v33, %v285_v32  ;;  %v315_v32 = vld [vmem:[%s3686_s10 + $0x310] sm:$0xff] }
  0x83   : > { %500 = vadd.xlane.f32.xlu1 %v499_v34  ;;  %v292_v34 = vld [vmem:[%s3686_s10 + $0x258] sm:$0xff] }
  0x84   : > { %496 = vadd.xlane.f32.xlu0 %v495_v35  ;;  %v290_v35 = vld [vmem:[%s3686_s10 + $0x248] sm:$0xff]  ;;  %v562_v39 = vsel %vm413_vm0, %v292_v34, 0.0  ;;  %v313_v34 = vld [vmem:[%s3686_s10 + $0x300] sm:$0xff] }
  0x85   : > { %v558_v41 = vsel %vm413_vm0, %v290_v35, 0.0  ;;  %v563_v44 = vadd.f32 %v562_v39, %v291_v38 }
  0x86   : > { %v559_v45 = vadd.f32 %v558_v41, %v289_v40  ;;  %v319_v40 = vld [vmem:[%s3686_s10 + $0x330] sm:$0xff] }
  0x87   : > { %508 = vadd.xlane.f32.xlu1 %v507_v42  ;;  %v296_v42 = vld [vmem:[%s3686_s10 + $0x278] sm:$0xff] }
  0x88   : > { %504 = vadd.xlane.f32.xlu0 %v503_v43  ;;  %v294_v43 = vld [vmem:[%s3686_s10 + $0x268] sm:$0xff]  ;;  %v570_v47 = vsel %vm413_vm0, %v296_v42, 0.0  ;;  %v317_v42 = vld [vmem:[%s3686_s10 + $0x320] sm:$0xff] }
  0x89   : > { %v566_v49 = vsel %vm413_vm0, %v294_v43, 0.0  ;;  %v571_v52 = vadd.f32 %v570_v47, %v295_v46 }
  0x8a   : > { %v567_v53 = vadd.f32 %v566_v49, %v293_v48  ;;  %v323_v48 = vld [vmem:[%s3686_s10 + $0x350] sm:$0xff] }
  0x8b   : > { %516 = vadd.xlane.f32.xlu1 %v515_v50  ;;  %v300_v50 = vld [vmem:[%s3686_s10 + $0x298] sm:$0xff] }
  0x8c   : > { %512 = vadd.xlane.f32.xlu0 %v511_v51  ;;  %v298_v51 = vld [vmem:[%s3686_s10 + $0x288] sm:$0xff]  ;;  %v578_v55 = vsel %vm413_vm0, %v300_v50, 0.0  ;;  %v321_v50 = vld [vmem:[%s3686_s10 + $0x340] sm:$0xff] }
  0x8d   : > { %v574_v57 = vsel %vm413_vm0, %v298_v51, 0.0  ;;  %v579_v60 = vadd.f32 %v578_v55, %v299_v54 }
  0x8e   : > { %v575_v61 = vadd.f32 %v574_v57, %v297_v56  ;;  %v327_v56 = vld [vmem:[%s3686_s10 + $0x370] sm:$0xff] }
  0x8f   : > { %524 = vadd.xlane.f32.xlu1 %v523_v58  ;;  %v304_v58 = vld [vmem:[%s3686_s10 + $0x2b8] sm:$0xff] }
  0x90   : > { %520 = vadd.xlane.f32.xlu0 %v519_v59  ;;  %v302_v59 = vld [vmem:[%s3686_s10 + $0x2a8] sm:$0xff]  ;;  %v586_v63 = vsel %vm413_vm0, %v304_v58, 0.0  ;;  %v325_v58 = vld [vmem:[%s3686_s10 + $0x360] sm:$0xff] }
  0x91   : > { %v582_v7 = vsel %vm413_vm0, %v302_v59, 0.0  ;;  %v587_v10 = vadd.f32 %v586_v63, %v303_v62 }
  0x92   : > { %v583_v12 = vadd.f32 %v582_v7, %v301_v3  ;;  %v331_v3 = vld [vmem:[%s3686_s10 + $0x390] sm:$0xff] }
  0x93   : > { %532 = vadd.xlane.f32.xlu1 %v531_v8  ;;  %v308_v8 = vld [vmem:[%s3686_s10 + $0x2d8] sm:$0xff] }
  0x94   : > { %528 = vadd.xlane.f32.xlu0 %v527_v9  ;;  %v306_v9 = vld [vmem:[%s3686_s10 + $0x2c8] sm:$0xff]  ;;  %v594_v16 = vsel %vm413_vm0, %v308_v8, 0.0  ;;  %v329_v8 = vld [vmem:[%s3686_s10 + $0x380] sm:$0xff] }
  0x95   : > { %v590_v19 = vsel %vm413_vm0, %v306_v9, 0.0  ;;  %v595_v22 = vadd.f32 %v594_v16, %v307_v13 }
  0x96   : > { %v591_v23 = vadd.f32 %v590_v19, %v305_v17  ;;  %v335_v17 = vld [vmem:[%s3686_s10 + $0x3b0] sm:$0xff] }
  0x97   : > { %540 = vadd.xlane.f32.xlu1 %v539_v20  ;;  %v312_v20 = vld [vmem:[%s3686_s10 + $0x2f8] sm:$0xff] }
  0x98   : > { %536 = vadd.xlane.f32.xlu0 %v535_v21  ;;  %v310_v21 = vld [vmem:[%s3686_s10 + $0x2e8] sm:$0xff]  ;;  %v602_v25 = vsel %vm413_vm0, %v312_v20, 0.0  ;;  %v333_v20 = vld [vmem:[%s3686_s10 + $0x3a0] sm:$0xff] }
  0x99   : > { %v598_v27 = vsel %vm413_vm0, %v310_v21, 0.0  ;;  %v603_v30 = vadd.f32 %v602_v25, %v311_v24 }
  0x9a   : > { %v599_v31 = vadd.f32 %v598_v27, %v309_v26  ;;  %v339_v26 = vld [vmem:[%s3686_s10 + $0x3d0] sm:$0xff] }
  0x9b   : > { %548 = vadd.xlane.f32.xlu1 %v547_v28  ;;  %v316_v28 = vld [vmem:[%s3686_s10 + $0x318] sm:$0xff] }
  0x9c   : > { %544 = vadd.xlane.f32.xlu0 %v543_v29  ;;  %v314_v29 = vld [vmem:[%s3686_s10 + $0x308] sm:$0xff]  ;;  %v610_v33 = vsel %vm413_vm0, %v316_v28, 0.0  ;;  %v337_v28 = vld [vmem:[%s3686_s10 + $0x3c0] sm:$0xff] }
  0x9d   : > { %v606_v35 = vsel %vm413_vm0, %v314_v29, 0.0  ;;  %v611_v38 = vadd.f32 %v610_v33, %v315_v32 }
  0x9e   : > { %v607_v39 = vadd.f32 %v606_v35, %v313_v34  ;;  %v343_v34 = vld [vmem:[%s3686_s10 + $0x3f0] sm:$0xff] }
  0x9f   : > { %556 = vadd.xlane.f32.xlu1 %v555_v36  ;;  %v320_v36 = vld [vmem:[%s3686_s10 + $0x338] sm:$0xff] }
  0xa0   : > { %552 = vadd.xlane.f32.xlu0 %v551_v37  ;;  %v318_v37 = vld [vmem:[%s3686_s10 + $0x328] sm:$0xff]  ;;  %v618_v41 = vsel %vm413_vm0, %v320_v36, 0.0  ;;  %v341_v36 = vld [vmem:[%s3686_s10 + $0x3e0] sm:$0xff] }
  0xa1   : > { %v614_v43 = vsel %vm413_vm0, %v318_v37, 0.0  ;;  %v619_v46 = vadd.f32 %v618_v41, %v319_v40 }
  0xa2   : > { %v615_v47 = vadd.f32 %v614_v43, %v317_v42  ;;  %v347_v42 = vld [vmem:[%s3686_s10 + $0x410] sm:$0xff] }
  0xa3   : > { %564 = vadd.xlane.f32.xlu1 %v563_v44  ;;  %v324_v44 = vld [vmem:[%s3686_s10 + $0x358] sm:$0xff] }
  0xa4   : > { %560 = vadd.xlane.f32.xlu0 %v559_v45  ;;  %v322_v45 = vld [vmem:[%s3686_s10 + $0x348] sm:$0xff]  ;;  %v626_v49 = vsel %vm413_vm0, %v324_v44, 0.0  ;;  %v345_v44 = vld [vmem:[%s3686_s10 + $0x400] sm:$0xff] }
  0xa5   : > { %v622_v51 = vsel %vm413_vm0, %v322_v45, 0.0  ;;  %v627_v54 = vadd.f32 %v626_v49, %v323_v48 }
  0xa6   : > { %v623_v55 = vadd.f32 %v622_v51, %v321_v50  ;;  %v351_v50 = vld [vmem:[%s3686_s10 + $0x430] sm:$0xff] }
  0xa7   : > { %572 = vadd.xlane.f32.xlu1 %v571_v52  ;;  %v328_v52 = vld [vmem:[%s3686_s10 + $0x378] sm:$0xff] }
  0xa8   : > { %568 = vadd.xlane.f32.xlu0 %v567_v53  ;;  %v326_v53 = vld [vmem:[%s3686_s10 + $0x368] sm:$0xff]  ;;  %v634_v57 = vsel %vm413_vm0, %v328_v52, 0.0  ;;  %v349_v52 = vld [vmem:[%s3686_s10 + $0x420] sm:$0xff] }
  0xa9   : > { %v630_v59 = vsel %vm413_vm0, %v326_v53, 0.0  ;;  %v635_v62 = vadd.f32 %v634_v57, %v327_v56 }
  0xaa   : > { %v631_v63 = vadd.f32 %v630_v59, %v325_v58  ;;  %v355_v58 = vld [vmem:[%s3686_s10 + $0x450] sm:$0xff] }
  0xab   : > { %580 = vadd.xlane.f32.xlu1 %v579_v60  ;;  %v332_v60 = vld [vmem:[%s3686_s10 + $0x398] sm:$0xff] }
  0xac   : > { %576 = vadd.xlane.f32.xlu0 %v575_v61  ;;  %v330_v61 = vld [vmem:[%s3686_s10 + $0x388] sm:$0xff]  ;;  %v642_v7 = vsel %vm413_vm0, %v332_v60, 0.0  ;;  %v353_v60 = vld [vmem:[%s3686_s10 + $0x440] sm:$0xff] }
  0xad   : > { %v638_v9 = vsel %vm413_vm0, %v330_v61, 0.0  ;;  %v643_v13 = vadd.f32 %v642_v7, %v331_v3 }
  0xae   : > { %v639_v16 = vadd.f32 %v638_v9, %v329_v8  ;;  %v359_v8 = vld [vmem:[%s3686_s10 + $0x470] sm:$0xff] }
  0xaf   : > { %588 = vadd.xlane.f32.xlu1 %v587_v10  ;;  %v336_v10 = vld [vmem:[%s3686_s10 + $0x3b8] sm:$0xff] }
  0xb0   : > { %584 = vadd.xlane.f32.xlu0 %v583_v12  ;;  %v334_v12 = vld [vmem:[%s3686_s10 + $0x3a8] sm:$0xff]  ;;  %v650_v19 = vsel %vm413_vm0, %v336_v10, 0.0  ;;  %v357_v10 = vld [vmem:[%s3686_s10 + $0x460] sm:$0xff] }
  0xb1   : > { %v646_v21 = vsel %vm413_vm0, %v334_v12, 0.0  ;;  %v651_v24 = vadd.f32 %v650_v19, %v335_v17 }
  0xb2   : > { %v647_v25 = vadd.f32 %v646_v21, %v333_v20  ;;  %v363_v21 = vld [vmem:[%s3686_s10 + $0x490] sm:$0xff] }
  0xb3   : > { %596 = vadd.xlane.f32.xlu1 %v595_v22  ;;  %v340_v22 = vld [vmem:[%s3686_s10 + $0x3d8] sm:$0xff] }
  0xb4   : > { %592 = vadd.xlane.f32.xlu0 %v591_v23  ;;  %v338_v23 = vld [vmem:[%s3686_s10 + $0x3c8] sm:$0xff]  ;;  %v658_v27 = vsel %vm413_vm0, %v340_v22, 0.0 }
  0xb5   : > { %v654_v29 = vsel %vm413_vm0, %v338_v23, 0.0  ;;  %v659_v32 = vadd.f32 %v658_v27, %v339_v26  ;;  %v368_v26 = vld [vmem:[%s3686_s10 + $0x4b8] sm:$0xff]  ;;  %v366_v27 = vld [vmem:[%s3686_s10 + $0x4a8] sm:$0xff] }
  0xb6   : > { %v655_v33 = vadd.f32 %v654_v29, %v337_v28 }
  0xb7   : > { %604 = vadd.xlane.f32.xlu1 %v603_v30  ;;  %v344_v30 = vld [vmem:[%s3686_s10 + $0x3f8] sm:$0xff] }
  0xb8   : > { %600 = vadd.xlane.f32.xlu0 %v599_v31  ;;  %v342_v31 = vld [vmem:[%s3686_s10 + $0x3e8] sm:$0xff]  ;;  %v666_v35 = vsel %vm413_vm0, %v344_v30, 0.0 }
  0xb9   : > { %v662_v37 = vsel %vm413_vm0, %v342_v31, 0.0  ;;  %v667_v40 = vadd.f32 %v666_v35, %v343_v34  ;;  %v367_v31 = vld [vmem:[%s3686_s10 + $0x4b0] sm:$0xff]  ;;  %v365_v34 = vld [vmem:[%s3686_s10 + $0x4a0] sm:$0xff]  ;;  %v710_v35 = vsel %vm413_vm0, %v366_v27, 0.0 }
  0xba   : > { %v663_v41 = vadd.f32 %v662_v37, %v341_v36  ;;  %v372_v36 = vld [vmem:[%s3686_s10 + $0x4d8] sm:$0xff]  ;;  %v370_v37 = vld [vmem:[%s3686_s10 + $0x4c8] sm:$0xff] }
  0xbb   : > { %612 = vadd.xlane.f32.xlu1 %v611_v38  ;;  %v348_v38 = vld [vmem:[%s3686_s10 + $0x418] sm:$0xff] }
  0xbc   : > { %608 = vadd.xlane.f32.xlu0 %v607_v39  ;;  %v346_v39 = vld [vmem:[%s3686_s10 + $0x408] sm:$0xff]  ;;  %v674_v43 = vsel %vm413_vm0, %v348_v38, 0.0 }
  0xbd   : > { %v670_v45 = vsel %vm413_vm0, %v346_v39, 0.0  ;;  %v675_v48 = vadd.f32 %v674_v43, %v347_v42  ;;  %v722_v42 = vsel %vm413_vm0, %v372_v36, 0.0  ;;  %v392_v36 = vld [vmem:[%s3686_s10 + $0x578] sm:$0xff] }
  0xbe   : > { %v671_v49 = vadd.f32 %v670_v45, %v345_v44  ;;  %v369_v44 = vld [vmem:[%s3686_s10 + $0x4c0] sm:$0xff]  ;;  %v718_v45 = vsel %vm413_vm0, %v370_v37, 0.0  ;;  %v390_v37 = vld [vmem:[%s3686_s10 + $0x568] sm:$0xff] }
  0xbf   : > { %620 = vadd.xlane.f32.xlu1 %v619_v46  ;;  %v352_v46 = vld [vmem:[%s3686_s10 + $0x438] sm:$0xff] }
  0xc0   : > { %616 = vadd.xlane.f32.xlu0 %v615_v47  ;;  %v350_v47 = vld [vmem:[%s3686_s10 + $0x428] sm:$0xff]  ;;  %v682_v51 = vsel %vm413_vm0, %v352_v46, 0.0  ;;  %v376_v46 = vld [vmem:[%s3686_s10 + $0x4f8] sm:$0xff] }
  0xc1   : > { %v678_v53 = vsel %vm413_vm0, %v350_v47, 0.0  ;;  %v683_v56 = vadd.f32 %v682_v51, %v351_v50  ;;  %v374_v47 = vld [vmem:[%s3686_s10 + $0x4e8] sm:$0xff]  ;;  %v719_v50 = vadd.f32 %v718_v45, %v369_v44  ;;  %v375_v51 = vld [vmem:[%s3686_s10 + $0x4f0] sm:$0xff] }
  0xc2   : > { %v679_v57 = vadd.f32 %v678_v53, %v349_v52  ;;  %v730_v52 = vsel %vm413_vm0, %v376_v46, 0.0  ;;  %v391_v45 = vld [vmem:[%s3686_s10 + $0x570] sm:$0xff]  ;;  %v762_v46 = vsel %vm413_vm0, %v392_v36, 0.0  ;;  %v401_v36 = vld [vmem:[%s3686_s10 + $0x5c0] sm:$0xff] }
  0xc3   : > { %628 = vadd.xlane.f32.xlu1 %v627_v54  ;;  %v356_v54 = vld [vmem:[%s3686_s10 + $0x458] sm:$0xff] }
  0xc4   : > { %624 = vadd.xlane.f32.xlu0 %v623_v55  ;;  %v354_v55 = vld [vmem:[%s3686_s10 + $0x448] sm:$0xff]  ;;  %v690_v59 = vsel %vm413_vm0, %v356_v54, 0.0  ;;  %v373_v54 = vld [vmem:[%s3686_s10 + $0x4e0] sm:$0xff] }
  0xc5   : > { %v686_v61 = vsel %vm413_vm0, %v354_v55, 0.0  ;;  %v691_v3 = vadd.f32 %v690_v59, %v355_v58  ;;  %v726_v55 = vsel %vm413_vm0, %v374_v47, 0.0  ;;  %v731_v58 = vadd.f32 %v730_v52, %v375_v51  ;;  %v400_v47 = vld [vmem:[%s3686_s10 + $0x5b8] sm:$0xff]  ;;  %v389_v52 = vld [vmem:[%s3686_s10 + $0x560] sm:$0xff] }
  0xc6   : > { %v687_v7 = vadd.f32 %v686_v61, %v353_v60  ;;  %v727_v60 = vadd.f32 %v726_v55, %v373_v54  ;;  %v379_v61 = vld [vmem:[%s3686_s10 + $0x510] sm:$0xff]  ;;  %v758_v54 = vsel %vm413_vm0, %v390_v37, 0.0 }
  0xc7   : > { %636 = vadd.xlane.f32.xlu1 %v635_v62  ;;  %v360_v62 = vld [vmem:[%s3686_s10 + $0x478] sm:$0xff]  ;;  %v395_v55 = vld [vmem:[%s3686_s10 + $0x590] sm:$0xff] }
  0xc8   : > { %632 = vadd.xlane.f32.xlu0 %v631_v63  ;;  %v358_v63 = vld [vmem:[%s3686_s10 + $0x468] sm:$0xff]  ;;  %v698_v9 = vsel %vm413_vm0, %v360_v62, 0.0 }
  0xc9   : > { %v694_v12 = vsel %vm413_vm0, %v358_v63, 0.0  ;;  %v699_v17 = vadd.f32 %v698_v9, %v359_v8  ;;  %v384_v8 = vld [vmem:[%s3686_s10 + $0x538] sm:$0xff]  ;;  %v382_v9 = vld [vmem:[%s3686_s10 + $0x528] sm:$0xff] }
  0xca   : > { %v695_v20 = vadd.f32 %v694_v12, %v357_v10 }
  0xcb   : > { %644 = vadd.xlane.f32.xlu1 %v643_v13  ;;  %v364_v13 = vld [vmem:[%s3686_s10 + $0x498] sm:$0xff] }
  0xcc   : > { %640 = vadd.xlane.f32.xlu0 %v639_v16  ;;  %v362_v16 = vld [vmem:[%s3686_s10 + $0x488] sm:$0xff]  ;;  %v706_v22 = vsel %vm413_vm0, %v364_v13, 0.0 }
  0xcd   : > { %v707_v28 = vadd.f32 %v706_v22, %v363_v21  ;;  %v381_v21 = vld [vmem:[%s3686_s10 + $0x520] sm:$0xff]  ;;  %v742_v22 = vsel %vm413_vm0, %v382_v9, 0.0 }
  0xcf   : > { %652 = vadd.xlane.f32.xlu1 %v651_v24  ;;  %v361_v24 = vld [vmem:[%s3686_s10 + $0x480] sm:$0xff] }
  0xd0   : > { %648 = vadd.xlane.f32.xlu0 %v647_v25  ;;  %v702_v25 = vsel %vm413_vm0, %v362_v16, 0.0  ;;  %v383_v16 = vld [vmem:[%s3686_s10 + $0x530] sm:$0xff] }
  0xd1   : > { %v703_v30 = vadd.f32 %v702_v25, %v361_v24  ;;  %v388_v24 = vld [vmem:[%s3686_s10 + $0x558] sm:$0xff]  ;;  %v386_v25 = vld [vmem:[%s3686_s10 + $0x548] sm:$0xff] }
  0xd3   : > { %660 = vadd.xlane.f32.xlu1 %v659_v32  ;;  %v714_v32 = vsel %vm413_vm0, %v368_v26, 0.0 }
  0xd4   : > { %656 = vadd.xlane.f32.xlu0 %v655_v33  ;;  %v715_v38 = vadd.f32 %v714_v32, %v367_v31  ;;  %v754_v31 = vsel %vm413_vm0, %v388_v24, 0.0 }
  0xd7   : > { %668 = vadd.xlane.f32.xlu1 %v667_v40  ;;  %v711_v40 = vadd.f32 %v710_v35, %v365_v34  ;;  %v385_v34 = vld [vmem:[%s3686_s10 + $0x540] sm:$0xff]  ;;  %v750_v35 = vsel %vm413_vm0, %v386_v25, 0.0 }
  0xd8   : > { %664 = vadd.xlane.f32.xlu0 %v663_v41  ;;  %v371_v41 = vld [vmem:[%s3686_s10 + $0x4d0] sm:$0xff]  ;;  %v751_v44 = vadd.f32 %v750_v35, %v385_v34 }
  0xdb   : > { %676 = vadd.xlane.f32.xlu1 %v675_v48  ;;  %v723_v48 = vadd.f32 %v722_v42, %v371_v41  ;;  %v394_v41 = vld [vmem:[%s3686_s10 + $0x588] sm:$0xff] }
  0xdc   : > { %672 = vadd.xlane.f32.xlu0 %v671_v49 }
  0xdf   : > { %684 = vadd.xlane.f32.xlu1 %v683_v56  ;;  %v380_v56 = vld [vmem:[%s3686_s10 + $0x518] sm:$0xff] }
  0xe0   : > { %680 = vadd.xlane.f32.xlu0 %v679_v57  ;;  %v378_v57 = vld [vmem:[%s3686_s10 + $0x508] sm:$0xff]  ;;  %v738_v62 = vsel %vm413_vm0, %v380_v56, 0.0 }
  0xe1   : > { %v739_v10 = vadd.f32 %v738_v62, %v379_v61  ;;  %v399_v61 = vld [vmem:[%s3686_s10 + $0x5b0] sm:$0xff]  ;;  %v404_v62 = vld [vmem:[%s3686_s10 + $0x5d8] sm:$0xff] }
  0xe3   : > { %692 = vadd.xlane.f32.xlu1 %v691_v3  ;;  %v377_v3 = vld [vmem:[%s3686_s10 + $0x500] sm:$0xff] }
  0xe4   : > { %688 = vadd.xlane.f32.xlu0 %v687_v7  ;;  %v3944_v19 = vpop.xlane.xlu1 %424  ;;  %v734_v7 = vsel %vm413_vm0, %v378_v57, 0.0 }
  0xe5   : > { %v3948_v23 = vpop.xlane.xlu0 %416  ;;  %v735_v13 = vadd.f32 %v734_v7, %v377_v3  ;;  %v763_v3 = vadd.f32 %v762_v46, %v391_v45  ;;  %v778_v7 = vsel %vm413_vm0, %v400_v47, 0.0  ;;  %v411_v47 = vld [vmem:[%s3686_s10 + $0x610] sm:$0xff] }
  0xe6   : > { %v806_v57 = vmul.f32 0.0052083335, %v3948_v23  ;;  %v779_v34 = vadd.f32 %v778_v7, %v399_v61 }
  0xe7   : > { %700 = vadd.xlane.f32.xlu1 %v699_v17  ;;  %v746_v17 = vsel %vm413_vm0, %v384_v8, 0.0  ;;  %v397_v8 = vld [vmem:[%s3686_s10 + $0x5a0] sm:$0xff] }
  0xe8   : > { %696 = vadd.xlane.f32.xlu0 %v695_v20  ;;  %v3954_v29 = vpop.xlane.xlu1 %428  ;;  %v747_v26 = vadd.f32 %v746_v17, %v383_v16  ;;  %v408_v17 = vld [vmem:[%s3686_s10 + $0x5f8] sm:$0xff]  ;;  %v4069_v45 = vsub.f32 %v3703_v2, %v806_v57 }
  0xe9   : > { %v3958_v33 = vpop.xlane.xlu0 %420 }
  0xeb   : > { %708 = vadd.xlane.f32.xlu1 %v707_v28  ;;  %v743_v28 = vadd.f32 %v742_v22, %v381_v21  ;;  %v406_v21 = vld [vmem:[%s3686_s10 + $0x5e8] sm:$0xff]  ;;  %v807_v22 = vmul.f32 0.0052083335, %v3958_v33 }
  0xec   : > { %704 = vadd.xlane.f32.xlu0 %v703_v30  ;;  %v3964_v39 = vpop.xlane.xlu1 %436  ;;  %v387_v30 = vld [vmem:[%s3686_s10 + $0x550] sm:$0xff] }
  0xed   : > { %v3968_v43 = vpop.xlane.xlu0 %432  ;;  %v811_v37 = vmul.f32 0.0052083335, %v3964_v39 }
  0xef   : > { %716 = vadd.xlane.f32.xlu1 %v715_v38  ;;  %v396_v38 = vld [vmem:[%s3686_s10 + $0x598] sm:$0xff] }
  0xf0   : > { %712 = vadd.xlane.f32.xlu0 %v711_v40  ;;  %v3974_v49 = vpop.xlane.xlu1 %444  ;;  %v755_v40 = vadd.f32 %v754_v31, %v387_v30  ;;  %v770_v56 = vsel %vm413_vm0, %v396_v38, 0.0  ;;  %v412_v30 = vld [vmem:[%s3686_s10 + $0x618] sm:$0xff]  ;;  %v4053_v31 = vsub.f32 %v3708_v4, %v806_v57  ;;  %v407_v38 = vld [vmem:[%s3686_s10 + $0x5f0] sm:$0xff]  ;;  %v790_v4 = vsel %vm413_vm0, %v406_v21, 0.0 }
  0xf1   : > { %v3978_v53 = vpop.xlane.xlu0 %440  ;;  %v771_v16 = vadd.f32 %v770_v56, %v395_v55  ;;  %v802_v39 = vsel %vm413_vm0, %v412_v30, 0.0  ;;  %v3187_v30 = vld [vmem:[%s3686_s10 + $0x40] sm:$0xff] }
  0xf2   : > { %v1101_v55 = vmul.f32 %v4053_v31, %v4053_v31 }
  0xf3   : > { %724 = vadd.xlane.f32.xlu1 %v723_v48  ;;  %v398_v48 = vld [vmem:[%s3686_s10 + $0x5a8] sm:$0xff] }
  0xf4   : > { %720 = vadd.xlane.f32.xlu0 %v719_v50  ;;  %v3984_v59 = vpop.xlane.xlu1 %452  ;;  %v808_v50 = vmul.f32 0.0052083335, %v3944_v19  ;;  %v809_v19 = vmul.f32 0.0052083335, %v3954_v29  ;;  %v774_v9 = vsel %vm413_vm0, %v398_v48, 0.0  ;;  %v410_v48 = vld [vmem:[%s3686_s10 + $0x608] sm:$0xff] }
  0xf5   : > { %v3988_v63 = vpop.xlane.xlu0 %448  ;;  %v775_v35 = vadd.f32 %v774_v9, %v397_v8  ;;  %v798_v61 = vsel %vm413_vm0, %v410_v48, 0.0  ;;  %v3186_v8 = vld [vmem:[%s3686_s10 + $0x10] sm:$0xff]  ;;  %v815_v21 = vmul.f32 0.0052083335, %v3984_v59  ;;  %v3189_v59 = vld [vmem:[%s3686_s10 + $0x68] sm:$0xff] }
  0xf6   : > { %v4044_v29 = vsub.f32 %v3700_v1, %v808_v50  ;;  %v4058_v33 = vsub.f32 %v3714_v6, %v809_v19  ;;  %v4091_v56 = vsub.f32 %v3711_v5, %v809_v19  ;;  %v1100_v5 = vmul.f32 %v4069_v45, %v4069_v45 }
  0xf7   : > { %732 = vadd.xlane.f32.xlu1 %v731_v58  ;;  %v393_v58 = vld [vmem:[%s3686_s10 + $0x580] sm:$0xff]  ;;  %v813_v19 = vmul.f32 0.0052083335, %v3974_v49  ;;  %v4115_v9 = vsub.f32 %v3186_v8, %v807_v22 }
  0xf8   : > { %728 = vadd.xlane.f32.xlu0 %v727_v60  ;;  %v3994_v12 = vpop.xlane.xlu1 %460  ;;  %v766_v60 = vsel %vm413_vm0, %v394_v41, 0.0  ;;  %v405_v41 = vld [vmem:[%s3686_s10 + $0x5e0] sm:$0xff] }
  0xf9   : > { %v3998_v20 = vpop.xlane.xlu0 %456  ;;  %v767_v25 = vadd.f32 %v766_v60, %v393_v58  ;;  %v4095_v58 = vadd.f32 %v790_v4, %v405_v41  ;;  %v4102_v60 = vadd.f32 %v802_v39, %v411_v47  ;;  %v3190_v39 = vld [vmem:[%s3686_s10 + $0x70] sm:$0xff] }
  0xfa   : > { %v4163_v48 = vsub.f32 %v3190_v39, %v813_v19 }
  0xfb   : > { %740 = vadd.xlane.f32.xlu1 %v739_v10  ;;  %v402_v10 = vld [vmem:[%s3686_s10 + $0x5c8] sm:$0xff] }
  0xfc   : > { %736 = vadd.xlane.f32.xlu0 %v735_v13  ;;  %v4004_v27 = vpop.xlane.xlu1 %468  ;;  %v759_v13 = vadd.f32 %v758_v54, %v389_v52  ;;  %v782_v1 = vsel %vm413_vm0, %v402_v10, 0.0  ;;  %v1105_v52 = vmul.f32 %v4044_v29, %v4044_v29  ;;  %v4081_v54 = vsub.f32 %v3723_v11, %v807_v22  ;;  %6996 = vst [vmem:[#allocation15_spill] sm:$0xff] %v4163_v48 }
  0xfd   : > { %v4008_v32 = vpop.xlane.xlu0 %464  ;;  %v4086_v2 = vadd.f32 %v782_v1, %v401_v36  ;;  %v1107_v11 = vmul.f32 %v4058_v33, %v4058_v33  ;;  %v1296_v22 = vsel %vm413_vm0, %v1101_v55, 0.0 }
  0xfe   : > { %v1103_v10 = vmul.f32 %v4081_v54, %v4081_v54  ;;  %v1304_v49 = vsel %vm413_vm0, %v1105_v52, 0.0  ;;  %v4157_v4 = vadd.f32 %v1296_v22, %v1100_v5  ;;  %v3191_v52 = vld [vmem:[%s3686_s10 + $0x98] sm:$0xff]  ;;  %v816_v5 = vmul.f32 0.0052083335, %v3998_v20  ;;  %v3194_v20 = vld [vmem:[%s3686_s10 + $0x90] sm:$0xff]  ;;  %v3195_v22 = vld [vmem:[%s3686_s10 + $0x80] sm:$0xff] }
  0xff   : > { %748 = vadd.xlane.f32.xlu1 %v747_v26  ;;  %v403_v26 = vld [vmem:[%s3686_s10 + $0x5d0] sm:$0xff] }
 0x100   : > { %744 = vadd.xlane.f32.xlu0 %v743_v28  ;;  %v4016_v42 = vpop.xlane.xlu1 %476  ;;  %v786_v28 = vsel %vm413_vm0, %v404_v62, 0.0  ;;  %v1300_v47 = vsel %vm413_vm0, %v1103_v10, 0.0  ;;  %v3193_v10 = vld [vmem:[%s3686_s10 + $0x60] sm:$0xff] }
 0x101   : > { %v4023_v51 = vpop.xlane.xlu0 %472  ;;  %v4073_v6 = vadd.f32 %v786_v28, %v403_v26  ;;  %v1308_v28 = vsel %vm413_vm0, %v1107_v11, 0.0  ;;  %v3192_v11 = vld [vmem:[%s3686_s10 + $0x88] sm:$0xff] }
 0x103   : > { %756 = vadd.xlane.f32.xlu1 %v755_v40  ;;  %v794_v40 = vsel %vm413_vm0, %v408_v17, 0.0  ;;  %v4128_v17 = vsub.f32 %v3736_v18, %v811_v37  ;;  %v3188_v18 = vld [vmem:[%s3686_s10 + $0x78] sm:$0xff] }
 0x104   : > { %752 = vadd.xlane.f32.xlu0 %v751_v44  ;;  %v4039_v23 = vpop.xlane.xlu1 %484  ;;  %v4066_v44 = vsub.f32 %v3697_v0, %v808_v50  ;;  %v810_v0 = vmul.f32 0.0052083335, %v3968_v43  ;;  %v4093_v57 = vadd.f32 %v794_v40, %v407_v38  ;;  %v4100_v43 = vsub.f32 %v3729_v14, %v811_v37  ;;  %v409_v14 = vld [vmem:[%s3686_s10 + $0x600] sm:$0xff] }
 0x105   : > { %v4047_v24 = vpop.xlane.xlu0 %480  ;;  %v4135_v26 = vadd.f32 %v798_v61, %v409_v14  ;;  %v4142_v1 = vsub.f32 %v3188_v18, %v813_v19 }
 0x106   : > { %v1104_v62 = vmul.f32 %v4066_v44, %v4066_v44  ;;  %v4139_v36 = vsub.f32 %v3187_v30, %v810_v0 }
 0x107   : > { %764 = vadd.xlane.f32.xlu1 %v763_v3  ;;  %v812_v3 = vmul.f32 0.0052083335, %v3978_v53  ;;  %v1106_v53 = vmul.f32 %v4091_v56, %v4091_v56  ;;  %6994 = vst [vmem:[#allocation13_spill] sm:$0xff] %v4142_v1  ;;  %v1115_v8 = vmul.f32 %v4142_v1, %v4142_v1 }
 0x108   : > { %760 = vadd.xlane.f32.xlu0 %v759_v13  ;;  %v4071_v46 = vpop.xlane.xlu1 %492  ;;  %v4120_v13 = vsub.f32 %v3732_v15, %v810_v0  ;;  %v814_v15 = vmul.f32 0.0052083335, %v3988_v63  ;;  %v4149_v63 = vadd.f32 %v1304_v49, %v1104_v62  ;;  %v4166_v0 = vsub.f32 %v3191_v52, %v815_v21 }
 0x109   : > { %v4084_v50 = vpop.xlane.xlu0 %488  ;;  %v4145_v37 = vsub.f32 %v3189_v59, %v812_v3  ;;  %v4168_v55 = vadd.f32 %v1308_v28, %v1106_v53  ;;  %v817_v62 = vmul.f32 0.0052083335, %v3994_v12  ;;  %v1108_v19 = vmul.f32 %v4139_v36, %v4139_v36 }
 0x10a   : > { %6993 = vst [vmem:[#allocation12_spill] sm:$0xff] %v4120_v13  ;;  %v1109_v40 = vmul.f32 %v4120_v13, %v4120_v13  ;;  %6997 = vst [vmem:[#allocation16_spill] sm:$0xff] %v4166_v0  ;;  %v4171_v61 = vsub.f32 %v3192_v11, %v814_v15  ;;  %v4182_v49 = vsub.f32 %v3193_v10, %v812_v3  ;;  %v819_v28 = vmul.f32 0.0052083335, %v4004_v27  ;;  %v3196_v27 = vld [vmem:[%s3686_s10 + $0xb8] sm:$0xff] }
 0x10b   : > { %772 = vadd.xlane.f32.xlu1 %v771_v16  ;;  %6995 = vst [vmem:[#allocation14_spill] sm:$0xff] %v4145_v37  ;;  %v1113_v53 = vmul.f32 %v4145_v37, %v4145_v37  ;;  %v1119_v18 = vmul.f32 %v4166_v0, %v4166_v0  ;;  %v4209_v52 = vsub.f32 %v3196_v27, %v817_v62  ;;  %v3202_v0 = vld [vmem:[%s3686_s10 + $0xd0] sm:$0xff] }
 0x10c   : > { %768 = vadd.xlane.f32.xlu0 %v767_v25  ;;  %v4111_v7 = vpop.xlane.xlu1 %500  ;;  %v1111_v25 = vmul.f32 %v4100_v43, %v4100_v43  ;;  %6998 = vst [vmem:[#allocation17_spill] sm:$0xff] %v4171_v61  ;;  %6999 = vst [vmem:[#allocation18_spill] sm:$0xff] %v4182_v49  ;;  %v1312_v3 = vsel %vm413_vm0, %v1109_v40, 0.0  ;;  %v3197_v40 = vld [vmem:[%s3686_s10 + $0xa8] sm:$0xff] }
 0x10d   : > { %v4122_v16 = vpop.xlane.xlu0 %496  ;;  %7002 = vst [vmem:[#allocation21_spill] sm:$0xff] %v4209_v52  ;;  %v4212_v11 = vsub.f32 %v3197_v40, %v816_v5  ;;  %v820_v40 = vmul.f32 0.0052083335, %v4023_v51  ;;  %v3203_v51 = vld [vmem:[%s3686_s10 + $0xc0] sm:$0xff] }
 0x10e   : > { %v1316_v14 = vsel %vm413_vm0, %v1111_v25, 0.0  ;;  %v4193_v25 = vsub.f32 %v3195_v22, %v814_v15  ;;  %v1117_v15 = vmul.f32 %v4171_v61, %v4171_v61  ;;  %v1332_v61 = vsel %vm413_vm0, %v1119_v18, 0.0 }
 0x10f   : > { %780 = vadd.xlane.f32.xlu1 %v779_v34  ;;  %v1102_v34 = vmul.f32 %v4115_v9, %v4115_v9  ;;  %7003 = vst [vmem:[#allocation22_spill] sm:$0xff] %v4212_v11 }
 0x110   : > { %776 = vadd.xlane.f32.xlu0 %v775_v35  ;;  %v4147_v38 = vpop.xlane.xlu1 %508  ;;  %v1110_v35 = vmul.f32 %v4128_v17, %v4128_v17  ;;  %7001 = vst [vmem:[#allocation20_spill] sm:$0xff] %v4193_v25 }
 0x111   : > { %v4155_v41 = vpop.xlane.xlu0 %504  ;;  %v1301_v59 = vadd.f32 %v1300_v47, %v1102_v34  ;;  %v4220_v47 = vadd.f32 %v1312_v3, %v1108_v19  ;;  %v3200_v3 = vld [vmem:[%s3686_s10 + $0xc8] sm:$0xff] }
 0x112   : > { %v4202_v39 = vadd.f32 %v1316_v14, %v1110_v35  ;;  %v1324_v35 = vsel %vm413_vm0, %v1115_v8, 0.0  ;;  %v1320_v14 = vsel %vm413_vm0, %v1113_v53, 0.0  ;;  %v821_v53 = vmul.f32 0.0052083335, %v4016_v42 }
 0x113   : > { %788 = vadd.xlane.f32.xlu1 %v4073_v6  ;;  %v4190_v6 = vsub.f32 %v3194_v20, %v815_v21  ;;  %v1114_v21 = vmul.f32 %v4163_v48, %v4163_v48  ;;  %v3198_v20 = vld [vmem:[%s3686_s10 + $0xb0] sm:$0xff]  ;;  %v4252_v42 = vsub.f32 %v3202_v0, %v819_v28 }
 0x114   : > { %784 = vadd.xlane.f32.xlu0 %v4086_v2  ;;  %v4187_v12 = vpop.xlane.xlu1 %516  ;;  %v818_v2 = vmul.f32 0.0052083335, %v4008_v32  ;;  %v1112_v32 = vmul.f32 %v4182_v49, %v4182_v49  ;;  %v4229_v22 = vsub.f32 %v3198_v20, %v817_v62  ;;  %v3201_v62 = vld [vmem:[%s3686_s10 + $0xa0] sm:$0xff] }
 0x115   : > { %7000 = vst [vmem:[#allocation19_spill] sm:$0xff] %v4190_v6  ;;  %v4196_v30 = vpop.xlane.xlu0 %512  ;;  %v1118_v10 = vmul.f32 %v4190_v6, %v4190_v6  ;;  %v4245_v20 = vsub.f32 %v3201_v62, %v816_v5  ;;  %7008 = vst [vmem:[#allocation27_spill] sm:$0xff] %v4252_v42  ;;  %v4261_v62 = vadd.f32 %v1324_v35, %v1114_v21  ;;  %v3205_v21 = vld [vmem:[%s3686_s10 + $0xe8] sm:$0xff] }
 0x116   : > { %7004 = vst [vmem:[#allocation23_spill] sm:$0xff] %v4229_v22  ;;  %v4237_v8 = vsub.f32 %v3200_v3, %v818_v2  ;;  %v1328_v3 = vsel %vm413_vm0, %v1117_v15, 0.0  ;;  %v4255_v18 = vsub.f32 %v3203_v51, %v818_v2  ;;  %v4269_v0 = vadd.f32 %v1320_v14, %v1112_v32 }
 0x117   : > { %796 = vadd.xlane.f32.xlu1 %v4093_v57  ;;  %v1116_v57 = vmul.f32 %v4193_v25, %v4193_v25  ;;  %v1123_v25 = vmul.f32 %v4209_v52, %v4209_v52  ;;  %7007 = vst [vmem:[#allocation26_spill] sm:$0xff] %v4245_v20  ;;  %v823_v52 = vmul.f32 0.0052083335, %v4039_v23  ;;  %v4279_v35 = vsub.f32 %v3205_v21, %v820_v40  ;;  %v3206_v21 = vld [vmem:[%s3686_s10 + $0xf0] sm:$0xff] }
 0x118   : > { %792 = vadd.xlane.f32.xlu0 %v4095_v58  ;;  %v4218_v34 = vpop.xlane.xlu1 %524  ;;  %v3199_v58 = vld [vmem:[%s3686_s10 + $0xd8] sm:$0xff]  ;;  %7006 = vst [vmem:[#allocation25_spill] sm:$0xff] %v4237_v8  ;;  %7009 = vst [vmem:[#allocation28_spill] sm:$0xff] %v4255_v18  ;;  %v1125_v23 = vmul.f32 %v4237_v8, %v4237_v8  ;;  %v822_v32 = vmul.f32 0.0052083335, %v4047_v24 }
 0x119   : > { %v4232_v27 = vsub.f32 %v3199_v58, %v819_v28  ;;  %v4234_v19 = vpop.xlane.xlu0 %520  ;;  %v1121_v58 = vmul.f32 %v4212_v11, %v4212_v11  ;;  %v4271_v28 = vadd.f32 %v1332_v61, %v1118_v10  ;;  %7011 = vst [vmem:[#allocation30_spill] sm:$0xff] %v4279_v35  ;;  %v4281_v51 = vadd.f32 %v1328_v3, %v1116_v57  ;;  %v3207_v3 = vld [vmem:[%s3686_s10 + $0x118] sm:$0xff] }
 0x11a   : > { %v1340_v61 = vsel %vm413_vm0, %v1123_v25, 0.0  ;;  %v1126_v10 = vmul.f32 %v4252_v42, %v4252_v42  ;;  %v4293_v57 = vsub.f32 %v3206_v21, %v821_v53  ;;  %v4296_v8 = vsub.f32 %v3207_v3, %v823_v52  ;;  %v3208_v25 = vld [vmem:[%s3686_s10 + $0xe0] sm:$0xff] }
 0x11b   : > { %7005 = vst [vmem:[#allocation24_spill] sm:$0xff] %v4232_v27  ;;  %804 = vadd.xlane.f32.xlu1 %v4102_v60  ;;  %v1122_v60 = vmul.f32 %v4229_v22, %v4229_v22  ;;  %v1127_v15 = vmul.f32 %v4232_v27, %v4232_v27  ;;  %v1120_v27 = vmul.f32 %v4245_v20, %v4245_v20  ;;  %v1336_v14 = vsel %vm413_vm0, %v1121_v58, 0.0  ;;  %v3215_v22 = vld [vmem:[%s3686_s10 + $0x148] sm:$0xff] }
 0x11c   : > { %800 = vadd.xlane.f32.xlu0 %v4135_v26  ;;  %v4259_v5 = vpop.xlane.xlu1 %532  ;;  %v3204_v26 = vld [vmem:[%s3686_s10 + $0xf8] sm:$0xff]  ;;  %7012 = vst [vmem:[#allocation31_spill] sm:$0xff] %v4293_v57  ;;  %7013 = vst [vmem:[#allocation32_spill] sm:$0xff] %v4296_v8  ;;  %v825_v58 = vmul.f32 0.0052083335, %v4071_v46  ;;  %v1129_v3 = vmul.f32 %v4279_v35, %v4279_v35 }
 0x11d   : > { %v4267_v11 = vpop.xlane.xlu0 %528  ;;  %v4276_v2 = vsub.f32 %v3204_v26, %v821_v53  ;;  %v1124_v26 = vmul.f32 %v4255_v18, %v4255_v18  ;;  %v824_v42 = vmul.f32 0.0052083335, %v4084_v50  ;;  %v1348_v53 = vsel %vm413_vm0, %v1127_v15, 0.0  ;;  %v3210_v50 = vld [vmem:[%s3686_s10 + $0x108] sm:$0xff] }
 0x11e   : > { %v4319_v20 = vsub.f32 %v3210_v50, %v822_v32  ;;  %v826_v15 = vmul.f32 0.0052083335, %v4122_v16  ;;  %v4334_v50 = vadd.f32 %v1348_v53, %v1126_v10  ;;  %v3214_v10 = vld [vmem:[%s3686_s10 + $0x158] sm:$0xff] }
 0x11f   : > { %7010 = vst [vmem:[#allocation29_spill] sm:$0xff] %v4276_v2  ;;  %1302 = vadd.xlane.f32.xlu1 %v1301_v59  ;;  %v4302_v59 = vsub.f32 %v3208_v25, %v820_v40  ;;  %v1131_v21 = vmul.f32 %v4276_v2, %v4276_v2  ;;  %v1344_v40 = vsel %vm413_vm0, %v1125_v23, 0.0  ;;  %v3209_v25 = vld [vmem:[%s3686_s10 + $0x110] sm:$0xff]  ;;  %v4323_v2 = vadd.f32 %v1340_v61, %v1122_v60  ;;  %v3212_v61 = vld [vmem:[%s3686_s10 + $0x128] sm:$0xff] }
 0x120   : > { %1298 = vadd.xlane.f32.xlu0 %v4157_v4  ;;  %v4299_v24 = vpop.xlane.xlu1 %540  ;;  %v827_v4 = vmul.f32 0.0052083335, %v4111_v7  ;;  %v4316_v46 = vsub.f32 %v3209_v25, %v823_v52  ;;  %7016 = vst [vmem:[#allocation35_spill] sm:$0xff] %v4319_v20  ;;  %v1130_v7 = vmul.f32 %v4293_v57, %v4293_v57  ;;  %v1135_v23 = vmul.f32 %v4296_v8, %v4296_v8 }
 0x121   : > { %7014 = vst [vmem:[#allocation33_spill] sm:$0xff] %v4302_v59  ;;  %v4306_v18 = vpop.xlane.xlu0 %536  ;;  %v4332_v25 = vadd.f32 %v1336_v14, %v1120_v27  ;;  %v1128_v16 = vmul.f32 %v4302_v59, %v4302_v59  ;;  %v4342_v35 = vsub.f32 %v3212_v61, %v824_v42  ;;  %v3213_v27 = vld [vmem:[%s3686_s10 + $0x100] sm:$0xff]  ;;  %v1356_v59 = vsel %vm413_vm0, %v1131_v21, 0.0 }
 0x122   : > { %7015 = vst [vmem:[#allocation34_spill] sm:$0xff] %v4316_v46  ;;  %v4349_v14 = vsub.f32 %v3213_v27, %v822_v32  ;;  %v4352_v53 = vsub.f32 %v3214_v10, %v827_v4  ;;  %v1134_v57 = vmul.f32 %v4316_v46, %v4316_v46  ;;  %v1133_v61 = vmul.f32 %v4319_v20, %v4319_v20  ;;  %v3217_v21 = vld [vmem:[%s3686_s10 + $0x120] sm:$0xff] }
 0x123   : > { %1310 = vadd.xlane.f32.xlu1 %v4168_v55  ;;  %v3211_v55 = vld [vmem:[%s3686_s10 + $0x138] sm:$0xff]  ;;  %7018 = vst [vmem:[#allocation37_spill] sm:$0xff] %v4342_v35  ;;  %v829_v32 = vmul.f32 0.0052083335, %v4147_v38  ;;  %v828_v10 = vmul.f32 0.0052083335, %v4155_v41  ;;  %v4385_v41 = vadd.f32 %v1356_v59, %v1130_v7 }
 0x124   : > { %1306 = vadd.xlane.f32.xlu0 %v4149_v63  ;;  %v4330_v52 = vpop.xlane.xlu1 %548  ;;  %v4339_v60 = vsub.f32 %v3211_v55, %v825_v58  ;;  %v4346_v63 = vadd.f32 %v1344_v40, %v1124_v26  ;;  %7019 = vst [vmem:[#allocation38_spill] sm:$0xff] %v4349_v14  ;;  %7020 = vst [vmem:[#allocation39_spill] sm:$0xff] %v4352_v53  ;;  %v1352_v55 = vsel %vm413_vm0, %v1129_v3, 0.0  ;;  %v3216_v40 = vld [vmem:[%s3686_s10 + $0x130] sm:$0xff]  ;;  %v1360_v7 = vsel %vm413_vm0, %v1133_v61, 0.0 }
 0x125   : > { %v4344_v8 = vpop.xlane.xlu0 %544  ;;  %v4361_v26 = vsub.f32 %v3215_v22, %v826_v15  ;;  %v4366_v27 = vsub.f32 %v3216_v40, %v825_v58  ;;  %v4369_v3 = vsub.f32 %v3217_v21, %v824_v42  ;;  %v1364_v22 = vsel %vm413_vm0, %v1135_v23, 0.0  ;;  %v3218_v58 = vld [vmem:[%s3686_s10 + $0x150] sm:$0xff]  ;;  %v3219_v21 = vld [vmem:[%s3686_s10 + $0x140] sm:$0xff] }
 0x126   : > { %7017 = vst [vmem:[#allocation36_spill] sm:$0xff] %v4339_v60  ;;  %v1139_v38 = vmul.f32 %v4339_v60, %v4339_v60  ;;  %v4381_v40 = vsub.f32 %v3218_v58, %v827_v4  ;;  %v1143_v23 = vmul.f32 %v4352_v53, %v4352_v53  ;;  %v4392_v46 = vsub.f32 %v3219_v21, %v826_v15  ;;  %v3220_v58 = vld [vmem:[%s3686_s10 + $0x178] sm:$0xff] }
 0x127   : > { %7021 = vst [vmem:[#allocation40_spill] sm:$0xff] %v4361_v26  ;;  %1318 = vadd.xlane.f32.xlu1 %v4202_v39  ;;  %7022 = vst [vmem:[#allocation41_spill] sm:$0xff] %v4366_v27  ;;  %v1137_v39 = vmul.f32 %v4342_v35, %v4342_v35  ;;  %v4394_v60 = vadd.f32 %v1352_v55, %v1128_v16  ;;  %v1141_v4 = vmul.f32 %v4361_v26, %v4361_v26  ;;  %v3221_v16 = vld [vmem:[%s3686_s10 + $0x168] sm:$0xff] }
 0x128   : > { %7023 = vst [vmem:[#allocation42_spill] sm:$0xff] %v4369_v3  ;;  %1314 = vadd.xlane.f32.xlu0 %v4220_v47  ;;  %v4373_v20 = vpop.xlane.xlu1 %556  ;;  %7024 = vst [vmem:[#allocation43_spill] sm:$0xff] %v4381_v40  ;;  %v1132_v47 = vmul.f32 %v4349_v14, %v4349_v14  ;;  %v4399_v35 = vsub.f32 %v3220_v58, %v829_v32  ;;  %v4402_v59 = vadd.f32 %v1364_v22, %v1134_v57 }
 0x129   : > { %v4383_v42 = vpop.xlane.xlu0 %552  ;;  %7025 = vst [vmem:[#allocation44_spill] sm:$0xff] %v4392_v46  ;;  %v1138_v53 = vmul.f32 %v4366_v27, %v4366_v27  ;;  %v1136_v15 = vmul.f32 %v4369_v3, %v4369_v3  ;;  %v4410_v55 = vsub.f32 %v3221_v16, %v828_v10  ;;  %v831_v21 = vmul.f32 0.0052083335, %v4187_v12  ;;  %v3222_v12 = vld [vmem:[%s3686_s10 + $0x170] sm:$0xff]  ;;  %v3223_v27 = vld [vmem:[%s3686_s10 + $0x160] sm:$0xff] }
 0x12a   : > { %7026 = vst [vmem:[#allocation45_spill] sm:$0xff] %v4399_v35  ;;  %v1142_v57 = vmul.f32 %v4381_v40, %v4381_v40  ;;  %v830_v61 = vmul.f32 0.0052083335, %v4196_v30  ;;  %v1372_v58 = vsel %vm413_vm0, %v1139_v38, 0.0  ;;  %v1368_v26 = vsel %vm413_vm0, %v1137_v39, 0.0 }
 0x12b   : > { %1326 = vadd.xlane.f32.xlu1 %v4261_v62  ;;  %7027 = vst [vmem:[#allocation46_spill] sm:$0xff] %v4410_v55  ;;  %v1140_v16 = vmul.f32 %v4392_v46, %v4392_v46  ;;  %v4426_v3 = vsub.f32 %v3222_v12, %v829_v32  ;;  %v1380_v40 = vsel %vm413_vm0, %v1143_v23, 0.0  ;;  %v1147_v30 = vmul.f32 %v4399_v35, %v4399_v35 }
 0x12c   : > { %1322 = vadd.xlane.f32.xlu0 %v4269_v0  ;;  %v4414_v62 = vpop.xlane.xlu1 %564  ;;  %v833_v0 = vmul.f32 0.0052083335, %v4218_v34  ;;  %v4433_v14 = vsub.f32 %v3223_v27, %v828_v10  ;;  %v832_v38 = vmul.f32 0.0052083335, %v4234_v19  ;;  %v1376_v39 = vsel %vm413_vm0, %v1141_v4, 0.0  ;;  %v3224_v34 = vld [vmem:[%s3686_s10 + $0x198] sm:$0xff] }
 0x12d   : > { %v4419_v22 = vpop.xlane.xlu0 %560  ;;  %7028 = vst [vmem:[#allocation47_spill] sm:$0xff] %v4426_v3  ;;  %v1145_v32 = vmul.f32 %v4410_v55, %v4410_v55  ;;  %v4441_v12 = vsub.f32 %v3224_v34, %v831_v21  ;;  %v835_v23 = vmul.f32 0.0052083335, %v4259_v5  ;;  %v4447_v19 = vadd.f32 %v1360_v7, %v1132_v47  ;;  %v3227_v47 = vld [vmem:[%s3686_s10 + $0x1b8] sm:$0xff] }
 0x12e   : > { %7029 = vst [vmem:[#allocation48_spill] sm:$0xff] %v4433_v14  ;;  %v4454_v35 = vadd.f32 %v1372_v58, %v1138_v53  ;;  %v4456_v55 = vadd.f32 %v1368_v26, %v1136_v15  ;;  %v4458_v34 = vadd.f32 %v1380_v40, %v1142_v57  ;;  %v1146_v5 = vmul.f32 %v4426_v3, %v4426_v3  ;;  %v3228_v26 = vld [vmem:[%s3686_s10 + $0x1a8] sm:$0xff]  ;;  %v3229_v58 = vld [vmem:[%s3686_s10 + $0x180] sm:$0xff] }
 0x12f   : > { %1334 = vadd.xlane.f32.xlu1 %v4271_v28  ;;  %7030 = vst [vmem:[#allocation49_spill] sm:$0xff] %v4441_v12  ;;  %v3225_v28 = vld [vmem:[%s3686_s10 + $0x188] sm:$0xff]  ;;  %v4466_v7 = vsub.f32 %v3227_v47, %v833_v0  ;;  %v1144_v53 = vmul.f32 %v4433_v14, %v4433_v14  ;;  %v4473_v40 = vsub.f32 %v3228_v26, %v832_v38  ;;  %v834_v15 = vmul.f32 0.0052083335, %v4267_v11 }
 0x130   : > { %1330 = vadd.xlane.f32.xlu0 %v4281_v51  ;;  %v4445_v27 = vpop.xlane.xlu1 %572  ;;  %v4450_v10 = vsub.f32 %v3225_v28, %v830_v61  ;;  %v3226_v51 = vld [vmem:[%s3686_s10 + $0x190] sm:$0xff]  ;;  %v4468_v28 = vadd.f32 %v1376_v39, %v1140_v16  ;;  %v1151_v57 = vmul.f32 %v4441_v12, %v4441_v12  ;;  %v4481_v16 = vsub.f32 %v3229_v58, %v830_v61  ;;  %v3230_v39 = vld [vmem:[%s3686_s10 + $0x1d8] sm:$0xff]  ;;  %v3232_v12 = vld [vmem:[%s3686_s10 + $0x1a0] sm:$0xff] }
 0x131   : > { %v4452_v4 = vpop.xlane.xlu0 %568  ;;  %v4463_v46 = vsub.f32 %v3226_v51, %v831_v21  ;;  %7033 = vst [vmem:[#allocation52_spill] sm:$0xff] %v4466_v7  ;;  %7034 = vst [vmem:[#allocation53_spill] sm:$0xff] %v4473_v40  ;;  %v1388_v21 = vsel %vm413_vm0, %v1147_v30, 0.0  ;;  %v4484_v51 = vsub.f32 %v3230_v39, %v835_v23  ;;  %v1384_v11 = vsel %vm413_vm0, %v1145_v32, 0.0  ;;  %v3231_v30 = vld [vmem:[%s3686_s10 + $0x1b0] sm:$0xff] }
 0x132   : > { %7031 = vst [vmem:[#allocation50_spill] sm:$0xff] %v4450_v10  ;;  %7035 = vst [vmem:[#allocation54_spill] sm:$0xff] %v4481_v16  ;;  %v4493_v26 = vsub.f32 %v3231_v30, %v833_v0  ;;  %v4496_v61 = vsub.f32 %v3232_v12, %v832_v38  ;;  %v837_v58 = vmul.f32 0.0052083335, %v4299_v24  ;;  %v1155_v14 = vmul.f32 %v4466_v7, %v4466_v7  ;;  %v3233_v38 = vld [vmem:[%s3686_s10 + $0x1d0] sm:$0xff]  ;;  %v3234_v24 = vld [vmem:[%s3686_s10 + $0x1c8] sm:$0xff] }
 0x133   : > { %7032 = vst [vmem:[#allocation51_spill] sm:$0xff] %v4463_v46  ;;  %1342 = vadd.xlane.f32.xlu1 %v4323_v2  ;;  %7036 = vst [vmem:[#allocation55_spill] sm:$0xff] %v4484_v51  ;;  %v1149_v2 = vmul.f32 %v4450_v10, %v4450_v10  ;;  %v836_v32 = vmul.f32 0.0052083335, %v4306_v18  ;;  %v4506_v3 = vadd.f32 %v1388_v21, %v1146_v5  ;;  %v839_v10 = vmul.f32 0.0052083335, %v4330_v52 }
 0x134   : > { %1338 = vadd.xlane.f32.xlu0 %v4332_v25  ;;  %v4487_v47 = vpop.xlane.xlu1 %580  ;;  %7037 = vst [vmem:[#allocation56_spill] sm:$0xff] %v4493_v26  ;;  %7038 = vst [vmem:[#allocation57_spill] sm:$0xff] %v4496_v61  ;;  %v1150_v25 = vmul.f32 %v4463_v46, %v4463_v46  ;;  %v1153_v0 = vmul.f32 %v4473_v40, %v4473_v40  ;;  %v4511_v12 = vsub.f32 %v3233_v38, %v835_v23  ;;  %v3237_v7 = vld [vmem:[%s3686_s10 + $0x1e8] sm:$0xff]  ;;  %v3238_v46 = vld [vmem:[%s3686_s10 + $0x218] sm:$0xff] }
 0x135   : > { %v4499_v39 = vpop.xlane.xlu0 %576  ;;  %v4514_v30 = vsub.f32 %v3234_v24, %v834_v15  ;;  %v1148_v18 = vmul.f32 %v4481_v16, %v4481_v16  ;;  %v1159_v5 = vmul.f32 %v4484_v51, %v4484_v51  ;;  %v4525_v23 = vadd.f32 %v1384_v11, %v1144_v53  ;;  %v3235_v24 = vld [vmem:[%s3686_s10 + $0x1f8] sm:$0xff]  ;;  %v3236_v53 = vld [vmem:[%s3686_s10 + $0x1c0] sm:$0xff] }
 0x136   : > { %7039 = vst [vmem:[#allocation58_spill] sm:$0xff] %v4511_v12  ;;  %v1396_v38 = vsel %vm413_vm0, %v1151_v57, 0.0  ;;  %v1154_v52 = vmul.f32 %v4493_v26, %v4493_v26  ;;  %v4533_v40 = vsub.f32 %v3235_v24, %v837_v58  ;;  %v4539_v11 = vsub.f32 %v3236_v53, %v834_v15 }
 0x137   : > { %7040 = vst [vmem:[#allocation59_spill] sm:$0xff] %v4514_v30  ;;  %1350 = vadd.xlane.f32.xlu1 %v4334_v50  ;;  %v1152_v50 = vmul.f32 %v4496_v61, %v4496_v61  ;;  %v4542_v57 = vsub.f32 %v3237_v7, %v836_v32  ;;  %v838_v26 = vmul.f32 0.0052083335, %v4344_v8  ;;  %v1404_v16 = vsel %vm413_vm0, %v1155_v14, 0.0  ;;  %v3239_v7 = vld [vmem:[%s3686_s10 + $0x1f0] sm:$0xff]  ;;  %v3240_v8 = vld [vmem:[%s3686_s10 + $0x1e0] sm:$0xff] }
 0x138   : > { %1346 = vadd.xlane.f32.xlu0 %v4346_v63  ;;  %v4523_v21 = vpop.xlane.xlu1 %588  ;;  %7041 = vst [vmem:[#allocation60_spill] sm:$0xff] %v4533_v40  ;;  %v1392_v63 = vsel %vm413_vm0, %v1149_v2, 0.0  ;;  %7042 = vst [vmem:[#allocation61_spill] sm:$0xff] %v4539_v11  ;;  %v1158_v61 = vmul.f32 %v4511_v12, %v4511_v12  ;;  %v1157_v24 = vmul.f32 %v4514_v30, %v4514_v30  ;;  %v1400_v15 = vsel %vm413_vm0, %v1153_v0, 0.0 }
 0x139   : > { %v4535_v51 = vpop.xlane.xlu0 %584  ;;  %7043 = vst [vmem:[#allocation62_spill] sm:$0xff] %v4542_v57  ;;  %v4551_v6 = vsub.f32 %v3238_v46, %v839_v10  ;;  %v4556_v2 = vsub.f32 %v3239_v7, %v837_v58  ;;  %v4559_v14 = vsub.f32 %v3240_v8, %v836_v32  ;;  %v841_v53 = vmul.f32 0.0052083335, %v4373_v20 }
 0x13a   : > { %v1412_v46 = vsel %vm413_vm0, %v1159_v5, 0.0  ;;  %v840_v0 = vmul.f32 0.0052083335, %v4383_v42  ;;  %v4571_v58 = vadd.f32 %v1396_v38, %v1150_v25  ;;  %v4573_v32 = vadd.f32 %v1392_v63, %v1148_v18  ;;  %v3242_v5 = vld [vmem:[%s3686_s10 + $0x208] sm:$0xff] }
 0x13b   : > { %7044 = vst [vmem:[#allocation63_spill] sm:$0xff] %v4551_v6  ;;  %1358 = vadd.xlane.f32.xlu1 %v4385_v41  ;;  %7045 = vst [vmem:[#allocation64_spill] sm:$0xff] %v4556_v2  ;;  %v1163_v41 = vmul.f32 %v4533_v40, %v4533_v40  ;;  %v1161_v20 = vmul.f32 %v4542_v57, %v4542_v57  ;;  %v4581_v8 = vsub.f32 %v3242_v5, %v838_v26 }
 0x13c   : > { %7046 = vst [vmem:[#allocation65_spill] sm:$0xff] %v4559_v14  ;;  %1354 = vadd.xlane.f32.xlu0 %v4394_v60  ;;  %v4563_v30 = vpop.xlane.xlu1 %596  ;;  %v3241_v60 = vld [vmem:[%s3686_s10 + $0x210] sm:$0xff]  ;;  %v4583_v40 = vadd.f32 %v1404_v16, %v1154_v52  ;;  %v1156_v42 = vmul.f32 %v4539_v11, %v4539_v11  ;;  %v1167_v25 = vmul.f32 %v4551_v6, %v4551_v6  ;;  %v3243_v16 = vld [vmem:[%s3686_s10 + $0x238] sm:$0xff]  ;;  %v843_v5 = vmul.f32 0.0052083335, %v4414_v62 }
 0x13d   : > { %v4569_v12 = vpop.xlane.xlu0 %592  ;;  %v4578_v7 = vsub.f32 %v3241_v60, %v839_v10  ;;  %7048 = vst [vmem:[#allocation67_spill] sm:$0xff] %v4581_v8  ;;  %v4590_v18 = vadd.f32 %v1400_v15, %v1152_v50  ;;  %v4592_v38 = vadd.f32 %v1412_v46, %v1158_v61  ;;  %v1162_v10 = vmul.f32 %v4556_v2, %v4556_v2  ;;  %v3244_v50 = vld [vmem:[%s3686_s10 + $0x200] sm:$0xff]  ;;  %v3245_v15 = vld [vmem:[%s3686_s10 + $0x228] sm:$0xff] }
 0x13e   : > { %v1160_v63 = vmul.f32 %v4559_v14, %v4559_v14  ;;  %v4599_v52 = vsub.f32 %v3243_v16, %v841_v53  ;;  %v4606_v61 = vsub.f32 %v3244_v50, %v838_v26  ;;  %v4609_v46 = vsub.f32 %v3245_v15, %v840_v0  ;;  %v3246_v50 = vld [vmem:[%s3686_s10 + $0x230] sm:$0xff]  ;;  %v3247_v14 = vld [vmem:[%s3686_s10 + $0x220] sm:$0xff] }
 0x13f   : > { %7047 = vst [vmem:[#allocation66_spill] sm:$0xff] %v4578_v7  ;;  %1366 = vadd.xlane.f32.xlu1 %v4402_v59  ;;  %v1408_v59 = vsel %vm413_vm0, %v1157_v24, 0.0  ;;  %v1420_v16 = vsel %vm413_vm0, %v1163_v41, 0.0  ;;  %v1165_v57 = vmul.f32 %v4581_v8, %v4581_v8  ;;  %v842_v24 = vmul.f32 0.0052083335, %v4419_v22 }
 0x140   : > { %7049 = vst [vmem:[#allocation68_spill] sm:$0xff] %v4599_v52  ;;  %1362 = vadd.xlane.f32.xlu0 %v4447_v19  ;;  %v4602_v60 = vpop.xlane.xlu1 %604  ;;  %7050 = vst [vmem:[#allocation69_spill] sm:$0xff] %v4606_v61  ;;  %v1166_v19 = vmul.f32 %v4578_v7, %v4578_v7  ;;  %v1416_v26 = vsel %vm413_vm0, %v1161_v20, 0.0  ;;  %v4622_v15 = vsub.f32 %v3246_v50, %v841_v53  ;;  %v845_v2 = vmul.f32 0.0052083335, %v4445_v27  ;;  %v3248_v27 = vld [vmem:[%s3686_s10 + $0x258] sm:$0xff] }
 0x141   : > { %7051 = vst [vmem:[#allocation70_spill] sm:$0xff] %v4609_v46  ;;  %v4612_v6 = vpop.xlane.xlu0 %600  ;;  %v4625_v62 = vsub.f32 %v3247_v14, %v840_v0  ;;  %v1428_v41 = vsel %vm413_vm0, %v1167_v25, 0.0  ;;  %v1171_v8 = vmul.f32 %v4599_v52, %v4599_v52  ;;  %v844_v22 = vmul.f32 0.0052083335, %v4452_v4  ;;  %v3251_v52 = vld [vmem:[%s3686_s10 + $0x278] sm:$0xff] }
 0x142   : > { %7052 = vst [vmem:[#allocation71_spill] sm:$0xff] %v4622_v15  ;;  %v4636_v53 = vadd.f32 %v1408_v59, %v1156_v42  ;;  %v4638_v14 = vadd.f32 %v1420_v16, %v1162_v10  ;;  %v4643_v0 = vsub.f32 %v3248_v27, %v843_v5  ;;  %v4647_v4 = vadd.f32 %v1416_v26, %v1160_v63  ;;  %v3249_v59 = vld [vmem:[%s3686_s10 + $0x248] sm:$0xff]  ;;  %v3250_v63 = vld [vmem:[%s3686_s10 + $0x250] sm:$0xff] }
 0x143   : > { %7053 = vst [vmem:[#allocation72_spill] sm:$0xff] %v4625_v62  ;;  %1374 = vadd.xlane.f32.xlu1 %v4454_v35  ;;  %v1169_v35 = vmul.f32 %v4609_v46, %v4609_v46  ;;  %v1164_v42 = vmul.f32 %v4606_v61, %v4606_v61  ;;  %v4652_v10 = vsub.f32 %v3249_v59, %v842_v24  ;;  %v1424_v50 = vsel %vm413_vm0, %v1165_v57, 0.0  ;;  %v3252_v59 = vld [vmem:[%s3686_s10 + $0x240] sm:$0xff]  ;;  %v3253_v57 = vld [vmem:[%s3686_s10 + $0x268] sm:$0xff] }
 0x144   : > { %1370 = vadd.xlane.f32.xlu0 %v4456_v55  ;;  %v4634_v20 = vpop.xlane.xlu1 %612  ;;  %7054 = vst [vmem:[#allocation73_spill] sm:$0xff] %v4643_v0  ;;  %v2181_v55 = vlaneseq  ;;  %v4654_v16 = vadd.f32 %v1428_v41, %v1166_v19  ;;  %v1170_v27 = vmul.f32 %v4622_v15, %v4622_v15  ;;  %v1168_v46 = vmul.f32 %v4625_v62, %v4625_v62 }
 0x145   : > { %v4645_v25 = vpop.xlane.xlu0 %608  ;;  %7055 = vst [vmem:[#allocation74_spill] sm:$0xff] %v4652_v10  ;;  %v4662_v26 = vsub.f32 %v3250_v63, %v843_v5  ;;  %v4665_v7 = vsub.f32 %v3251_v52, %v845_v2  ;;  %v4669_v19 = vsub.f32 %v3252_v59, %v842_v24  ;;  %v4672_v41 = vsub.f32 %v3253_v57, %v844_v22 }
 0x146   : > { %v847_v15 = vmul.f32 0.0052083335, %v4487_v47  ;;  %v1436_v5 = vsel %vm413_vm0, %v1171_v8, 0.0  ;;  %v1175_v52 = vmul.f32 %v4643_v0, %v4643_v0  ;;  %v1432_v24 = vsel %vm413_vm0, %v1169_v35, 0.0  ;;  %v3255_v8 = vld [vmem:[%s3686_s10 + $0x260] sm:$0xff] }
 0x147   : > { %7056 = vst [vmem:[#allocation75_spill] sm:$0xff] %v4662_v26  ;;  %7057 = vst [vmem:[#allocation76_spill] sm:$0xff] %v4665_v7  ;;  %1382 = vadd.xlane.f32.xlu1 %v4458_v34  ;;  %v846_v34 = vmul.f32 0.0052083335, %v4499_v39  ;;  %v4685_v59 = vshrl.u32 %v2181_v55, 7  ;;  %v1173_v47 = vmul.f32 %v4652_v10, %v4652_v10  ;;  %v4693_v61 = vsub.f32 %v3255_v8, %v844_v22 }
 0x148   : > { %7058 = vst [vmem:[#allocation77_spill] sm:$0xff] %v4669_v19  ;;  %7059 = vst [vmem:[#allocation78_spill] sm:$0xff] %v4672_v41  ;;  %1378 = vadd.xlane.f32.xlu0 %v4468_v28  ;;  %v4676_v62 = vpop.xlane.xlu1 %620  ;;  %v3254_v28 = vld [vmem:[%s3686_s10 + $0x270] sm:$0xff]  ;;  %v4695_v0 = vadd.f32 %v1424_v50, %v1164_v42  ;;  %v1174_v39 = vmul.f32 %v4662_v26, %v4662_v26  ;;  %v1179_v35 = vmul.f32 %v4665_v7, %v4665_v7  ;;  %v3256_v42 = vld [vmem:[%s3686_s10 + $0x298] sm:$0xff] }
 0x149   : > { %v4682_v63 = vpop.xlane.xlu0 %616  ;;  %v4690_v57 = vsub.f32 %v3254_v28, %v845_v2  ;;  %7061 = vst [vmem:[#allocation80_spill] sm:$0xff] %v4693_v61  ;;  %v849_v55 = vmul.f32 0.0052083335, %v4523_v21  ;;  %v4703_v10 = vadd.f32 %v1436_v5, %v1170_v27  ;;  %v1172_v2 = vmul.f32 %v4669_v19, %v4669_v19  ;;  %v3258_v19 = vld [vmem:[%s3686_s10 + $0x290] sm:$0xff] }
 0x14a   : > { %v1177_v22 = vmul.f32 %v4672_v41, %v4672_v41  ;;  %v4710_v50 = vsub.f32 %v3256_v42, %v847_v15  ;;  %v4715_v21 = vadd.f32 %v1432_v24, %v1168_v46  ;;  %v1444_v8 = vsel %vm413_vm0, %v1175_v52, 0.0  ;;  %v3259_v52 = vld [vmem:[%s3686_s10 + $0x2b8] sm:$0xff] }
 0x14b   : > { %7060 = vst [vmem:[#allocation79_spill] sm:$0xff] %v4690_v57  ;;  %1390 = vadd.xlane.f32.xlu1 %v4506_v3  ;;  %v3257_v3 = vld [vmem:[%s3686_s10 + $0x288] sm:$0xff]  ;;  %v2183_v41 = vsub.s32 0, %v4685_v59  ;;  %v1176_v7 = vmul.f32 %v4693_v61, %v4693_v61  ;;  %v848_v46 = vmul.f32 0.0052083335, %v4535_v51  ;;  %v1440_v24 = vsel %vm413_vm0, %v1173_v47, 0.0 }
 0x14c   : > { %7062 = vst [vmem:[#allocation81_spill] sm:$0xff] %v4710_v50  ;;  %1386 = vadd.xlane.f32.xlu0 %v4525_v23  ;;  %v4713_v28 = vpop.xlane.xlu1 %628  ;;  %v4718_v27 = vsub.f32 %v3257_v3, %v846_v34  ;;  %v1178_v23 = vmul.f32 %v4690_v57, %v4690_v57  ;;  %v1982_v3 = vld [vmem:[#allocation5] sm:$0x3]  ;;  %v4732_v26 = vsub.f32 %v3258_v19, %v847_v15  ;;  %v851_v37 = vmul.f32 0.0052083335, %v4563_v30  ;;  %v3262_v57 = vld [vmem:[%s3686_s10 + $0x2a8] sm:$0xff] }
 0x14d   : > { %v4720_v5 = vpop.xlane.xlu0 %624  ;;  %v4735_v11 = vsub.f32 %v3259_v52, %v849_v55  ;;  %v1452_v42 = vsel %vm413_vm0, %v1179_v35, 0.0  ;;  %v1183_v51 = vmul.f32 %v4710_v50, %v4710_v50  ;;  %v3260_v61 = vld [vmem:[%s3686_s10 + $0x280] sm:$0xff]  ;;  %v850_v15 = vmul.f32 0.0052083335, %v4569_v12  ;;  %v3261_v12 = vld [vmem:[%s3686_s10 + $0x2b0] sm:$0xff] }
 0x14e   : > { %7063 = vst [vmem:[#allocation82_spill] sm:$0xff] %v4718_v27  ;;  %7064 = vst [vmem:[#allocation83_spill] sm:$0xff] %v4732_v26  ;;  %v4743_v47 = vsub.f32 %v3260_v61, %v846_v34  ;;  %v1448_v30 = vsel %vm413_vm0, %v1177_v22, 0.0  ;;  %v4754_v52 = vadd.f32 %v1444_v8, %v1174_v39  ;;  %v4756_v50 = vadd.f32 %v1440_v24, %v1172_v2  ;;  %v1983_v61 = vld [vmem:[#allocation7] sm:$0x3]  ;;  %v3263_v8 = vld [vmem:[%s3686_s10 + $0x2d8] sm:$0xff] }
 0x14f   : > { %7065 = vst [vmem:[#allocation84_spill] sm:$0xff] %v4735_v11  ;;  %1398 = vadd.xlane.f32.xlu1 %v4571_v58  ;;  %v1181_v58 = vmul.f32 %v4718_v27, %v4718_v27  ;;  %v4758_v34 = vrot.slane %v1982_v3, %v2183_v41  ;;  %v4764_v49 = vsub.f32 %v3262_v57, %v848_v46  ;;  %v7069_v27 = vsub.s32 1, %v4685_v59 }
 0x150   : > { %7066 = vst [vmem:[#allocation85_spill] sm:$0xff] %v4743_v47  ;;  %1394 = vadd.xlane.f32.xlu0 %v4573_v32  ;;  %v4747_v19 = vpop.xlane.xlu1 %636  ;;  %v4761_v32 = vsub.f32 %v3261_v12, %v849_v55  ;;  %v4766_v22 = vadd.f32 %v1452_v42, %v1178_v23  ;;  %v1182_v39 = vmul.f32 %v4732_v26, %v4732_v26  ;;  %v3264_v42 = vld [vmem:[%s3686_s10 + $0x2c8] sm:$0xff]  ;;  %v858_v48 = vmul.f32 0.0052083335, %v4720_v5  ;;  %v3279_v5 = vld [vmem:[%s3686_s10 + $0x358] sm:$0xff] }
 0x151   : > { %v4752_v35 = vpop.xlane.xlu0 %632  ;;  %7068 = vst [vmem:[#allocation87_spill] sm:$0xff] %v4764_v49  ;;  %v4770_v1 = vrot.slane %v1982_v3, %v7069_v27  ;;  %v1187_v2 = vmul.f32 %v4735_v11, %v4735_v11  ;;  %v4777_v24 = vsub.f32 %v3263_v8, %v851_v37  ;;  %v4780_v57 = vadd.f32 %v1448_v30, %v1176_v7  ;;  %v3265_v8 = vld [vmem:[%s3686_s10 + $0x2a0] sm:$0xff]  ;;  %v3272_v26 = vld [vmem:[%s3686_s10 + $0x308] sm:$0xff] }
 0x152   : > { %7067 = vst [vmem:[#allocation86_spill] sm:$0xff] %v4761_v32  ;;  %v1180_v55 = vmul.f32 %v4743_v47, %v4743_v47  ;;  %v4785_v27 = vsub.f32 %v3264_v42, %v850_v15  ;;  %v1460_v3 = vsel %vm413_vm0, %v1183_v51, 0.0  ;;  %v4791_v12 = vrot.slane %v1983_v61, %v2183_v41  ;;  %v3266_v51 = vld [vmem:[%s3686_s10 + $0x2d0] sm:$0xff] }
 0x153   : > { %7070 = vst [vmem:[#allocation88_spill] sm:$0xff] %v4777_v24  ;;  %1406 = vadd.xlane.f32.xlu1 %v4583_v40  ;;  %v4794_v40 = vsub.f32 %v3265_v8, %v848_v46  ;;  %v853_v7 = vmul.f32 0.0052083335, %v4602_v60  ;;  %v852_v30 = vmul.f32 0.0052083335, %v4612_v6  ;;  %v1456_v42 = vsel %vm413_vm0, %v1181_v58, 0.0 }
 0x154   : > { %7071 = vst [vmem:[#allocation89_spill] sm:$0xff] %v4785_v27  ;;  %1402 = vadd.xlane.f32.xlu0 %v4590_v18  ;;  %v4788_v23 = vpop.xlane.xlu1 %644  ;;  %v1186_v18 = vmul.f32 %v4761_v32, %v4761_v32  ;;  %v1185_v47 = vmul.f32 %v4764_v49, %v4764_v49  ;;  %v4806_v41 = vsub.f32 %v3266_v51, %v851_v37  ;;  %v855_v46 = vmul.f32 0.0052083335, %v4634_v20  ;;  %v3267_v60 = vld [vmem:[%s3686_s10 + $0x2c0] sm:$0xff] }
 0x155   : > { %7072 = vst [vmem:[#allocation90_spill] sm:$0xff] %v4794_v40  ;;  %v4798_v11 = vpop.xlane.xlu0 %640  ;;  %v1191_v6 = vmul.f32 %v4777_v24, %v4777_v24  ;;  %v4812_v8 = vsub.f32 %v3267_v60, %v850_v15  ;;  %v854_v58 = vmul.f32 0.0052083335, %v4645_v25  ;;  %v1468_v49 = vsel %vm413_vm0, %v1187_v2, 0.0  ;;  %v3268_v2 = vld [vmem:[%s3686_s10 + $0x2f8] sm:$0xff] }
 0x156   : > { %7073 = vst [vmem:[#allocation91_spill] sm:$0xff] %v4806_v41  ;;  %v1189_v37 = vmul.f32 %v4785_v27, %v4785_v27  ;;  %v857_v51 = vmul.f32 0.0052083335, %v4676_v62  ;;  %v4823_v24 = vadd.f32 %v1460_v3, %v1182_v39  ;;  %v7075_v15 = vsub.s32 1, %v4685_v59  ;;  %v3269_v27 = vld [vmem:[%s3686_s10 + $0x2e8] sm:$0xff] }
 0x157   : > { %7074 = vst [vmem:[#allocation92_spill] sm:$0xff] %v4812_v8  ;;  %1414 = vadd.xlane.f32.xlu1 %v4592_v38  ;;  %v1184_v38 = vmul.f32 %v4794_v40, %v4794_v40  ;;  %v4832_v60 = vsub.f32 %v3268_v2, %v853_v7  ;;  %v4835_v62 = vsub.f32 %v3269_v27, %v852_v30  ;;  %v1464_v2 = vsel %vm413_vm0, %v1185_v47, 0.0  ;;  %v3271_v27 = vld [vmem:[%s3686_s10 + $0x2f0] sm:$0xff] }
 0x158   : > { %1410 = vadd.xlane.f32.xlu0 %v4636_v53  ;;  %v4821_v20 = vpop.xlane.xlu1 %652  ;;  %v4827_v25 = vrot.slane %v1983_v61, %v7075_v15  ;;  %v4839_v39 = vadd.f32 %v1456_v42, %v1180_v55  ;;  %v1190_v59 = vmul.f32 %v4806_v41, %v4806_v41  ;;  %v3270_v61 = vld [vmem:[%s3686_s10 + $0x318] sm:$0xff]  ;;  %v4846_v15 = vadd.f32 %v1468_v49, %v1186_v18 }
 0x159   : > { %7076 = vst [vmem:[#allocation93_spill] sm:$0xff] %v4832_v60  ;;  %7077 = vst [vmem:[#allocation94_spill] sm:$0xff] %v4835_v62  ;;  %v4837_v53 = vpop.xlane.xlu0 %648  ;;  %v4844_v3 = vsub.f32 %v3270_v61, %v855_v46  ;;  %v1188_v40 = vmul.f32 %v4812_v8, %v4812_v8  ;;  %v4852_v32 = vsub.f32 %v3271_v27, %v853_v7  ;;  %v1476_v42 = vsel %vm413_vm0, %v1191_v6, 0.0  ;;  %v3273_v61 = vld [vmem:[%s3686_s10 + $0x2e0] sm:$0xff]  ;;  %v3274_v18 = vld [vmem:[%s3686_s10 + $0x338] sm:$0xff] }
 0x15a   : > { %v4855_v55 = vsub.f32 %v3272_v26, %v854_v58  ;;  %v4860_v49 = vsub.f32 %v3273_v61, %v852_v30  ;;  %v4863_v47 = vsub.f32 %v3274_v18, %v857_v51  ;;  %v856_v8 = vmul.f32 0.0052083335, %v4682_v63  ;;  %v3275_v30 = vld [vmem:[%s3686_s10 + $0x310] sm:$0xff]  ;;  %v3276_v18 = vld [vmem:[%s3686_s10 + $0x300] sm:$0xff] }
 0x15b   : > { %7078 = vst [vmem:[#allocation95_spill] sm:$0xff] %v4844_v3  ;;  %7079 = vst [vmem:[#allocation96_spill] sm:$0xff] %v4852_v32  ;;  %1422 = vadd.xlane.f32.xlu1 %v4638_v14  ;;  %v1472_v26 = vsel %vm413_vm0, %v1189_v37, 0.0  ;;  %v1195_v14 = vmul.f32 %v4832_v60, %v4832_v60  ;;  %v1193_v6 = vmul.f32 %v4835_v62, %v4835_v62  ;;  %v859_v61 = vmul.f32 0.0052083335, %v4713_v28  ;;  %v3277_v28 = vld [vmem:[%s3686_s10 + $0x330] sm:$0xff] }
 0x15c   : > { %7080 = vst [vmem:[#allocation97_spill] sm:$0xff] %v4855_v55  ;;  %7081 = vst [vmem:[#allocation98_spill] sm:$0xff] %v4860_v49  ;;  %1418 = vadd.xlane.f32.xlu0 %v4647_v4  ;;  %v4867_v7 = vpop.xlane.xlu1 %660  ;;  %v4875_v27 = vsub.f32 %v3275_v30, %v855_v46  ;;  %v1199_v4 = vmul.f32 %v4844_v3, %v4844_v3  ;;  %v4883_v41 = vsub.f32 %v3276_v18, %v854_v58  ;;  %v3280_v3 = vld [vmem:[%s3686_s10 + $0x320] sm:$0xff] }
 0x15d   : > { %7082 = vst [vmem:[#allocation99_spill] sm:$0xff] %v4863_v47  ;;  %v4878_v63 = vpop.xlane.xlu0 %656  ;;  %v4885_v37 = vadd.f32 %v1464_v2, %v1184_v38  ;;  %v4887_v60 = vadd.f32 %v1476_v42, %v1190_v59  ;;  %v1194_v46 = vmul.f32 %v4852_v32, %v4852_v32  ;;  %v1197_v30 = vmul.f32 %v4855_v55, %v4855_v55  ;;  %v3278_v59 = vld [vmem:[%s3686_s10 + $0x328] sm:$0xff] }
 0x15e   : > { %7083 = vst [vmem:[#allocation100_spill] sm:$0xff] %v4875_v27  ;;  %7084 = vst [vmem:[#allocation101_spill] sm:$0xff] %v4883_v41  ;;  %v4894_v62 = vsub.f32 %v3277_v28, %v857_v51  ;;  %v1192_v58 = vmul.f32 %v4860_v49, %v4860_v49  ;;  %v1203_v38 = vmul.f32 %v4863_v47, %v4863_v47  ;;  %v1484_v47 = vsel %vm413_vm0, %v1195_v14, 0.0  ;;  %v3281_v49 = vld [vmem:[%s3686_s10 + $0x348] sm:$0xff] }
 0x15f   : > { %1430 = vadd.xlane.f32.xlu1 %v4654_v16  ;;  %v4903_v2 = vsub.f32 %v3278_v59, %v856_v8  ;;  %v4908_v51 = vadd.f32 %v1472_v26, %v1188_v40  ;;  %v1198_v16 = vmul.f32 %v4875_v27, %v4875_v27  ;;  %v4913_v18 = vsub.f32 %v3279_v5, %v859_v61 }
 0x160   : > { %7085 = vst [vmem:[#allocation102_spill] sm:$0xff] %v4894_v62  ;;  %1426 = vadd.xlane.f32.xlu0 %v4695_v0  ;;  %v4906_v42 = vpop.xlane.xlu1 %668  ;;  %v1480_v59 = vsel %vm413_vm0, %v1193_v6, 0.0  ;;  %v1196_v0 = vmul.f32 %v4883_v41, %v4883_v41  ;;  %v861_v55 = vmul.f32 0.0052083335, %v4747_v19  ;;  %v860_v40 = vmul.f32 0.0052083335, %v4752_v35 }
 0x161   : > { %7086 = vst [vmem:[#allocation103_spill] sm:$0xff] %v4903_v2  ;;  %7087 = vst [vmem:[#allocation104_spill] sm:$0xff] %v4913_v18  ;;  %v4915_v28 = vpop.xlane.xlu0 %664  ;;  %v1492_v26 = vsel %vm413_vm0, %v1199_v4, 0.0  ;;  %v1202_v5 = vmul.f32 %v4894_v62, %v4894_v62  ;;  %v4927_v27 = vsub.f32 %v3280_v3, %v856_v8  ;;  %v4930_v14 = vsub.f32 %v3281_v49, %v858_v48  ;;  %v3282_v35 = vld [vmem:[%s3686_s10 + $0x350] sm:$0xff] }
 0x162   : > { %v1488_v6 = vsel %vm413_vm0, %v1197_v30, 0.0  ;;  %v1201_v19 = vmul.f32 %v4903_v2, %v4903_v2  ;;  %v4937_v4 = vsub.f32 %v3282_v35, %v859_v61  ;;  %v863_v62 = vmul.f32 0.0052083335, %v4788_v23  ;;  %v3283_v23 = vld [vmem:[%s3686_s10 + $0x340] sm:$0xff] }
 0x163   : > { %7088 = vst [vmem:[#allocation105_spill] sm:$0xff] %v4927_v27  ;;  %7089 = vst [vmem:[#allocation106_spill] sm:$0xff] %v4930_v14  ;;  %1438 = vadd.xlane.f32.xlu1 %v4703_v10  ;;  %v1500_v3 = vsel %vm413_vm0, %v1203_v38, 0.0  ;;  %v1207_v10 = vmul.f32 %v4913_v18, %v4913_v18  ;;  %v862_v49 = vmul.f32 0.0052083335, %v4798_v11  ;;  %v4949_v2 = vadd.f32 %v1484_v47, %v1194_v46  ;;  %v3285_v38 = vld [vmem:[%s3686_s10 + $0x368] sm:$0xff] }
 0x164   : > { %7090 = vst [vmem:[#allocation107_spill] sm:$0xff] %v4937_v4  ;;  %1434 = vadd.xlane.f32.xlu0 %v4715_v21  ;;  %v4941_v8 = vpop.xlane.xlu1 %676  ;;  %v4951_v61 = vadd.f32 %v1480_v59, %v1192_v58  ;;  %v4954_v35 = vsub.f32 %v3283_v23, %v858_v48  ;;  %v3284_v21 = vld [vmem:[%s3686_s10 + $0x378] sm:$0xff]  ;;  %v4960_v32 = vsub.f32 %v3285_v38, %v860_v40  ;;  %v3286_v59 = vld [vmem:[%s3686_s10 + $0x370] sm:$0xff] }
 0x165   : > { %v4947_v30 = vpop.xlane.xlu0 %672  ;;  %v4957_v41 = vsub.f32 %v3284_v21, %v861_v55  ;;  %v4962_v18 = vadd.f32 %v1492_v26, %v1198_v16  ;;  %v1200_v11 = vmul.f32 %v4927_v27, %v4927_v27  ;;  %v1205_v47 = vmul.f32 %v4930_v14, %v4930_v14  ;;  %v3287_v16 = vld [vmem:[%s3686_s10 + $0x398] sm:$0xff] }
 0x166   : > { %7091 = vst [vmem:[#allocation108_spill] sm:$0xff] %v4954_v35  ;;  %7093 = vst [vmem:[#allocation110_spill] sm:$0xff] %v4960_v32  ;;  %v4969_v46 = vadd.f32 %v1488_v6, %v1196_v0  ;;  %v4971_v48 = vadd.f32 %v1500_v3, %v1202_v5  ;;  %v1206_v58 = vmul.f32 %v4937_v4, %v4937_v4  ;;  %v3288_v0 = vld [vmem:[%s3686_s10 + $0x388] sm:$0xff]  ;;  %v865_v6 = vmul.f32 0.0052083335, %v4821_v20  ;;  %v3290_v20 = vld [vmem:[%s3686_s10 + $0x390] sm:$0xff] }
 0x167   : > { %7092 = vst [vmem:[#allocation109_spill] sm:$0xff] %v4957_v41  ;;  %1446 = vadd.xlane.f32.xlu1 %v4754_v52  ;;  %v4976_v23 = vsub.f32 %v3286_v59, %v861_v55  ;;  %v4979_v26 = vsub.f32 %v3287_v16, %v863_v62  ;;  %v1496_v52 = vsel %vm413_vm0, %v1201_v19, 0.0  ;;  %v4986_v5 = vsub.f32 %v3288_v0, %v862_v49  ;;  %v3289_v16 = vld [vmem:[%s3686_s10 + $0x360] sm:$0xff] }
 0x168   : > { %1442 = vadd.xlane.f32.xlu0 %v4756_v50  ;;  %v4982_v21 = vpop.xlane.xlu1 %684  ;;  %v864_v3 = vmul.f32 0.0052083335, %v4837_v53  ;;  %v1508_v38 = vsel %vm413_vm0, %v1207_v10, 0.0  ;;  %v1204_v59 = vmul.f32 %v4954_v35, %v4954_v35  ;;  %v1211_v50 = vmul.f32 %v4957_v41, %v4957_v41  ;;  %v3291_v53 = vld [vmem:[%s3686_s10 + $0x380] sm:$0xff] }
 0x169   : > { %7094 = vst [vmem:[#allocation111_spill] sm:$0xff] %v4976_v23  ;;  %7095 = vst [vmem:[#allocation112_spill] sm:$0xff] %v4979_v26  ;;  %v4990_v55 = vpop.xlane.xlu0 %680  ;;  %v4998_v14 = vsub.f32 %v3289_v16, %v860_v40  ;;  %v1209_v19 = vmul.f32 %v4960_v32, %v4960_v32  ;;  %v5003_v0 = vsub.f32 %v3290_v20, %v863_v62  ;;  %v867_v10 = vmul.f32 0.0052083335, %v4867_v7 }
 0x16a   : > { %7096 = vst [vmem:[#allocation113_spill] sm:$0xff] %v4986_v5  ;;  %v5006_v4 = vsub.f32 %v3291_v53, %v862_v49  ;;  %v1504_v41 = vsel %vm413_vm0, %v1205_v47, 0.0  ;;  %v1215_v40 = vmul.f32 %v4979_v26, %v4979_v26  ;;  %v866_v16 = vmul.f32 0.0052083335, %v4878_v63  ;;  %v3292_v47 = vld [vmem:[%s3686_s10 + $0x3b8] sm:$0xff]  ;;  %v3293_v63 = vld [vmem:[%s3686_s10 + $0x3a8] sm:$0xff] }
 0x16b   : > { %7097 = vst [vmem:[#allocation114_spill] sm:$0xff] %v4998_v14  ;;  %7098 = vst [vmem:[#allocation115_spill] sm:$0xff] %v5003_v0  ;;  %1454 = vadd.xlane.f32.xlu1 %v4766_v22  ;;  %v5017_v62 = vadd.f32 %v1496_v52, %v1200_v11  ;;  %v5019_v49 = vadd.f32 %v1508_v38, %v1206_v58  ;;  %v1210_v22 = vmul.f32 %v4976_v23, %v4976_v23  ;;  %v3295_v23 = vld [vmem:[%s3686_s10 + $0x3d8] sm:$0xff] }
 0x16c   : > { %7099 = vst [vmem:[#allocation116_spill] sm:$0xff] %v5006_v4  ;;  %1450 = vadd.xlane.f32.xlu0 %v4780_v57  ;;  %v5015_v32 = vpop.xlane.xlu1 %692  ;;  %v1213_v7 = vmul.f32 %v4986_v5, %v4986_v5  ;;  %v5026_v20 = vsub.f32 %v3292_v47, %v865_v6  ;;  %v5029_v57 = vsub.f32 %v3293_v63, %v864_v3  ;;  %v1516_v52 = vsel %vm413_vm0, %v1211_v50, 0.0  ;;  %v3294_v63 = vld [vmem:[%s3686_s10 + $0x3b0] sm:$0xff] }
 0x16d   : > { %v5031_v53 = vpop.xlane.xlu0 %688  ;;  %v1208_v11 = vmul.f32 %v4998_v14, %v4998_v14  ;;  %v5035_v58 = vadd.f32 %v1504_v41, %v1204_v59  ;;  %v1512_v38 = vsel %vm413_vm0, %v1209_v19, 0.0  ;;  %v1214_v5 = vmul.f32 %v5003_v0, %v5003_v0  ;;  %v3296_v41 = vld [vmem:[%s3686_s10 + $0x3c8] sm:$0xff]  ;;  %v3299_v14 = vld [vmem:[%s3686_s10 + $0x3c0] sm:$0xff] }
 0x16e   : > { %7100 = vst [vmem:[#allocation117_spill] sm:$0xff] %v5026_v20  ;;  %7101 = vst [vmem:[#allocation118_spill] sm:$0xff] %v5029_v57  ;;  %v1212_v47 = vmul.f32 %v5006_v4, %v5006_v4  ;;  %v5044_v26 = vsub.f32 %v3294_v63, %v865_v6  ;;  %v5047_v35 = vsub.f32 %v3295_v23, %v867_v10  ;;  %v869_v50 = vmul.f32 0.0052083335, %v4906_v42  ;;  %v3297_v63 = vld [vmem:[%s3686_s10 + $0x3a0] sm:$0xff] }
 0x16f   : > { %1462 = vadd.xlane.f32.xlu1 %v4823_v24  ;;  %v5051_v59 = vsub.f32 %v3296_v41, %v866_v16  ;;  %v868_v19 = vmul.f32 0.0052083335, %v4915_v28  ;;  %v1524_v6 = vsel %vm413_vm0, %v1215_v40, 0.0  ;;  %v1219_v23 = vmul.f32 %v5026_v20, %v5026_v20 }
 0x170   : > { %7102 = vst [vmem:[#allocation119_spill] sm:$0xff] %v5044_v26  ;;  %7103 = vst [vmem:[#allocation120_spill] sm:$0xff] %v5047_v35  ;;  %1458 = vadd.xlane.f32.xlu0 %v4839_v39  ;;  %v5056_v4 = vpop.xlane.xlu1 %700  ;;  %v5062_v0 = vsub.f32 %v3297_v63, %v864_v3  ;;  %v1217_v24 = vmul.f32 %v5029_v57, %v5029_v57  ;;  %v1520_v42 = vsel %vm413_vm0, %v1213_v7, 0.0  ;;  %v3298_v39 = vld [vmem:[%s3686_s10 + $0x3d0] sm:$0xff]  ;;  %v871_v20 = vmul.f32 0.0052083335, %v4941_v8 }
 0x171   : > { %7104 = vst [vmem:[#allocation121_spill] sm:$0xff] %v5051_v59  ;;  %v5066_v41 = vpop.xlane.xlu0 %696  ;;  %v5070_v28 = vsub.f32 %v3298_v39, %v867_v10  ;;  %v5073_v40 = vsub.f32 %v3299_v14, %v866_v16  ;;  %v5076_v27 = vadd.f32 %v1516_v52, %v1210_v22  ;;  %v1218_v3 = vmul.f32 %v5044_v26, %v5044_v26  ;;  %v3300_v10 = vld [vmem:[%s3686_s10 + $0x3f8] sm:$0xff]  ;;  %v3301_v16 = vld [vmem:[%s3686_s10 + $0x3e8] sm:$0xff] }
 0x172   : > { %7105 = vst [vmem:[#allocation122_spill] sm:$0xff] %v5062_v0  ;;  %v1223_v63 = vmul.f32 %v5047_v35, %v5047_v35  ;;  %v5083_v57 = vadd.f32 %v1512_v38, %v1208_v11  ;;  %v5085_v7 = vadd.f32 %v1524_v6, %v1214_v5  ;;  %v1221_v14 = vmul.f32 %v5051_v59, %v5051_v59  ;;  %v3322_v26 = vld [vmem:[%s3686_s10 + $0x488] sm:$0xff] }
 0x173   : > { %7106 = vst [vmem:[#allocation123_spill] sm:$0xff] %v5070_v28  ;;  %7107 = vst [vmem:[#allocation124_spill] sm:$0xff] %v5073_v40  ;;  %1470 = vadd.xlane.f32.xlu1 %v4846_v15  ;;  %v5090_v8 = vsub.f32 %v3300_v10, %v869_v50  ;;  %v5093_v22 = vsub.f32 %v3301_v16, %v868_v19  ;;  %v5098_v15 = vadd.f32 %v1520_v42, %v1212_v47  ;;  %v3302_v47 = vld [vmem:[%s3686_s10 + $0x3f0] sm:$0xff]  ;;  %v3303_v16 = vld [vmem:[%s3686_s10 + $0x418] sm:$0xff] }
 0x174   : > { %1466 = vadd.xlane.f32.xlu0 %v4885_v37  ;;  %v5096_v52 = vpop.xlane.xlu1 %708  ;;  %v1216_v5 = vmul.f32 %v5062_v0, %v5062_v0  ;;  %v870_v11 = vmul.f32 0.0052083335, %v4947_v30  ;;  %v1532_v6 = vsel %vm413_vm0, %v1219_v23, 0.0  ;;  %v1528_v39 = vsel %vm413_vm0, %v1217_v24, 0.0  ;;  %v3304_v30 = vld [vmem:[%s3686_s10 + $0x3e0] sm:$0xff] }
 0x175   : > { %7108 = vst [vmem:[#allocation125_spill] sm:$0xff] %v5090_v8  ;;  %7109 = vst [vmem:[#allocation126_spill] sm:$0xff] %v5093_v22  ;;  %v5103_v38 = vpop.xlane.xlu0 %704  ;;  %v1222_v10 = vmul.f32 %v5070_v28, %v5070_v28  ;;  %v1220_v37 = vmul.f32 %v5073_v40, %v5073_v40  ;;  %v5112_v42 = vsub.f32 %v3302_v47, %v869_v50  ;;  %v873_v23 = vmul.f32 0.0052083335, %v4982_v21  ;;  %v3305_v47 = vld [vmem:[%s3686_s10 + $0x410] sm:$0xff] }
 0x176   : > { %v5115_v59 = vsub.f32 %v3303_v16, %v871_v20  ;;  %v5118_v35 = vsub.f32 %v3304_v30, %v868_v19  ;;  %v872_v24 = vmul.f32 0.0052083335, %v4990_v55  ;;  %v1540_v28 = vsel %vm413_vm0, %v1223_v63, 0.0 }
 0x177   : > { %7110 = vst [vmem:[#allocation127_spill] sm:$0xff] %v5112_v42  ;;  %1478 = vadd.xlane.f32.xlu1 %v4887_v60  ;;  %v1227_v40 = vmul.f32 %v5090_v8, %v5090_v8  ;;  %v1225_v50 = vmul.f32 %v5093_v22, %v5093_v22  ;;  %v5129_v16 = vsub.f32 %v3305_v47, %v871_v20  ;;  %v1536_v55 = vsel %vm413_vm0, %v1221_v14, 0.0  ;;  %v3306_v60 = vld [vmem:[%s3686_s10 + $0x408] sm:$0xff] }
 0x178   : > { %7111 = vst [vmem:[#allocation128_spill] sm:$0xff] %v5115_v59  ;;  %7112 = vst [vmem:[#allocation129_spill] sm:$0xff] %v5118_v35  ;;  %1474 = vadd.xlane.f32.xlu0 %v4908_v51  ;;  %v5132_v21 = vpop.xlane.xlu1 %716  ;;  %v5136_v19 = vsub.f32 %v3306_v60, %v870_v11  ;;  %v875_v63 = vmul.f32 0.0052083335, %v5015_v32  ;;  %v5141_v22 = vadd.f32 %v1532_v6, %v1218_v3  ;;  %v874_v14 = vmul.f32 0.0052083335, %v5031_v53 }
 0x179   : > { %7113 = vst [vmem:[#allocation130_spill] sm:$0xff] %v5129_v16  ;;  %v5139_v30 = vpop.xlane.xlu0 %712  ;;  %v5143_v8 = vadd.f32 %v1528_v39, %v1216_v5  ;;  %v1226_v51 = vmul.f32 %v5112_v42, %v5112_v42  ;;  %v1231_v20 = vmul.f32 %v5115_v59, %v5115_v59  ;;  %v5150_v47 = vadd.f32 %v1540_v28, %v1222_v10  ;;  %v3307_v60 = vld [vmem:[%s3686_s10 + $0x438] sm:$0xff]  ;;  %v3308_v5 = vld [vmem:[%s3686_s10 + $0x428] sm:$0xff]  ;;  %v3309_v28 = vld [vmem:[%s3686_s10 + $0x400] sm:$0xff] }
 0x17a   : > { %7114 = vst [vmem:[#allocation131_spill] sm:$0xff] %v5136_v19  ;;  %v1224_v32 = vmul.f32 %v5118_v35, %v5118_v35  ;;  %v5155_v3 = vsub.f32 %v3307_v60, %v873_v23  ;;  %v5158_v6 = vsub.f32 %v3308_v5, %v872_v24  ;;  %v5161_v39 = vadd.f32 %v1536_v55, %v1220_v37  ;;  %v3310_v37 = vld [vmem:[%s3686_s10 + $0x430] sm:$0xff] }
 0x17b   : > { %1486 = vadd.xlane.f32.xlu1 %v4949_v2  ;;  %v1230_v53 = vmul.f32 %v5129_v16, %v5129_v16  ;;  %v5166_v10 = vsub.f32 %v3309_v28, %v870_v11  ;;  %v1548_v60 = vsel %vm413_vm0, %v1227_v40, 0.0  ;;  %v1544_v5 = vsel %vm413_vm0, %v1225_v50, 0.0  ;;  %v3311_v16 = vld [vmem:[%s3686_s10 + $0x458] sm:$0xff]  ;;  %v3312_v28 = vld [vmem:[%s3686_s10 + $0x420] sm:$0xff]  ;;  %v3313_v40 = vld [vmem:[%s3686_s10 + $0x448] sm:$0xff] }
 0x17c   : > { %7115 = vst [vmem:[#allocation132_spill] sm:$0xff] %v5155_v3  ;;  %7116 = vst [vmem:[#allocation133_spill] sm:$0xff] %v5158_v6  ;;  %1482 = vadd.xlane.f32.xlu0 %v4951_v61  ;;  %v5169_v59 = vpop.xlane.xlu1 %724  ;;  %v1229_v2 = vmul.f32 %v5136_v19, %v5136_v19  ;;  %v5176_v55 = vsub.f32 %v3310_v37, %v873_v23  ;;  %v5179_v35 = vsub.f32 %v3311_v16, %v875_v63 }
 0x17d   : > { %7117 = vst [vmem:[#allocation134_spill] sm:$0xff] %v5166_v10  ;;  %v877_v11 = vmul.f32 0.0052083335, %v5056_v4  ;;  %v5182_v61 = vpop.xlane.xlu0 %720  ;;  %v5185_v42 = vsub.f32 %v3312_v28, %v872_v24  ;;  %v5188_v50 = vsub.f32 %v3313_v40, %v874_v14  ;;  %v876_v0 = vmul.f32 0.0052083335, %v5066_v41  ;;  %v3314_v4 = vld [vmem:[%s3686_s10 + $0x450] sm:$0xff] }
 0x17e   : > { %7118 = vst [vmem:[#allocation135_spill] sm:$0xff] %v5176_v55  ;;  %7119 = vst [vmem:[#allocation136_spill] sm:$0xff] %v5179_v35  ;;  %v1556_v23 = vsel %vm413_vm0, %v1231_v20, 0.0  ;;  %v1235_v16 = vmul.f32 %v5155_v3, %v5155_v3  ;;  %v1233_v37 = vmul.f32 %v5158_v6, %v5158_v6  ;;  %v5197_v19 = vsub.f32 %v3314_v4, %v875_v63  ;;  %v3315_v41 = vld [vmem:[%s3686_s10 + $0x440] sm:$0xff]  ;;  %v3316_v63 = vld [vmem:[%s3686_s10 + $0x478] sm:$0xff] }
 0x17f   : > { %7120 = vst [vmem:[#allocation137_spill] sm:$0xff] %v5185_v42  ;;  %7121 = vst [vmem:[#allocation138_spill] sm:$0xff] %v5188_v50  ;;  %1494 = vadd.xlane.f32.xlu1 %v4962_v18  ;;  %v5200_v24 = vadd.f32 %v1548_v60, %v1226_v51  ;;  %v1228_v28 = vmul.f32 %v5166_v10, %v5166_v10  ;;  %v5205_v40 = vsub.f32 %v3315_v41, %v874_v14  ;;  %v3317_v4 = vld [vmem:[%s3686_s10 + $0x468] sm:$0xff]  ;;  %v3321_v10 = vld [vmem:[%s3686_s10 + $0x490] sm:$0xff] }
 0x180   : > { %7122 = vst [vmem:[#allocation139_spill] sm:$0xff] %v5197_v19  ;;  %v879_v20 = vmul.f32 0.0052083335, %v5096_v52  ;;  %1490 = vadd.xlane.f32.xlu0 %v4969_v46  ;;  %v5209_v3 = vpop.xlane.xlu1 %732  ;;  %v5211_v6 = vadd.f32 %v1544_v5, %v1224_v32  ;;  %v1239_v18 = vmul.f32 %v5179_v35, %v5179_v35  ;;  %v5216_v51 = vsub.f32 %v3316_v63, %v877_v11 }
 0x181   : > { %7123 = vst [vmem:[#allocation140_spill] sm:$0xff] %v5205_v40  ;;  %v5218_v60 = vpop.xlane.xlu0 %728  ;;  %v5220_v14 = vadd.f32 %v1556_v23, %v1230_v53  ;;  %v1552_v52 = vsel %vm413_vm0, %v1229_v2, 0.0  ;;  %v1234_v46 = vmul.f32 %v5176_v55, %v5176_v55  ;;  %v1232_v32 = vmul.f32 %v5185_v42, %v5185_v42 }
 0x182   : > { %7124 = vst [vmem:[#allocation141_spill] sm:$0xff] %v5216_v51  ;;  %v1237_v5 = vmul.f32 %v5188_v50, %v5188_v50  ;;  %v5230_v41 = vsub.f32 %v3317_v4, %v876_v0  ;;  %v1238_v63 = vmul.f32 %v5197_v19, %v5197_v19  ;;  %v878_v53 = vmul.f32 0.0052083335, %v5103_v38  ;;  %v3318_v50 = vld [vmem:[%s3686_s10 + $0x470] sm:$0xff]  ;;  %v3319_v4 = vld [vmem:[%s3686_s10 + $0x498] sm:$0xff] }
 0x183   : > { %1502 = vadd.xlane.f32.xlu1 %v4971_v48  ;;  %v1564_v2 = vsel %vm413_vm0, %v1235_v16, 0.0  ;;  %v1560_v23 = vsel %vm413_vm0, %v1233_v37, 0.0  ;;  %v1236_v35 = vmul.f32 %v5205_v40, %v5205_v40  ;;  %v5241_v42 = vsub.f32 %v3318_v50, %v877_v11  ;;  %v3320_v16 = vld [vmem:[%s3686_s10 + $0x460] sm:$0xff] }
 0x184   : > { %7125 = vst [vmem:[#allocation142_spill] sm:$0xff] %v5230_v41  ;;  %v5244_v55 = vsub.f32 %v3319_v4, %v879_v20  ;;  %v881_v19 = vmul.f32 0.0052083335, %v5132_v21  ;;  %1498 = vadd.xlane.f32.xlu0 %v5017_v62  ;;  %v741_v48 = vpop.xlane.xlu1 %740  ;;  %v1243_v38 = vmul.f32 %v5216_v51, %v5216_v51  ;;  %v5251_v37 = vsub.f32 %v3320_v16, %v876_v0 }
 0x185   : > { %7126 = vst [vmem:[#allocation143_spill] sm:$0xff] %v5241_v42  ;;  %v880_v40 = vmul.f32 0.0052083335, %v5139_v30  ;;  %v737_v11 = vpop.xlane.xlu0 %736  ;;  %v1572_v50 = vsel %vm413_vm0, %v1239_v18, 0.0  ;;  %v1241_v4 = vmul.f32 %v5230_v41, %v5230_v41  ;;  %v5258_v21 = vsub.f32 %v3321_v10, %v879_v20  ;;  %v3323_v20 = vld [vmem:[%s3686_s10 + $0x4b8] sm:$0xff]  ;;  %v3326_v41 = vld [vmem:[%s3686_s10 + $0x4b0] sm:$0xff] }
 0x186   : > { %7127 = vst [vmem:[#allocation144_spill] sm:$0xff] %v5244_v55  ;;  %7128 = vst [vmem:[#allocation145_spill] sm:$0xff] %v5251_v37  ;;  %v5260_v62 = vadd.f32 %v1552_v52, %v1228_v28  ;;  %v1568_v51 = vsel %vm413_vm0, %v1237_v5, 0.0  ;;  %v5264_v0 = vsub.f32 %v3322_v26, %v878_v53  ;;  %v883_v30 = vmul.f32 0.0052083335, %v5169_v59 }
 0x187   : > { %7129 = vst [vmem:[#allocation146_spill] sm:$0xff] %v5258_v21  ;;  %1510 = vadd.xlane.f32.xlu1 %v5019_v49  ;;  %v5268_v16 = vadd.f32 %v1564_v2, %v1234_v46  ;;  %v5270_v18 = vadd.f32 %v1560_v23, %v1232_v32  ;;  %v1242_v10 = vmul.f32 %v5241_v42, %v5241_v42  ;;  %v3324_v46 = vld [vmem:[%s3686_s10 + $0x4a8] sm:$0xff]  ;;  %v1580_v23 = vsel %vm413_vm0, %v1243_v38, 0.0 }
 0x188   : > { %7130 = vst [vmem:[#allocation147_spill] sm:$0xff] %v5264_v0  ;;  %v1247_v28 = vmul.f32 %v5244_v55, %v5244_v55  ;;  %v5277_v52 = vsub.f32 %v3323_v20, %v881_v19  ;;  %1506 = vadd.xlane.f32.xlu0 %v5035_v58  ;;  %v5280_v26 = vpop.xlane.xlu1 %748  ;;  %v5282_v49 = vadd.f32 %v1572_v50, %v1238_v63  ;;  %v3325_v20 = vld [vmem:[%s3686_s10 + $0x480] sm:$0xff]  ;;  %v882_v63 = vmul.f32 0.0052083335, %v5182_v61 }
 0x189   : > { %v1240_v59 = vmul.f32 %v5251_v37, %v5251_v37  ;;  %v5287_v32 = vsub.f32 %v3324_v46, %v880_v40  ;;  %v745_v5 = vpop.xlane.xlu0 %744  ;;  %v5289_v2 = vadd.f32 %v1568_v51, %v1236_v35  ;;  %v1246_v58 = vmul.f32 %v5258_v21, %v5258_v21  ;;  %v3327_v35 = vld [vmem:[%s3686_s10 + $0x4d8] sm:$0xff] }
 0x18a   : > { %7131 = vst [vmem:[#allocation148_spill] sm:$0xff] %v5277_v52  ;;  %v5295_v55 = vsub.f32 %v3325_v20, %v878_v53  ;;  %v1576_v50 = vsel %vm413_vm0, %v1241_v4, 0.0  ;;  %v1245_v46 = vmul.f32 %v5264_v0, %v5264_v0  ;;  %v5302_v37 = vsub.f32 %v3326_v41, %v881_v19  ;;  %v3328_v53 = vld [vmem:[%s3686_s10 + $0x4a0] sm:$0xff] }
 0x18b   : > { %7132 = vst [vmem:[#allocation149_spill] sm:$0xff] %v5287_v32  ;;  %v5305_v51 = vsub.f32 %v3327_v35, %v883_v30  ;;  %v885_v38 = vmul.f32 0.0052083335, %v5209_v3  ;;  %1518 = vadd.xlane.f32.xlu1 %v5076_v27  ;;  %v1251_v61 = vmul.f32 %v5277_v52, %v5277_v52  ;;  %v5312_v4 = vsub.f32 %v3328_v53, %v880_v40  ;;  %v3329_v35 = vld [vmem:[%s3686_s10 + $0x4d0] sm:$0xff] }
 0x18c   : > { %7133 = vst [vmem:[#allocation150_spill] sm:$0xff] %v5295_v55  ;;  %7134 = vst [vmem:[#allocation151_spill] sm:$0xff] %v5302_v37  ;;  %v884_v20 = vmul.f32 0.0052083335, %v5218_v60  ;;  %1514 = vadd.xlane.f32.xlu0 %v5083_v57  ;;  %v5316_v19 = vpop.xlane.xlu1 %756  ;;  %v1588_v41 = vsel %vm413_vm0, %v1247_v28, 0.0  ;;  %v1249_v3 = vmul.f32 %v5287_v32, %v5287_v32  ;;  %v5322_v27 = vsub.f32 %v3329_v35, %v883_v30  ;;  %v3330_v57 = vld [vmem:[%s3686_s10 + $0x4c8] sm:$0xff] }
 0x18d   : > { %7135 = vst [vmem:[#allocation152_spill] sm:$0xff] %v5305_v51  ;;  %7136 = vst [vmem:[#allocation153_spill] sm:$0xff] %v5312_v4  ;;  %v887_v0 = vmul.f32 0.0052083335, %v741_v48  ;;  %v5324_v52 = vpop.xlane.xlu0 %752  ;;  %v5326_v40 = vadd.f32 %v1580_v23, %v1242_v10  ;;  %v1244_v60 = vmul.f32 %v5295_v55, %v5295_v55  ;;  %v5331_v53 = vsub.f32 %v3330_v57, %v882_v63  ;;  %v3331_v48 = vld [vmem:[%s3686_s10 + $0x4f8] sm:$0xff] }
 0x18e   : > { %7137 = vst [vmem:[#allocation154_spill] sm:$0xff] %v5322_v27  ;;  %v886_v21 = vmul.f32 0.0052083335, %v737_v11  ;;  %v5333_v28 = vadd.f32 %v1576_v50, %v1240_v59  ;;  %v1255_v30 = vmul.f32 %v5305_v51, %v5305_v51  ;;  %v5338_v35 = vsub.f32 %v3331_v48, %v885_v38  ;;  %v3332_v50 = vld [vmem:[%s3686_s10 + $0x4e8] sm:$0xff]  ;;  %v3334_v51 = vld [vmem:[%s3686_s10 + $0x518] sm:$0xff] }
 0x18f   : > { %7138 = vst [vmem:[#allocation155_spill] sm:$0xff] %v5331_v53  ;;  %1526 = vadd.xlane.f32.xlu1 %v5085_v7  ;;  %v5341_v10 = vadd.f32 %v1588_v41, %v1246_v58  ;;  %v1584_v23 = vsel %vm413_vm0, %v1245_v46, 0.0  ;;  %v1250_v11 = vmul.f32 %v5302_v37, %v5302_v37  ;;  %v1248_v59 = vmul.f32 %v5312_v4, %v5312_v4  ;;  %v3333_v46 = vld [vmem:[%s3686_s10 + $0x4c0] sm:$0xff]  ;;  %v3335_v37 = vld [vmem:[%s3686_s10 + $0x4f0] sm:$0xff] }
 0x190   : > { %7139 = vst [vmem:[#allocation156_spill] sm:$0xff] %v5338_v35  ;;  %v5349_v57 = vsub.f32 %v3332_v50, %v884_v20  ;;  %1522 = vadd.xlane.f32.xlu0 %v5098_v15  ;;  %v765_v48 = vpop.xlane.xlu1 %764  ;;  %v1596_v7 = vsel %vm413_vm0, %v1251_v61, 0.0  ;;  %v1254_v58 = vmul.f32 %v5322_v27, %v5322_v27  ;;  %v5356_v41 = vsub.f32 %v3333_v46, %v882_v63  ;;  %v3336_v61 = vld [vmem:[%s3686_s10 + $0x508] sm:$0xff] }
 0x191   : > { %v5359_v32 = vsub.f32 %v3334_v51, %v887_v0  ;;  %v761_v4 = vpop.xlane.xlu0 %760  ;;  %v1592_v50 = vsel %vm413_vm0, %v1249_v3, 0.0  ;;  %v1253_v15 = vmul.f32 %v5331_v53, %v5331_v53  ;;  %v5365_v55 = vsub.f32 %v3335_v37, %v885_v38  ;;  %v3337_v51 = vld [vmem:[%s3686_s10 + $0x4e0] sm:$0xff]  ;;  %v3338_v38 = vld [vmem:[%s3686_s10 + $0x510] sm:$0xff] }
 0x192   : > { %7140 = vst [vmem:[#allocation157_spill] sm:$0xff] %v5349_v57  ;;  %v5368_v42 = vsub.f32 %v3336_v61, %v886_v21  ;;  %v889_v27 = vmul.f32 0.0052083335, %v5280_v26  ;;  %v1259_v63 = vmul.f32 %v5338_v35, %v5338_v35  ;;  %v5374_v46 = vsub.f32 %v3337_v51, %v884_v20 }
 0x193   : > { %7141 = vst [vmem:[#allocation158_spill] sm:$0xff] %v5359_v32  ;;  %7142 = vst [vmem:[#allocation159_spill] sm:$0xff] %v5365_v55  ;;  %v888_v13 = vmul.f32 0.0052083335, %v745_v5  ;;  %1534 = vadd.xlane.f32.xlu1 %v5141_v22  ;;  %v1604_v3 = vsel %vm413_vm0, %v1255_v30, 0.0  ;;  %v1257_v37 = vmul.f32 %v5349_v57, %v5349_v57  ;;  %v5381_v61 = vsub.f32 %v3338_v38, %v887_v0  ;;  %v3339_v30 = vld [vmem:[%s3686_s10 + $0x500] sm:$0xff] }
 0x194   : > { %7143 = vst [vmem:[#allocation160_spill] sm:$0xff] %v5368_v42  ;;  %7144 = vst [vmem:[#allocation161_spill] sm:$0xff] %v5374_v46  ;;  %1530 = vadd.xlane.f32.xlu0 %v5143_v8  ;;  %v773_v26 = vpop.xlane.xlu1 %772  ;;  %v5384_v35 = vadd.f32 %v1584_v23, %v1244_v60  ;;  %v5386_v20 = vadd.f32 %v1596_v7, %v1250_v11  ;;  %v1252_v22 = vmul.f32 %v5356_v41, %v5356_v41  ;;  %v3340_v38 = vld [vmem:[%s3686_s10 + $0x538] sm:$0xff] }
 0x195   : > { %7145 = vst [vmem:[#allocation162_spill] sm:$0xff] %v5381_v61  ;;  %v1263_v5 = vmul.f32 %v5359_v32, %v5359_v32  ;;  %v5393_v51 = vsub.f32 %v3339_v30, %v886_v21  ;;  %v769_v57 = vpop.xlane.xlu0 %768  ;;  %v5395_v0 = vadd.f32 %v1592_v50, %v1248_v59  ;;  %v1261_v8 = vmul.f32 %v5368_v42, %v5368_v42  ;;  %v3341_v30 = vld [vmem:[%s3686_s10 + $0x528] sm:$0xff] }
 0x196   : > { %v5400_v60 = vsub.f32 %v3340_v38, %v889_v27  ;;  %v5402_v23 = vadd.f32 %v1604_v3, %v1254_v58  ;;  %v1600_v11 = vsel %vm413_vm0, %v1253_v15, 0.0  ;;  %v1258_v7 = vmul.f32 %v5365_v55, %v5365_v55 }
 0x197   : > { %7146 = vst [vmem:[#allocation163_spill] sm:$0xff] %v5393_v51  ;;  %v1256_v21 = vmul.f32 %v5374_v46, %v5374_v46  ;;  %v5410_v59 = vsub.f32 %v3341_v30, %v888_v13  ;;  %1542 = vadd.xlane.f32.xlu1 %v5150_v47  ;;  %v1612_v50 = vsel %vm413_vm0, %v1259_v63, 0.0  ;;  %v1262_v38 = vmul.f32 %v5381_v61, %v5381_v61  ;;  %v3342_v47 = vld [vmem:[%s3686_s10 + $0x530] sm:$0xff] }
 0x198   : > { %7147 = vst [vmem:[#allocation164_spill] sm:$0xff] %v5400_v60  ;;  %v891_v58 = vmul.f32 0.0052083335, %v5316_v19  ;;  %v890_v15 = vmul.f32 0.0052083335, %v5324_v52  ;;  %1538 = vadd.xlane.f32.xlu0 %v5161_v39  ;;  %v781_v3 = vpop.xlane.xlu1 %780  ;;  %v1608_v42 = vsel %vm413_vm0, %v1257_v37, 0.0  ;;  %v1260_v30 = vmul.f32 %v5393_v51, %v5393_v51 }
 0x199   : > { %7148 = vst [vmem:[#allocation165_spill] sm:$0xff] %v5410_v59  ;;  %v5423_v32 = vsub.f32 %v3342_v47, %v889_v27  ;;  %v893_v63 = vmul.f32 0.0052083335, %v765_v48  ;;  %v777_v61 = vpop.xlane.xlu0 %776  ;;  %v1620_v46 = vsel %vm413_vm0, %v1263_v5, 0.0  ;;  %v1267_v52 = vmul.f32 %v5400_v60, %v5400_v60  ;;  %v3343_v37 = vld [vmem:[%s3686_s10 + $0x520] sm:$0xff]  ;;  %v3344_v47 = vld [vmem:[%s3686_s10 + $0x558] sm:$0xff] }
 0x19a   : > { %v892_v19 = vmul.f32 0.0052083335, %v761_v4  ;;  %v895_v39 = vmul.f32 0.0052083335, %v773_v26  ;;  %v1616_v55 = vsel %vm413_vm0, %v1261_v8, 0.0  ;;  %v5430_v53 = vsub.f32 %v3343_v37, %v888_v13  ;;  %v3345_v26 = vld [vmem:[%s3686_s10 + $0x548] sm:$0xff] }
 0x19b   : > { %7149 = vst [vmem:[#allocation166_spill] sm:$0xff] %v5423_v32  ;;  %v1265_v27 = vmul.f32 %v5410_v59, %v5410_v59  ;;  %1550 = vadd.xlane.f32.xlu1 %v5200_v24  ;;  %v5435_v48 = vadd.f32 %v1600_v11, %v1252_v22  ;;  %v5437_v5 = vadd.f32 %v1612_v50, %v1258_v7  ;;  %v894_v60 = vmul.f32 0.0052083335, %v769_v57  ;;  %v3346_v22 = vld [vmem:[%s3686_s10 + $0x578] sm:$0xff] }
 0x19c   : > { %7150 = vst [vmem:[#allocation167_spill] sm:$0xff] %v5430_v53  ;;  %v5440_v4 = vsub.f32 %v3344_v47, %v891_v58  ;;  %v5443_v8 = vsub.f32 %v3345_v26, %v890_v15  ;;  %1546 = vadd.xlane.f32.xlu0 %v5211_v6  ;;  %v5446_v13 = vpop.xlane.xlu1 %788  ;;  %v5448_v37 = vadd.f32 %v1608_v42, %v1256_v21  ;;  %v3347_v6 = vld [vmem:[%s3686_s10 + $0x568] sm:$0xff]  ;;  %v3348_v42 = vld [vmem:[%s3686_s10 + $0x598] sm:$0xff]  ;;  %v897_v26 = vmul.f32 0.0052083335, %v781_v3 }
 0x19d   : > { %v1266_v24 = vmul.f32 %v5423_v32, %v5423_v32  ;;  %v5453_v11 = vsub.f32 %v3346_v22, %v893_v63  ;;  %v5455_v7 = vpop.xlane.xlu0 %784  ;;  %v5457_v50 = vadd.f32 %v1620_v46, %v1262_v38  ;;  %v5459_v47 = vadd.f32 %v1616_v55, %v1260_v30  ;;  %v3349_v32 = vld [vmem:[%s3686_s10 + $0x550] sm:$0xff]  ;;  %v3350_v55 = vld [vmem:[%s3686_s10 + $0x540] sm:$0xff] }
 0x19e   : > { %7151 = vst [vmem:[#allocation168_spill] sm:$0xff] %v5440_v4  ;;  %7152 = vst [vmem:[#allocation169_spill] sm:$0xff] %v5443_v8  ;;  %v5462_v57 = vsub.f32 %v3347_v6, %v892_v19  ;;  %v5465_v21 = vsub.f32 %v3348_v42, %v895_v39  ;;  %v1628_v59 = vsel %vm413_vm0, %v1267_v52, 0.0  ;;  %v1264_v22 = vmul.f32 %v5430_v53, %v5430_v53  ;;  %v3351_v6 = vld [vmem:[%s3686_s10 + $0x570] sm:$0xff] }
 0x19f   : > { %7153 = vst [vmem:[#allocation170_spill] sm:$0xff] %v5453_v11  ;;  %v5471_v46 = vsub.f32 %v3349_v32, %v891_v58  ;;  %v5474_v38 = vsub.f32 %v3350_v55, %v890_v15  ;;  %1558 = vadd.xlane.f32.xlu1 %v5220_v14  ;;  %v1624_v30 = vsel %vm413_vm0, %v1265_v27, 0.0  ;;  %v1271_v3 = vmul.f32 %v5440_v4, %v5440_v4  ;;  %v3352_v32 = vld [vmem:[%s3686_s10 + $0x588] sm:$0xff]  ;;  %v3353_v27 = vld [vmem:[%s3686_s10 + $0x560] sm:$0xff]  ;;  %v3354_v4 = vld [vmem:[%s3686_s10 + $0x590] sm:$0xff] }
 0x1a0   : > { %7154 = vst [vmem:[#allocation171_spill] sm:$0xff] %v5462_v57  ;;  %7155 = vst [vmem:[#allocation172_spill] sm:$0xff] %v5465_v21  ;;  %v1269_v52 = vmul.f32 %v5443_v8, %v5443_v8  ;;  %v5483_v42 = vsub.f32 %v3351_v6, %v893_v63  ;;  %v5486_v58 = vsub.f32 %v3352_v32, %v894_v60  ;;  %1554 = vadd.xlane.f32.xlu0 %v5260_v62  ;;  %v797_v15 = vpop.xlane.xlu1 %796  ;;  %v3355_v6 = vld [vmem:[%s3686_s10 + $0x5b8] sm:$0xff] }
 0x1a1   : > { %7156 = vst [vmem:[#allocation173_spill] sm:$0xff] %v5474_v38  ;;  %v1275_v14 = vmul.f32 %v5453_v11, %v5453_v11  ;;  %v5492_v55 = vsub.f32 %v3353_v27, %v892_v19  ;;  %v5495_v53 = vsub.f32 %v3354_v4, %v895_v39  ;;  %v793_v8 = vpop.xlane.xlu0 %792  ;;  %v5497_v51 = vadd.f32 %v1628_v59, %v1266_v24  ;;  %v3356_v4 = vld [vmem:[%s3686_s10 + $0x580] sm:$0xff] }
 0x1a2   : > { %7157 = vst [vmem:[#allocation174_spill] sm:$0xff] %v5483_v42  ;;  %7158 = vst [vmem:[#allocation175_spill] sm:$0xff] %v5486_v58  ;;  %v1273_v63 = vmul.f32 %v5462_v57, %v5462_v57  ;;  %v1279_v62 = vmul.f32 %v5465_v21, %v5465_v21  ;;  %v5504_v32 = vsub.f32 %v3355_v6, %v897_v26  ;;  %v896_v11 = vmul.f32 0.0052083335, %v777_v61 }
 0x1a3   : > { %7159 = vst [vmem:[#allocation176_spill] sm:$0xff] %v5492_v55  ;;  %7160 = vst [vmem:[#allocation177_spill] sm:$0xff] %v5495_v53  ;;  %v1270_v19 = vmul.f32 %v5471_v46, %v5471_v46  ;;  %v1268_v39 = vmul.f32 %v5474_v38, %v5474_v38  ;;  %v5511_v59 = vsub.f32 %v3356_v4, %v894_v60  ;;  %1566 = vadd.xlane.f32.xlu1 %v5268_v16 }
 0x1a4   : > { %7161 = vst [vmem:[#allocation178_spill] sm:$0xff] %v5504_v32  ;;  %v5514_v24 = vadd.f32 %v1624_v30, %v1264_v22  ;;  %v1274_v27 = vmul.f32 %v5483_v42, %v5483_v42  ;;  %v1277_v61 = vmul.f32 %v5486_v58, %v5486_v58  ;;  %1562 = vadd.xlane.f32.xlu0 %v5270_v18  ;;  %v5521_v6 = vpop.xlane.xlu1 %804  ;;  %v1636_v21 = vsel %vm413_vm0, %v1271_v3, 0.0  ;;  %v3357_v22 = vld [vmem:[%s3686_s10 + $0x5b0] sm:$0xff]  ;;  %v3358_v42 = vld [vmem:[%s3686_s10 + $0x5a8] sm:$0xff] }
 0x1a5   : > { %7162 = vst [vmem:[#allocation179_spill] sm:$0xff] %v5511_v59  ;;  %v1632_v60 = vsel %vm413_vm0, %v1269_v52, 0.0  ;;  %v1272_v4 = vmul.f32 %v5492_v55, %v5492_v55  ;;  %v1278_v16 = vmul.f32 %v5495_v53, %v5495_v53  ;;  %v5530_v30 = vsub.f32 %v3357_v22, %v897_v26  ;;  %v801_v57 = vpop.xlane.xlu0 %800  ;;  %v3359_v22 = vld [vmem:[%s3686_s10 + $0x5a0] sm:$0xff] }
 0x1a6   : > { %v1644_v58 = vsel %vm413_vm0, %v1275_v14, 0.0  ;;  %v1283_v18 = vmul.f32 %v5504_v32, %v5504_v32  ;;  %v5536_v3 = vsub.f32 %v3358_v42, %v896_v11  ;;  %v1640_v52 = vsel %vm413_vm0, %v1273_v63, 0.0 }
 0x1a7   : > { %v1652_v55 = vsel %vm413_vm0, %v1279_v62, 0.0  ;;  %v1276_v38 = vmul.f32 %v5511_v59, %v5511_v59  ;;  %v899_v53 = vmul.f32 0.0052083335, %v5446_v13  ;;  %1574 = vadd.xlane.f32.xlu1 %v5282_v49  ;;  %v5544_v26 = vadd.f32 %v1636_v21, %v1270_v19 }
 0x1a8   : > { %v5546_v14 = vadd.f32 %v1632_v60, %v1268_v39  ;;  %v5549_v32 = vsub.f32 %v3359_v22, %v896_v11  ;;  %v898_v42 = vmul.f32 0.0052083335, %v5455_v7  ;;  %1570 = vadd.xlane.f32.xlu0 %v5289_v2  ;;  %v1303_v63 = vpop.xlane.xlu1 %1302  ;;  %v5553_v62 = vadd.f32 %v1644_v58, %v1274_v27  ;;  %v3360_v27 = vld [vmem:[%s3686_s10 + $0x5d8] sm:$0xff] }
 0x1a9   : > { %v1648_v59 = vsel %vm413_vm0, %v1277_v61, 0.0  ;;  %v1282_v49 = vmul.f32 %v5530_v30, %v5530_v30  ;;  %v1689_v13 = vmul.f32 0.0052083335, %v1303_v63  ;;  %v1299_v21 = vpop.xlane.xlu0 %1298  ;;  %v5558_v19 = vadd.f32 %v1640_v52, %v1272_v4  ;;  %v3362_v52 = vld [vmem:[%s3686_s10 + $0x5c8] sm:$0xff] }
 0x1aa   : > { %v5560_v11 = vadd.f32 %v1652_v55, %v1278_v16  ;;  %v1281_v7 = vmul.f32 %v5536_v3, %v5536_v3  ;;  %v901_v2 = vmul.f32 0.0052083335, %v797_v15  ;;  %v1688_v39 = vmul.f32 0.0052083335, %v1299_v21  ;;  %v3361_v16 = vld [vmem:[%s3686_s10 + $0x5d0] sm:$0xff] }
 0x1ab   : > { %v1660_v58 = vsel %vm413_vm0, %v1283_v18, 0.0  ;;  %v5566_v61 = vsub.f32 %v3360_v27, %v899_v53  ;;  %v900_v60 = vmul.f32 0.0052083335, %v793_v8  ;;  %v1787_v22 = vadd.f32 1e-06, %v1689_v13  ;;  %1582 = vadd.xlane.f32.xlu1 %v5326_v40  ;;  %v3363_v13 = vld [vmem:[%s3686_s10 + $0x5c0] sm:$0xff] }
 0x1ac   : > { %v5569_v4 = vadd.f32 %v1648_v59, %v1276_v38  ;;  %v5573_v55 = vmul.f32 %v5549_v32, %v5549_v32  ;;  %v5576_v15 = vsub.f32 %v3361_v16, %v899_v53  ;;  %v5579_v63 = vsub.f32 %v3362_v52, %v898_v42  ;;  %1578 = vadd.xlane.f32.xlu0 %v5333_v28  ;;  %v1311_v8 = vpop.xlane.xlu1 %1310  ;;  %v3364_v27 = vld [vmem:[%s3686_s10 + $0x5f8] sm:$0xff]  ;;  %v3365_v52 = vld [vmem:[%s3686_s10 + $0x5e8] sm:$0xff] }
 0x1ad   : > { %7163 = vst [vmem:[#allocation180_spill] sm:$0xff] %v5566_v61  ;;  %v1786_v18 = vadd.f32 1e-06, %v1688_v39  ;;  %v5583_v40 = vsub.f32 %v3363_v13, %v898_v42  ;;  %2990 = vrsqrt.f32 %v1787_v22  ;;  %v1691_v38 = vmul.f32 0.0052083335, %v1311_v8  ;;  %v1307_v59 = vpop.xlane.xlu0 %1306 }
 0x1ae   : > { %7164 = vst [vmem:[#allocation181_spill] sm:$0xff] %v5579_v63  ;;  %v5585_v21 = vadd.f32 %v1660_v58, %v1282_v49  ;;  %v5588_v53 = vsub.f32 %v3364_v27, %v901_v2  ;;  %v1690_v16 = vmul.f32 0.0052083335, %v1307_v59  ;;  %v1656_v39 = vsel %vm413_vm0, %v1281_v7, 0.0  ;;  %v3366_v58 = vld [vmem:[%s3686_s10 + $0x5f0] sm:$0xff] }
 0x1af   : > { %7165 = vst [vmem:[#allocation182_spill] sm:$0xff] %v5583_v40  ;;  %2992 = vrsqrt.f32 %v1786_v18  ;;  %v1287_v28 = vmul.f32 %v5566_v61, %v5566_v61  ;;  %v5594_v42 = vsub.f32 %v3365_v52, %v900_v60  ;;  %v903_v22 = vmul.f32 0.0052083335, %v5521_v6  ;;  %1590 = vadd.xlane.f32.xlu1 %v5341_v10  ;;  %v3367_v52 = vld [vmem:[%s3686_s10 + $0x5e0] sm:$0xff] }
 0x1b0   : > { %7166 = vst [vmem:[#allocation183_spill] sm:$0xff] %v5588_v53  ;;  %v1789_v8 = vadd.f32 1e-06, %v1691_v38  ;;  %v1285_v49 = vmul.f32 %v5579_v63, %v5579_v63  ;;  %v5601_v18 = vsub.f32 %v3366_v58, %v901_v2  ;;  %v902_v13 = vmul.f32 0.0052083335, %v801_v57  ;;  %1586 = vadd.xlane.f32.xlu0 %v5384_v35  ;;  %v1319_v59 = vpop.xlane.xlu1 %1318  ;;  %v3368_v58 = vld [vmem:[%s3686_s10 + $0x618] sm:$0xff] }
 0x1b1   : > { %7167 = vst [vmem:[#allocation184_spill] sm:$0xff] %v5594_v42  ;;  %v1788_v7 = vadd.f32 1e-06, %v1690_v16  ;;  %v1286_v27 = vmul.f32 %v5576_v15, %v5576_v15  ;;  %v5607_v6 = vsub.f32 %v3367_v52, %v900_v60  ;;  %v1693_v10 = vmul.f32 0.0052083335, %v1319_v59  ;;  %v1315_v38 = vpop.xlane.xlu0 %1314  ;;  %v3369_v52 = vld [vmem:[%s3686_s10 + $0x608] sm:$0xff] }
 0x1b2   : > { %7168 = vst [vmem:[#allocation185_spill] sm:$0xff] %v5601_v18  ;;  %2994 = vrsqrt.f32 %v1789_v8  ;;  %v1284_v2 = vmul.f32 %v5583_v40, %v5583_v40  ;;  %v1291_v57 = vmul.f32 %v5588_v53, %v5588_v53  ;;  %v1692_v35 = vmul.f32 0.0052083335, %v1315_v38  ;;  %v3371_v61 = vld [vmem:[%s3686_s10 + $0x600] sm:$0xff] }
 0x1b3   : > { %7169 = vst [vmem:[#allocation186_spill] sm:$0xff] %v5607_v6  ;;  %2996 = vrsqrt.f32 %v1788_v7  ;;  %v1289_v16 = vmul.f32 %v5594_v42, %v5594_v42  ;;  %v5616_v63 = vsub.f32 %v3368_v58, %v903_v22  ;;  %v1791_v60 = vadd.f32 1e-06, %v1693_v10  ;;  %1598 = vadd.xlane.f32.xlu1 %v5386_v20  ;;  %v3370_v58 = vld [vmem:[%s3686_s10 + $0x610] sm:$0xff] }
 0x1b4   : > { %v1668_v8 = vsel %vm413_vm0, %v1287_v28, 0.0  ;;  %v1290_v59 = vmul.f32 %v5601_v18, %v5601_v18  ;;  %v5623_v53 = vsub.f32 %v3369_v52, %v902_v13  ;;  %v1790_v7 = vadd.f32 1e-06, %v1692_v35  ;;  %1594 = vadd.xlane.f32.xlu0 %v5395_v0  ;;  %v1327_v38 = vpop.xlane.xlu1 %1326 }
 0x1b5   : > { %v1664_v42 = vsel %vm413_vm0, %v1285_v49, 0.0  ;;  %v1288_v10 = vmul.f32 %v5607_v6, %v5607_v6  ;;  %v5630_v40 = vsub.f32 %v3370_v58, %v903_v22  ;;  %2998 = vrsqrt.f32 %v1791_v60  ;;  %v1323_v28 = vpop.xlane.xlu0 %1322 }
 0x1b6   : > { %v1695_v20 = vmul.f32 0.0052083335, %v1327_v38  ;;  %v5633_v18 = vsub.f32 %v3371_v61, %v902_v13  ;;  %3000 = vrsqrt.f32 %v1790_v7  ;;  %v1694_v52 = vmul.f32 0.0052083335, %v1323_v28 }
 0x1b7   : > { %v1676_v35 = vsel %vm413_vm0, %v1291_v57, 0.0  ;;  %v1295_v0 = vmul.f32 %v5616_v63, %v5616_v63  ;;  %1606 = vadd.xlane.f32.xlu1 %v5402_v23  ;;  %v5640_v6 = vadd.f32 %v1656_v39, %v5573_v55  ;;  %v1672_v22 = vsel %vm413_vm0, %v1289_v16, 0.0 }
 0x1b8   : > { %v1793_v49 = vadd.f32 1e-06, %v1695_v20  ;;  %v1293_v60 = vmul.f32 %v5623_v53, %v5623_v53  ;;  %v1792_v61 = vadd.f32 1e-06, %v1694_v52  ;;  %1602 = vadd.xlane.f32.xlu0 %v5435_v48  ;;  %v1335_v13 = vpop.xlane.xlu1 %1334  ;;  %v5646_v7 = vadd.f32 %v1668_v8, %v1286_v27 }
 0x1b9   : > { %v5648_v57 = vadd.f32 %v1664_v42, %v1284_v2  ;;  %v5652_v38 = vmul.f32 %v5630_v40, %v5630_v40  ;;  %v1697_v23 = vmul.f32 0.0052083335, %v1335_v13  ;;  %v1331_v55 = vpop.xlane.xlu0 %1330  ;;  %v5654_v39 = vadd.f32 %v1676_v35, %v1290_v59 }
 0x1ba   : > { %3002 = vrsqrt.f32 %v1793_v49  ;;  %v2991_v16 = vpop.eup %2990  ;;  %v5658_v58 = vmul.f32 %v5633_v18, %v5633_v18  ;;  %v1696_v48 = vmul.f32 0.0052083335, %v1331_v55  ;;  %v5660_v27 = vadd.f32 %v1672_v22, %v1288_v10 }
 0x1bb   : > { %3004 = vrsqrt.f32 %v1792_v61  ;;  %v1986_v2 = vmul.f32 %v2991_v16, %v4115_v9  ;;  %v1987_v8 = vmul.f32 %v2991_v16, %v4081_v54  ;;  %v1795_v20 = vadd.f32 1e-06, %v1697_v23  ;;  %1614 = vadd.xlane.f32.xlu1 %v5437_v5 }
 0x1bc   : > { %v2993_v42 = vpop.eup %2992  ;;  %v5666_v59 = vsel %vm413_vm0, %v1295_v0, 0.0  ;;  %v1794_v35 = vadd.f32 1e-06, %v1696_v48  ;;  %1610 = vadd.xlane.f32.xlu0 %v5448_v37  ;;  %v1343_v10 = vpop.xlane.xlu1 %1342  ;;  %v5672_v49 = vsel %vm413_vm0, %v1293_v60, 0.0 }
 0x1bd   : > { %v1984_v28 = vmul.f32 %v2993_v42, %v4069_v45  ;;  %v1985_v52 = vmul.f32 %v2993_v42, %v4053_v31  ;;  %v2193_v9 = vmul.f32 %v4758_v34, %v1986_v2  ;;  %v2194_v54 = vmul.f32 %v4770_v1, %v1987_v8  ;;  %v1339_v22 = vpop.xlane.xlu0 %1338 }
 0x1be   : > { %3006 = vrsqrt.f32 %v1795_v20  ;;  %v1699_v5 = vmul.f32 0.0052083335, %v1343_v10  ;;  %v1698_v45 = vmul.f32 0.0052083335, %v1339_v22 }
 0x1bf   : > { %v2995_v0 = vpop.eup %2994  ;;  %v2191_v61 = vmul.f32 %v4758_v34, %v1984_v28  ;;  %v2192_v31 = vmul.f32 %v4770_v1, %v1985_v52  ;;  %3008 = vrsqrt.f32 %v1794_v35  ;;  %v2400_v13 = vadd.f32 %v4791_v12, %v2193_v9  ;;  %1622 = vadd.xlane.f32.xlu1 %v5457_v50 }
 0x1c0   : > { %v2997_v37 = vpop.eup %2996  ;;  %v2401_v60 = vadd.f32 %v4827_v25, %v2194_v54  ;;  %v1990_v23 = vmul.f32 %v2995_v0, %v4091_v56  ;;  %v1991_v55 = vmul.f32 %v2995_v0, %v4058_v33  ;;  %1618 = vadd.xlane.f32.xlu0 %v5459_v47  ;;  %v1351_v8 = vpop.xlane.xlu1 %1350  ;;  %v1796_v50 = vadd.f32 1e-06, %v1698_v45  ;;  %v7170_v45 = vld [vmem:[#allocation12_spill] sm:$0xff] }
 0x1c1   : > { %v2398_v16 = vadd.f32 %v4791_v12, %v2191_v61  ;;  %v2399_v48 = vadd.f32 %v4827_v25, %v2192_v31  ;;  %v1988_v42 = vmul.f32 %v2997_v37, %v4066_v44  ;;  %v1989_v2 = vmul.f32 %v2997_v37, %v4044_v29  ;;  %2596 = vst [vmem:[%s5690_s23 + $0x10] sm:$0xff] %v2400_v13  ;;  %v1347_v29 = vpop.xlane.xlu0 %1346 }
 0x1c2   : > { %2597 = vst.msk [vmem:[%s5690_s23 + $0x18] sm:$0xff] %vm413_vm0, %v2401_v60  ;;  %v2197_v33 = vmul.f32 %v4758_v34, %v1990_v23  ;;  %v2198_v56 = vmul.f32 %v4770_v1, %v1991_v55  ;;  %v1797_v44 = vadd.f32 1e-06, %v1699_v5  ;;  %v2999_v20 = vpop.eup %2998  ;;  %v1701_v52 = vmul.f32 0.0052083335, %v1351_v8 }
 0x1c3   : > { %2594 = vst [vmem:[%s5690_s23] sm:$0xff] %v2398_v16  ;;  %2595 = vst.msk [vmem:[%s5690_s23 + $0x8] sm:$0xff] %vm413_vm0, %v2399_v48  ;;  %v2195_v47 = vmul.f32 %v4758_v34, %v1988_v42  ;;  %v2196_v28 = vmul.f32 %v4770_v1, %v1989_v2  ;;  %v1700_v35 = vmul.f32 0.0052083335, %v1347_v29  ;;  %v3001_v10 = vpop.eup %3000  ;;  %v1994_v5 = vmul.f32 %v2999_v20, %v4128_v17  ;;  %v7171_v2 = vld [vmem:[#allocation15_spill] sm:$0xff] }
 0x1c4   : > { %v2404_v9 = vadd.f32 %v4791_v12, %v2197_v33  ;;  %v2405_v54 = vadd.f32 %v4827_v25, %v2198_v56  ;;  %v1995_v22 = vmul.f32 %v2999_v20, %v4100_v43  ;;  %1630 = vadd.xlane.f32.xlu1 %v5497_v51  ;;  %v1992_v31 = vmul.f32 %v3001_v10, %v4139_v36  ;;  %v1359_v13 = vpop.xlane.xlu1 %1358  ;;  %v7172_v33 = vld [vmem:[#allocation13_spill] sm:$0xff]  ;;  %v7173_v20 = vld [vmem:[#allocation18_spill] sm:$0xff] }
 0x1c5   : > { %v2402_v0 = vadd.f32 %v4791_v12, %v2195_v47  ;;  %v2403_v61 = vadd.f32 %v4827_v25, %v2196_v28  ;;  %v1993_v37 = vmul.f32 %v3001_v10, %v7170_v45  ;;  %1626 = vadd.xlane.f32.xlu0 %v5514_v24  ;;  %v2201_v43 = vmul.f32 %v4758_v34, %v1994_v5  ;;  %v1355_v60 = vpop.xlane.xlu0 %1354  ;;  %v7174_v47 = vld [vmem:[#allocation14_spill] sm:$0xff]  ;;  %v7175_v45 = vld [vmem:[#allocation19_spill] sm:$0xff] }
 0x1c6   : > { %2600 = vst [vmem:[%s5690_s23 + $0x30] sm:$0xff] %v2404_v9  ;;  %2601 = vst.msk [vmem:[%s5690_s23 + $0x38] sm:$0xff] %vm413_vm0, %v2405_v54  ;;  %v2202_v17 = vmul.f32 %v4770_v1, %v1995_v22  ;;  %3010 = vrsqrt.f32 %v1797_v44  ;;  %v1799_v51 = vadd.f32 1e-06, %v1701_v52  ;;  %v2199_v36 = vmul.f32 %v4758_v34, %v1992_v31 }
 0x1c7   : > { %v3003_v23 = vpop.eup %3002  ;;  %2598 = vst [vmem:[%s5690_s23 + $0x20] sm:$0xff] %v2402_v0  ;;  %2599 = vst.msk [vmem:[%s5690_s23 + $0x28] sm:$0xff] %vm413_vm0, %v2403_v61  ;;  %v2200_v24 = vmul.f32 %v4770_v1, %v1993_v37  ;;  %3012 = vrsqrt.f32 %v1796_v50  ;;  %v1798_v55 = vadd.f32 1e-06, %v1700_v35  ;;  %v2408_v48 = vadd.f32 %v4791_v12, %v2201_v43 }
 0x1c8   : > { %v3005_v16 = vpop.eup %3004  ;;  %v2409_v42 = vadd.f32 %v4827_v25, %v2202_v17  ;;  %v1998_v8 = vmul.f32 %v3003_v23, %v7171_v2  ;;  %v1999_v56 = vmul.f32 %v3003_v23, %v7172_v33  ;;  %1638 = vadd.xlane.f32.xlu1 %v5544_v26  ;;  %v2406_v44 = vadd.f32 %v4791_v12, %v2199_v36  ;;  %v1367_v52 = vpop.xlane.xlu1 %1366  ;;  %v7177_v23 = vld [vmem:[#allocation20_spill] sm:$0xff] }
 0x1c9   : > { %v2407_v29 = vadd.f32 %v4827_v25, %v2200_v24  ;;  %v1996_v50 = vmul.f32 %v3005_v16, %v7173_v20  ;;  %v1997_v28 = vmul.f32 %v3005_v16, %v7174_v47  ;;  %1634 = vadd.xlane.f32.xlu0 %v5546_v14  ;;  %2604 = vst [vmem:[%s5690_s23 + $0x50] sm:$0xff] %v2408_v48  ;;  %3014 = vrsqrt.f32 %v1799_v51  ;;  %v1363_v9 = vpop.xlane.xlu0 %1362 }
 0x1ca   : > { %2605 = vst.msk [vmem:[%s5690_s23 + $0x58] sm:$0xff] %vm413_vm0, %v2409_v42  ;;  %v2205_v35 = vmul.f32 %v4758_v34, %v1998_v8  ;;  %v2206_v10 = vmul.f32 %v4770_v1, %v1999_v56  ;;  %v1703_v26 = vmul.f32 0.0052083335, %v1359_v13  ;;  %2602 = vst [vmem:[%s5690_s23 + $0x40] sm:$0xff] %v2406_v44  ;;  %3016 = vrsqrt.f32 %v1798_v55  ;;  %v7176_v13 = vld [vmem:[#allocation16_spill] sm:$0xff] }
 0x1cb   : > { %v3007_v54 = vpop.eup %3006  ;;  %2603 = vst.msk [vmem:[%s5690_s23 + $0x48] sm:$0xff] %vm413_vm0, %v2407_v29  ;;  %v2203_v5 = vmul.f32 %v4758_v34, %v1996_v50  ;;  %v2204_v14 = vmul.f32 %v4770_v1, %v1997_v28  ;;  %v1702_v22 = vmul.f32 0.0052083335, %v1355_v60  ;;  %v7178_v60 = vld [vmem:[#allocation17_spill] sm:$0xff]  ;;  %v1705_v33 = vmul.f32 0.0052083335, %v1367_v52 }
 0x1cc   : > { %v3009_v0 = vpop.eup %3008  ;;  %v2412_v61 = vadd.f32 %v4791_v12, %v2205_v35  ;;  %v2413_v31 = vadd.f32 %v4827_v25, %v2206_v10  ;;  %v2002_v37 = vmul.f32 %v3007_v54, %v7175_v45  ;;  %v2003_v43 = vmul.f32 %v3007_v54, %v7176_v13  ;;  %1646 = vadd.xlane.f32.xlu1 %v5553_v62  ;;  %v1375_v55 = vpop.xlane.xlu1 %1374  ;;  %v7182_v13 = vld [vmem:[#allocation22_spill] sm:$0xff] }
 0x1cd   : > { %v2410_v17 = vadd.f32 %v4791_v12, %v2203_v5  ;;  %v2411_v51 = vadd.f32 %v4827_v25, %v2204_v14  ;;  %v2000_v36 = vmul.f32 %v3009_v0, %v7177_v23  ;;  %v2001_v24 = vmul.f32 %v3009_v0, %v7178_v60  ;;  %1642 = vadd.xlane.f32.xlu0 %v5558_v19  ;;  %v1371_v2 = vpop.xlane.xlu0 %1370  ;;  %v7179_v0 = vld [vmem:[#allocation23_spill] sm:$0xff] }
 0x1ce   : > { %2608 = vst [vmem:[%s5690_s23 + $0x70] sm:$0xff] %v2412_v61  ;;  %2609 = vst.msk [vmem:[%s5690_s23 + $0x78] sm:$0xff] %vm413_vm0, %v2413_v31  ;;  %v2209_v16 = vmul.f32 %v4758_v34, %v2002_v37  ;;  %v2210_v48 = vmul.f32 %v4770_v1, %v2003_v43  ;;  %v1801_v42 = vadd.f32 1e-06, %v1703_v26  ;;  %v1800_v62 = vadd.f32 1e-06, %v1702_v22 }
 0x1cf   : > { %2606 = vst [vmem:[%s5690_s23 + $0x60] sm:$0xff] %v2410_v17  ;;  %2607 = vst.msk [vmem:[%s5690_s23 + $0x68] sm:$0xff] %vm413_vm0, %v2411_v51  ;;  %v2207_v8 = vmul.f32 %v4758_v34, %v2000_v36  ;;  %v2208_v19 = vmul.f32 %v4770_v1, %v2001_v24  ;;  %v1704_v56 = vmul.f32 0.0052083335, %v1363_v9  ;;  %v1707_v20 = vmul.f32 0.0052083335, %v1375_v55 }
 0x1d0   : > { %v2416_v44 = vadd.f32 %v4791_v12, %v2209_v16  ;;  %v2417_v29 = vadd.f32 %v4827_v25, %v2210_v48  ;;  %3018 = vrsqrt.f32 %v1801_v42  ;;  %1654 = vadd.xlane.f32.xlu1 %v5560_v11  ;;  %v1803_v28 = vadd.f32 1e-06, %v1705_v33  ;;  %v1383_v52 = vpop.xlane.xlu1 %1382  ;;  %v7180_v31 = vld [vmem:[#allocation21_spill] sm:$0xff]  ;;  %v7183_v42 = vld [vmem:[#allocation27_spill] sm:$0xff] }
 0x1d1   : > { %v2414_v50 = vadd.f32 %v4791_v12, %v2207_v8  ;;  %v2415_v47 = vadd.f32 %v4827_v25, %v2208_v19  ;;  %3020 = vrsqrt.f32 %v1800_v62  ;;  %1650 = vadd.xlane.f32.xlu0 %v5569_v4  ;;  %v1802_v35 = vadd.f32 1e-06, %v1704_v56  ;;  %v1379_v9 = vpop.xlane.xlu0 %1378  ;;  %v7185_v56 = vld [vmem:[#allocation28_spill] sm:$0xff] }
 0x1d2   : > { %2612 = vst [vmem:[%s5690_s23 + $0x90] sm:$0xff] %v2416_v44  ;;  %2613 = vst.msk [vmem:[%s5690_s23 + $0x98] sm:$0xff] %vm413_vm0, %v2417_v29  ;;  %v1805_v10 = vadd.f32 1e-06, %v1707_v20  ;;  %v1706_v26 = vmul.f32 0.0052083335, %v1371_v2  ;;  %v5773_v11 = vadd.f32 %v5666_v59, %v5652_v38  ;;  %3022 = vrsqrt.f32 %v1803_v28 }
 0x1d3   : > { %v3011_v54 = vpop.eup %3010  ;;  %2610 = vst [vmem:[%s5690_s23 + $0x80] sm:$0xff] %v2414_v50  ;;  %2611 = vst.msk [vmem:[%s5690_s23 + $0x88] sm:$0xff] %vm413_vm0, %v2415_v47  ;;  %v1709_v5 = vmul.f32 0.0052083335, %v1383_v52  ;;  %v1708_v14 = vmul.f32 0.0052083335, %v1379_v9  ;;  %v5780_v4 = vadd.f32 %v5672_v49, %v5658_v58  ;;  %3024 = vrsqrt.f32 %v1802_v35 }
 0x1d4   : > { %v3013_v22 = vpop.eup %3012  ;;  %v2006_v61 = vmul.f32 %v3011_v54, %v7179_v0  ;;  %v2007_v45 = vmul.f32 %v3011_v54, %v7180_v31  ;;  %v1804_v37 = vadd.f32 1e-06, %v1706_v26  ;;  %1662 = vadd.xlane.f32.xlu1 %v5585_v21  ;;  %v7181_v38 = vld [vmem:[#allocation26_spill] sm:$0xff]  ;;  %3026 = vrsqrt.f32 %v1805_v10  ;;  %v1391_v51 = vpop.xlane.xlu1 %1390  ;;  %v7184_v2 = vld [vmem:[#allocation24_spill] sm:$0xff]  ;;  %v7186_v29 = vld [vmem:[#allocation25_spill] sm:$0xff] }
 0x1d5   : > { %v2004_v59 = vmul.f32 %v3013_v22, %v7181_v38  ;;  %v2005_v43 = vmul.f32 %v3013_v22, %v7182_v13  ;;  %v1807_v17 = vadd.f32 1e-06, %v1709_v5  ;;  %1658 = vadd.xlane.f32.xlu0 %v5640_v6  ;;  %v1806_v23 = vadd.f32 1e-06, %v1708_v14  ;;  %v1387_v36 = vpop.xlane.xlu0 %1386  ;;  %v7187_v38 = vld [vmem:[#allocation31_spill] sm:$0xff]  ;;  %v7188_v13 = vld [vmem:[#allocation29_spill] sm:$0xff] }
 0x1d6   : > { %v2213_v58 = vmul.f32 %v4758_v34, %v2006_v61  ;;  %v2214_v49 = vmul.f32 %v4770_v1, %v2007_v45  ;;  %3028 = vrsqrt.f32 %v1804_v37  ;;  %v3015_v60 = vpop.eup %3014  ;;  %v1711_v55 = vmul.f32 0.0052083335, %v1391_v51 }
 0x1d7   : > { %v2211_v24 = vmul.f32 %v4758_v34, %v2004_v59  ;;  %v2212_v21 = vmul.f32 %v4770_v1, %v2005_v43  ;;  %3030 = vrsqrt.f32 %v1807_v17  ;;  %v3017_v16 = vpop.eup %3016  ;;  %v2010_v62 = vmul.f32 %v3015_v60, %v7183_v42  ;;  %v7191_v42 = vld [vmem:[#allocation34_spill] sm:$0xff] }
 0x1d8   : > { %v2420_v6 = vadd.f32 %v4791_v12, %v2213_v58  ;;  %v2421_v48 = vadd.f32 %v4827_v25, %v2214_v49  ;;  %v2011_v8 = vmul.f32 %v3015_v60, %v7184_v2  ;;  %1670 = vadd.xlane.f32.xlu1 %v5646_v7  ;;  %v2008_v44 = vmul.f32 %v3017_v16, %v7185_v56  ;;  %v1399_v50 = vpop.xlane.xlu1 %1398  ;;  %v7189_v58 = vld [vmem:[#allocation33_spill] sm:$0xff]  ;;  %v7192_v2 = vld [vmem:[#allocation32_spill] sm:$0xff] }
 0x1d9   : > { %v2418_v19 = vadd.f32 %v4791_v12, %v2211_v24  ;;  %v2419_v33 = vadd.f32 %v4827_v25, %v2212_v21  ;;  %v2009_v20 = vmul.f32 %v3017_v16, %v7186_v29  ;;  %1666 = vadd.xlane.f32.xlu0 %v5648_v57  ;;  %v2217_v47 = vmul.f32 %v4758_v34, %v2010_v62  ;;  %v1395_v52 = vpop.xlane.xlu0 %1394 }
 0x1da   : > { %2616 = vst [vmem:[%s5690_s23 + $0xb0] sm:$0xff] %v2420_v6  ;;  %2617 = vst.msk [vmem:[%s5690_s23 + $0xb8] sm:$0xff] %vm413_vm0, %v2421_v48  ;;  %v2218_v28 = vmul.f32 %v4770_v1, %v2011_v8  ;;  %3032 = vrsqrt.f32 %v1806_v23  ;;  %v1809_v7 = vadd.f32 1e-06, %v1711_v55  ;;  %v2215_v35 = vmul.f32 %v4758_v34, %v2008_v44  ;;  %v7190_v23 = vld [vmem:[#allocation30_spill] sm:$0xff] }
 0x1db   : > { %2614 = vst [vmem:[%s5690_s23 + $0xa0] sm:$0xff] %v2418_v19  ;;  %2615 = vst.msk [vmem:[%s5690_s23 + $0xa8] sm:$0xff] %vm413_vm0, %v2419_v33  ;;  %v2216_v10 = vmul.f32 %v4770_v1, %v2009_v20  ;;  %v1710_v57 = vmul.f32 0.0052083335, %v1387_v36  ;;  %v1713_v26 = vmul.f32 0.0052083335, %v1399_v50  ;;  %v2424_v9 = vadd.f32 %v4791_v12, %v2217_v47 }
 0x1dc   : > { %v2425_v54 = vadd.f32 %v4827_v25, %v2218_v28  ;;  %3034 = vrsqrt.f32 %v1809_v7  ;;  %v1712_v5 = vmul.f32 0.0052083335, %v1395_v52  ;;  %1678 = vadd.xlane.f32.xlu1 %v5654_v39  ;;  %v2422_v22 = vadd.f32 %v4791_v12, %v2215_v35  ;;  %v1407_v45 = vpop.xlane.xlu1 %1406  ;;  %v7193_v44 = vld [vmem:[#allocation38_spill] sm:$0xff]  ;;  %v7194_v20 = vld [vmem:[#allocation35_spill] sm:$0xff] }
 0x1dd   : > { %v3019_v14 = vpop.eup %3018  ;;  %v2423_v0 = vadd.f32 %v4827_v25, %v2216_v10  ;;  %v1808_v61 = vadd.f32 1e-06, %v1710_v57  ;;  %v1811_v31 = vadd.f32 1e-06, %v1713_v26  ;;  %1674 = vadd.xlane.f32.xlu0 %v5660_v27  ;;  %2620 = vst [vmem:[%s5690_s23 + $0xd0] sm:$0xff] %v2424_v9  ;;  %v1403_v51 = vpop.xlane.xlu0 %1402  ;;  %v7195_v9 = vld [vmem:[#allocation41_spill] sm:$0xff] }
 0x1de   : > { %v3021_v37 = vpop.eup %3020  ;;  %2621 = vst.msk [vmem:[%s5690_s23 + $0xd8] sm:$0xff] %vm413_vm0, %v2425_v54  ;;  %v2014_v59 = vmul.f32 %v3019_v14, %v7187_v38  ;;  %v2015_v39 = vmul.f32 %v3019_v14, %v7188_v13  ;;  %v5823_v43 = vadd.f32 1e-06, %v1712_v5  ;;  %v1715_v17 = vmul.f32 0.0052083335, %v1407_v45  ;;  %2618 = vst [vmem:[%s5690_s23 + $0xc0] sm:$0xff] %v2422_v22 }
 0x1df   : > { %2619 = vst.msk [vmem:[%s5690_s23 + $0xc8] sm:$0xff] %vm413_vm0, %v2423_v0  ;;  %v2012_v49 = vmul.f32 %v3021_v37, %v7189_v58  ;;  %v2013_v27 = vmul.f32 %v3021_v37, %v7190_v23  ;;  %3036 = vrsqrt.f32 %v1808_v61  ;;  %v5830_v36 = vmul.f32 0.0052083335, %v1403_v51  ;;  %v3023_v60 = vpop.eup %3022  ;;  %v7196_v5 = vld [vmem:[#allocation36_spill] sm:$0xff]  ;;  %v7197_v61 = vld [vmem:[#allocation42_spill] sm:$0xff]  ;;  %v7198_v45 = vld [vmem:[#allocation37_spill] sm:$0xff] }
 0x1e0   : > { %v2221_v24 = vmul.f32 %v4758_v34, %v2014_v59  ;;  %v2222_v21 = vmul.f32 %v4770_v1, %v2015_v39  ;;  %3038 = vrsqrt.f32 %v1811_v31  ;;  %v5834_v55 = vadd.f32 1e-06, %v1715_v17  ;;  %1686 = vadd.xlane.f32.xlu1 %v5773_v11  ;;  %v3025_v16 = vpop.eup %3024  ;;  %v5842_v19 = vpop.xlane.xlu1 %1414 }
 0x1e1   : > { %v2219_v6 = vmul.f32 %v4758_v34, %v2012_v49  ;;  %v2220_v48 = vmul.f32 %v4770_v1, %v2013_v27  ;;  %v2018_v62 = vmul.f32 %v3023_v60, %v7191_v42  ;;  %v2019_v8 = vmul.f32 %v3023_v60, %v7192_v2  ;;  %1682 = vadd.xlane.f32.xlu0 %v5780_v4  ;;  %v3027_v33 = vpop.eup %3026  ;;  %v5848_v47 = vpop.xlane.xlu0 %1410  ;;  %v7199_v27 = vld [vmem:[#allocation43_spill] sm:$0xff] }
 0x1e2   : > { %v2428_v56 = vadd.f32 %v4791_v12, %v2221_v24  ;;  %v2429_v11 = vadd.f32 %v4827_v25, %v2222_v21  ;;  %v2016_v29 = vmul.f32 %v3025_v16, %v7193_v44  ;;  %v2017_v50 = vmul.f32 %v3025_v16, %v7194_v20  ;;  %v7200_v24 = vld [vmem:[#allocation39_spill] sm:$0xff] }
 0x1e3   : > { %v3029_v28 = vpop.eup %3028  ;;  %v2426_v7 = vadd.f32 %v4791_v12, %v2219_v6  ;;  %v2427_v4 = vadd.f32 %v4827_v25, %v2220_v48  ;;  %v2225_v52 = vmul.f32 %v4758_v34, %v2018_v62  ;;  %v2226_v35 = vmul.f32 %v4770_v1, %v2019_v8  ;;  %v7201_v48 = vld [vmem:[#allocation44_spill] sm:$0xff] }
 0x1e4   : > { %v3031_v10 = vpop.eup %3030  ;;  %2624 = vst [vmem:[%s5690_s23 + $0xf0] sm:$0xff] %v2428_v56  ;;  %2625 = vst.msk [vmem:[%s5690_s23 + $0xf8] sm:$0xff] %vm413_vm0, %v2429_v11  ;;  %v2223_v57 = vmul.f32 %v4758_v34, %v2016_v29  ;;  %v2224_v26 = vmul.f32 %v4770_v1, %v2017_v50  ;;  %v2022_v54 = vmul.f32 %v3027_v33, %v7195_v9  ;;  %v5868_v38 = vpop.xlane.xlu1 %1422  ;;  %v7202_v62 = vld [vmem:[#allocation40_spill] sm:$0xff]  ;;  %3040 = vrsqrt.f32 %v5823_v43 }
 0x1e5   : > { %v2023_v14 = vmul.f32 %v3027_v33, %v7196_v5  ;;  %2622 = vst [vmem:[%s5690_s23 + $0xe0] sm:$0xff] %v2426_v7  ;;  %2623 = vst.msk [vmem:[%s5690_s23 + $0xe8] sm:$0xff] %vm413_vm0, %v2427_v4  ;;  %v2432_v22 = vadd.f32 %v4791_v12, %v2225_v52  ;;  %v2433_v0 = vadd.f32 %v4827_v25, %v2226_v35  ;;  %v5874_v51 = vpop.xlane.xlu0 %1418  ;;  %v7204_v4 = vld [vmem:[#allocation45_spill] sm:$0xff]  ;;  %3042 = vrsqrt.f32 %v5834_v55 }
 0x1e6   : > { %v2020_v31 = vmul.f32 %v3029_v28, %v7197_v61  ;;  %v2021_v37 = vmul.f32 %v3029_v28, %v7198_v45  ;;  %v2430_v59 = vadd.f32 %v4791_v12, %v2223_v57  ;;  %v2431_v13 = vadd.f32 %v4827_v25, %v2224_v26  ;;  %v7203_v28 = vld [vmem:[#allocation47_spill] sm:$0xff]  ;;  %v7205_v61 = vld [vmem:[#allocation48_spill] sm:$0xff]  ;;  %v7206_v45 = vld [vmem:[#allocation46_spill] sm:$0xff] }
 0x1e7   : > { %v2229_v39 = vmul.f32 %v4758_v34, %v2022_v54  ;;  %v2230_v17 = vmul.f32 %v4770_v1, %v2023_v14  ;;  %v3033_v58 = vpop.eup %3032  ;;  %2628 = vst [vmem:[%s5690_s23 + $0x110] sm:$0xff] %v2432_v22  ;;  %2629 = vst.msk [vmem:[%s5690_s23 + $0x118] sm:$0xff] %vm413_vm0, %v2433_v0  ;;  %v2026_v60 = vmul.f32 %v3031_v10, %v7199_v27  ;;  %v1812_v26 = vadd.f32 1e-06, %v5830_v36 }
 0x1e8   : > { %v2227_v49 = vmul.f32 %v4758_v34, %v2020_v31  ;;  %v2228_v23 = vmul.f32 %v4770_v1, %v2021_v37  ;;  %v2027_v21 = vmul.f32 %v3031_v10, %v7200_v24  ;;  %2626 = vst [vmem:[%s5690_s23 + $0x100] sm:$0xff] %v2430_v59  ;;  %2627 = vst.msk [vmem:[%s5690_s23 + $0x108] sm:$0xff] %vm413_vm0, %v2431_v13  ;;  %v1431_v29 = vpop.xlane.xlu1 %1430  ;;  %v1717_v36 = vmul.f32 0.0052083335, %v5842_v19 }
 0x1e9   : > { %v2436_v16 = vadd.f32 %v4791_v12, %v2229_v39  ;;  %v2437_v6 = vadd.f32 %v4827_v25, %v2230_v17  ;;  %v2024_v42 = vmul.f32 %v3033_v58, %v7201_v48  ;;  %v2025_v2 = vmul.f32 %v3033_v58, %v7202_v62  ;;  %v3035_v8 = vpop.eup %3034  ;;  %v1427_v35 = vpop.xlane.xlu0 %1426  ;;  %v7207_v39 = vld [vmem:[#allocation51_spill] sm:$0xff]  ;;  %v7208_v58 = vld [vmem:[#allocation49_spill] sm:$0xff] }
 0x1ea   : > { %v2434_v33 = vadd.f32 %v4791_v12, %v2227_v49  ;;  %v2435_v56 = vadd.f32 %v4827_v25, %v2228_v23  ;;  %v2233_v11 = vmul.f32 %v4758_v34, %v2026_v60  ;;  %v2234_v44 = vmul.f32 %v4770_v1, %v2027_v21 }
 0x1eb   : > { %2632 = vst [vmem:[%s5690_s23 + $0x130] sm:$0xff] %v2436_v16  ;;  %2633 = vst.msk [vmem:[%s5690_s23 + $0x138] sm:$0xff] %vm413_vm0, %v2437_v6  ;;  %v2231_v20 = vmul.f32 %v4758_v34, %v2024_v42  ;;  %v2232_v50 = vmul.f32 %v4770_v1, %v2025_v2  ;;  %v2030_v7 = vmul.f32 %v3035_v8, %v7203_v28  ;;  %3044 = vrsqrt.f32 %v1812_v26 }
 0x1ec   : > { %v2031_v52 = vmul.f32 %v3035_v8, %v7204_v4  ;;  %2630 = vst [vmem:[%s5690_s23 + $0x120] sm:$0xff] %v2434_v33  ;;  %2631 = vst.msk [vmem:[%s5690_s23 + $0x128] sm:$0xff] %vm413_vm0, %v2435_v56  ;;  %v2440_v10 = vadd.f32 %v4791_v12, %v2233_v11  ;;  %v2441_v57 = vadd.f32 %v4827_v25, %v2234_v44  ;;  %v3037_v9 = vpop.eup %3036  ;;  %v1439_v37 = vpop.xlane.xlu1 %1438  ;;  %v1815_v55 = vadd.f32 1e-06, %v1717_v36 }
 0x1ed   : > { %v2438_v54 = vadd.f32 %v4791_v12, %v2231_v20  ;;  %v2439_v5 = vadd.f32 %v4827_v25, %v2232_v50  ;;  %v2237_v14 = vmul.f32 %v4758_v34, %v2030_v7  ;;  %v3039_v0 = vpop.eup %3038  ;;  %v2028_v31 = vmul.f32 %v3037_v9, %v7205_v61  ;;  %v1435_v23 = vpop.xlane.xlu0 %1434 }
 0x1ee   : > { %v2238_v22 = vmul.f32 %v4770_v1, %v2031_v52  ;;  %2636 = vst [vmem:[%s5690_s23 + $0x150] sm:$0xff] %v2440_v10  ;;  %2637 = vst.msk [vmem:[%s5690_s23 + $0x158] sm:$0xff] %vm413_vm0, %v2441_v57  ;;  %v2029_v43 = vmul.f32 %v3037_v9, %v7206_v45  ;;  %v2034_v17 = vmul.f32 %v3039_v0, %v7207_v39  ;;  %v1716_v21 = vmul.f32 0.0052083335, %v5848_v47  ;;  %v7211_v39 = vld [vmem:[#allocation56_spill] sm:$0xff] }
 0x1ef   : > { %2634 = vst [vmem:[%s5690_s23 + $0x140] sm:$0xff] %v2438_v54  ;;  %2635 = vst.msk [vmem:[%s5690_s23 + $0x148] sm:$0xff] %vm413_vm0, %v2439_v5  ;;  %v2444_v59 = vadd.f32 %v4791_v12, %v2237_v14  ;;  %v2035_v49 = vmul.f32 %v3039_v0, %v7208_v58  ;;  %v2235_v27 = vmul.f32 %v4758_v34, %v2028_v31  ;;  %v1719_v16 = vmul.f32 0.0052083335, %v5868_v38  ;;  %v7209_v5 = vld [vmem:[#allocation54_spill] sm:$0xff]  ;;  %v7212_v58 = vld [vmem:[#allocation52_spill] sm:$0xff] }
 0x1f0   : > { %v2445_v13 = vadd.f32 %v4827_v25, %v2238_v22  ;;  %v2236_v60 = vmul.f32 %v4770_v1, %v2029_v43  ;;  %v2241_v19 = vmul.f32 %v4758_v34, %v2034_v17  ;;  %3046 = vrsqrt.f32 %v1815_v55  ;;  %v1447_v62 = vpop.xlane.xlu1 %1446  ;;  %v7210_v22 = vld [vmem:[#allocation50_spill] sm:$0xff] }
 0x1f1   : > { %2640 = vst [vmem:[%s5690_s23 + $0x170] sm:$0xff] %v2444_v59  ;;  %v2242_v24 = vmul.f32 %v4770_v1, %v2035_v49  ;;  %v2442_v6 = vadd.f32 %v4791_v12, %v2235_v27  ;;  %v1718_v42 = vmul.f32 0.0052083335, %v5874_v51  ;;  %v1814_v33 = vadd.f32 1e-06, %v1716_v21  ;;  %v1443_v11 = vpop.xlane.xlu0 %1442 }
 0x1f2   : > { %2641 = vst.msk [vmem:[%s5690_s23 + $0x178] sm:$0xff] %vm413_vm0, %v2445_v13  ;;  %v2443_v48 = vadd.f32 %v4827_v25, %v2236_v60  ;;  %v2448_v2 = vadd.f32 %v4791_v12, %v2241_v19  ;;  %v1817_v56 = vadd.f32 1e-06, %v1719_v16  ;;  %v1721_v38 = vmul.f32 0.0052083335, %v1431_v29  ;;  %v3041_v29 = vpop.eup %3040 }
 0x1f3   : > { %v2449_v8 = vadd.f32 %v4827_v25, %v2242_v24  ;;  %2638 = vst [vmem:[%s5690_s23 + $0x160] sm:$0xff] %v2442_v6  ;;  %v1816_v47 = vadd.f32 1e-06, %v1718_v42  ;;  %v1720_v44 = vmul.f32 0.0052083335, %v1427_v35  ;;  %3048 = vrsqrt.f32 %v1814_v33  ;;  %v3043_v31 = vpop.eup %3042  ;;  %v7213_v42 = vld [vmem:[#allocation57_spill] sm:$0xff] }
 0x1f4   : > { %2639 = vst.msk [vmem:[%s5690_s23 + $0x168] sm:$0xff] %vm413_vm0, %v2443_v48  ;;  %2644 = vst [vmem:[%s5690_s23 + $0x190] sm:$0xff] %v2448_v2  ;;  %v1723_v20 = vmul.f32 0.0052083335, %v1439_v37  ;;  %v1722_v51 = vmul.f32 0.0052083335, %v1435_v23  ;;  %3050 = vrsqrt.f32 %v1817_v56  ;;  %v1455_v4 = vpop.xlane.xlu1 %1454  ;;  %v2032_v14 = vmul.f32 %v3041_v29, %v7209_v5 }
 0x1f5   : > { %2645 = vst.msk [vmem:[%s5690_s23 + $0x198] sm:$0xff] %vm413_vm0, %v2449_v8  ;;  %v1725_v50 = vmul.f32 0.0052083335, %v1447_v62  ;;  %v1819_v28 = vadd.f32 1e-06, %v1721_v38  ;;  %3052 = vrsqrt.f32 %v1816_v47  ;;  %v1451_v26 = vpop.xlane.xlu0 %1450  ;;  %v2033_v0 = vmul.f32 %v3041_v29, %v7210_v22  ;;  %v7214_v2 = vld [vmem:[#allocation53_spill] sm:$0xff] }
 0x1f6   : > { %v1818_v7 = vadd.f32 1e-06, %v1720_v44  ;;  %v1821_v52 = vadd.f32 1e-06, %v1723_v20  ;;  %v1820_v10 = vadd.f32 1e-06, %v1722_v51  ;;  %v2239_v59 = vmul.f32 %v4758_v34, %v2032_v14 }
 0x1f7   : > { %v1724_v57 = vmul.f32 0.0052083335, %v1443_v11  ;;  %3054 = vrsqrt.f32 %v1819_v28  ;;  %v1727_v9 = vmul.f32 0.0052083335, %v1455_v4  ;;  %v1823_v35 = vadd.f32 1e-06, %v1725_v50 }
 0x1f8   : > { %3056 = vrsqrt.f32 %v1818_v7  ;;  %v1726_v54 = vmul.f32 0.0052083335, %v1451_v26  ;;  %v1463_v61 = vpop.xlane.xlu1 %1462  ;;  %v2240_v13 = vmul.f32 %v4770_v1, %v2033_v0  ;;  %v2038_v17 = vmul.f32 %v3043_v31, %v7211_v39  ;;  %v3045_v23 = vpop.eup %3044  ;;  %v7215_v38 = vld [vmem:[#allocation58_spill] sm:$0xff]  ;;  %v7216_v20 = vld [vmem:[#allocation55_spill] sm:$0xff] }
 0x1f9   : > { %3058 = vrsqrt.f32 %v1821_v52  ;;  %v1822_v45 = vadd.f32 1e-06, %v1724_v57  ;;  %v1825_v43 = vadd.f32 1e-06, %v1727_v9  ;;  %v1729_v36 = vmul.f32 0.0052083335, %v1463_v61  ;;  %v1459_v37 = vpop.xlane.xlu0 %1458 }
 0x1fa   : > { %3060 = vrsqrt.f32 %v1820_v10  ;;  %v2039_v49 = vmul.f32 %v3043_v31, %v7212_v58  ;;  %v1824_v27 = vadd.f32 1e-06, %v1726_v54  ;;  %v1728_v55 = vmul.f32 0.0052083335, %v1459_v37  ;;  %v7217_v54 = vld [vmem:[#allocation61_spill] sm:$0xff]  ;;  %v7218_v14 = vld [vmem:[#allocation59_spill] sm:$0xff] }
 0x1fb   : > { %3062 = vrsqrt.f32 %v1823_v35  ;;  %v5952_v60 = vadd.f32 1e-06, %v1729_v36  ;;  %v2446_v19 = vadd.f32 %v4791_v12, %v2239_v59  ;;  %v2447_v24 = vadd.f32 %v4827_v25, %v2240_v13  ;;  %v7220_v37 = vld [vmem:[#allocation60_spill] sm:$0xff]  ;;  %v7221_v58 = vld [vmem:[#allocation65_spill] sm:$0xff] }
 0x1fc   : > { %v2245_v21 = vmul.f32 %v4758_v34, %v2038_v17  ;;  %v2246_v16 = vmul.f32 %v4770_v1, %v2039_v49  ;;  %v1471_v6 = vpop.xlane.xlu1 %1470  ;;  %v2036_v62 = vmul.f32 %v3045_v23, %v7213_v42  ;;  %v2037_v8 = vmul.f32 %v3045_v23, %v7214_v2  ;;  %v7222_v23 = vld [vmem:[#allocation62_spill] sm:$0xff] }
 0x1fd   : > { %v3047_v48 = vpop.eup %3046  ;;  %3064 = vrsqrt.f32 %v1822_v45  ;;  %v5960_v33 = vadd.f32 1e-06, %v1728_v55  ;;  %v1467_v56 = vpop.xlane.xlu0 %1466  ;;  %2642 = vst [vmem:[%s5690_s23 + $0x180] sm:$0xff] %v2446_v19  ;;  %2643 = vst.msk [vmem:[%s5690_s23 + $0x188] sm:$0xff] %vm413_vm0, %v2447_v24  ;;  %v5971_v7 = vmul.f32 0.0052083335, %v1471_v6 }
 0x1fe   : > { %v2452_v11 = vadd.f32 %v4791_v12, %v2245_v21  ;;  %v2453_v47 = vadd.f32 %v4827_v25, %v2246_v16  ;;  %v2042_v44 = vmul.f32 %v3047_v48, %v7215_v38  ;;  %v2043_v51 = vmul.f32 %v3047_v48, %v7216_v20  ;;  %v7223_v21 = vld [vmem:[#allocation66_spill] sm:$0xff]  ;;  %v7224_v6 = vld [vmem:[#allocation63_spill] sm:$0xff] }
 0x1ff   : > { %v2243_v50 = vmul.f32 %v4758_v34, %v2036_v62  ;;  %v2244_v28 = vmul.f32 %v4770_v1, %v2037_v8  ;;  %3066 = vrsqrt.f32 %v1825_v43  ;;  %v5978_v57 = vmul.f32 0.0052083335, %v1467_v56  ;;  %v7219_v43 = vld [vmem:[#allocation64_spill] sm:$0xff] }
 0x200   : > { %v3049_v4 = vpop.eup %3048  ;;  %2648 = vst [vmem:[%s5690_s23 + $0x1b0] sm:$0xff] %v2452_v11  ;;  %2649 = vst.msk [vmem:[%s5690_s23 + $0x1b8] sm:$0xff] %vm413_vm0, %v2453_v47  ;;  %v2249_v52 = vmul.f32 %v4758_v34, %v2042_v44  ;;  %v2250_v10 = vmul.f32 %v4770_v1, %v2043_v51  ;;  %3068 = vrsqrt.f32 %v1824_v27  ;;  %v5980_v26 = vpop.xlane.xlu1 %1478 }
 0x201   : > { %v3051_v9 = vpop.eup %3050  ;;  %v2450_v29 = vadd.f32 %v4791_v12, %v2243_v50  ;;  %v2451_v35 = vadd.f32 %v4827_v25, %v2244_v28  ;;  %v2040_v5 = vmul.f32 %v3049_v4, %v7217_v54  ;;  %v2041_v22 = vmul.f32 %v3049_v4, %v7218_v14  ;;  %v5986_v0 = vpop.xlane.xlu0 %1474  ;;  %v7227_v14 = vld [vmem:[#allocation71_spill] sm:$0xff] }
 0x202   : > { %v3053_v61 = vpop.eup %3052  ;;  %v2456_v31 = vadd.f32 %v4791_v12, %v2249_v52  ;;  %v2457_v45 = vadd.f32 %v4827_v25, %v2250_v10  ;;  %v2046_v36 = vmul.f32 %v3051_v9, %v7219_v43  ;;  %v2047_v59 = vmul.f32 %v3051_v9, %v7220_v37  ;;  %v7225_v52 = vld [vmem:[#allocation69_spill] sm:$0xff]  ;;  %v7226_v9 = vld [vmem:[#allocation67_spill] sm:$0xff]  ;;  %v7229_v37 = vld [vmem:[#allocation72_spill] sm:$0xff] }
 0x203   : > { %2646 = vst [vmem:[%s5690_s23 + $0x1a0] sm:$0xff] %v2450_v29  ;;  %2647 = vst.msk [vmem:[%s5690_s23 + $0x1a8] sm:$0xff] %vm413_vm0, %v2451_v35  ;;  %v2247_v39 = vmul.f32 %v4758_v34, %v2040_v5  ;;  %v2248_v17 = vmul.f32 %v4770_v1, %v2041_v22  ;;  %v2044_v49 = vmul.f32 %v3053_v61, %v7221_v58  ;;  %3070 = vrsqrt.f32 %v5952_v60 }
 0x204   : > { %v3055_v13 = vpop.eup %3054  ;;  %v2045_v27 = vmul.f32 %v3053_v61, %v7222_v23  ;;  %2652 = vst [vmem:[%s5690_s23 + $0x1d0] sm:$0xff] %v2456_v31  ;;  %2653 = vst.msk [vmem:[%s5690_s23 + $0x1d8] sm:$0xff] %vm413_vm0, %v2457_v45  ;;  %v2253_v19 = vmul.f32 %v4758_v34, %v2046_v36  ;;  %v2254_v24 = vmul.f32 %v4770_v1, %v2047_v59  ;;  %v6006_v42 = vpop.xlane.xlu1 %1486  ;;  %v7228_v61 = vld [vmem:[#allocation68_spill] sm:$0xff]  ;;  %3072 = vrsqrt.f32 %v5960_v33 }
 0x205   : > { %v3057_v55 = vpop.eup %3056  ;;  %v2050_v16 = vmul.f32 %v3055_v13, %v7223_v21  ;;  %v2051_v48 = vmul.f32 %v3055_v13, %v7224_v6  ;;  %v2454_v2 = vadd.f32 %v4791_v12, %v2247_v39  ;;  %v2455_v8 = vadd.f32 %v4827_v25, %v2248_v17  ;;  %v6012_v47 = vpop.xlane.xlu0 %1482  ;;  %v7230_v13 = vld [vmem:[#allocation70_spill] sm:$0xff] }
 0x206   : > { %v3059_v62 = vpop.eup %3058  ;;  %v2251_v56 = vmul.f32 %v4758_v34, %v2044_v49  ;;  %v2252_v11 = vmul.f32 %v4770_v1, %v2045_v27  ;;  %v2460_v44 = vadd.f32 %v4791_v12, %v2253_v19  ;;  %v2461_v20 = vadd.f32 %v4827_v25, %v2254_v24  ;;  %v7231_v27 = vld [vmem:[#allocation75_spill] sm:$0xff]  ;;  %v7232_v19 = vld [vmem:[#allocation73_spill] sm:$0xff] }
 0x207   : > { %v3061_v38 = vpop.eup %3060  ;;  %v2257_v51 = vmul.f32 %v4758_v34, %v2050_v16  ;;  %v2258_v50 = vmul.f32 %v4770_v1, %v2051_v48  ;;  %2650 = vst [vmem:[%s5690_s23 + $0x1c0] sm:$0xff] %v2454_v2  ;;  %2651 = vst.msk [vmem:[%s5690_s23 + $0x1c8] sm:$0xff] %vm413_vm0, %v2455_v8  ;;  %v2048_v10 = vmul.f32 %v3057_v55, %v7225_v52  ;;  %v1828_v60 = vadd.f32 1e-06, %v5978_v57 }
 0x208   : > { %v2458_v28 = vadd.f32 %v4791_v12, %v2251_v56  ;;  %v2459_v4 = vadd.f32 %v4827_v25, %v2252_v11  ;;  %v2049_v29 = vmul.f32 %v3057_v55, %v7226_v9  ;;  %v3063_v35 = vpop.eup %3062  ;;  %2656 = vst [vmem:[%s5690_s23 + $0x1f0] sm:$0xff] %v2460_v44  ;;  %2657 = vst.msk [vmem:[%s5690_s23 + $0x1f8] sm:$0xff] %vm413_vm0, %v2461_v20  ;;  %v6032_v45 = vpop.xlane.xlu1 %1494  ;;  %v1735_v33 = vmul.f32 0.0052083335, %v6006_v42 }
 0x209   : > { %v2464_v54 = vadd.f32 %v4791_v12, %v2257_v51  ;;  %v2465_v5 = vadd.f32 %v4827_v25, %v2258_v50  ;;  %v2054_v22 = vmul.f32 %v3059_v62, %v7227_v14  ;;  %v2055_v31 = vmul.f32 %v3059_v62, %v7228_v61  ;;  %v6041_v17 = vpop.xlane.xlu0 %1490  ;;  %v7233_v50 = vld [vmem:[#allocation77_spill] sm:$0xff] }
 0x20a   : > { %2654 = vst [vmem:[%s5690_s23 + $0x1e0] sm:$0xff] %v2458_v28  ;;  %2655 = vst.msk [vmem:[%s5690_s23 + $0x1e8] sm:$0xff] %vm413_vm0, %v2459_v4  ;;  %v2255_v43 = vmul.f32 %v4758_v34, %v2048_v10  ;;  %v2256_v36 = vmul.f32 %v4770_v1, %v2049_v29  ;;  %v2052_v59 = vmul.f32 %v3061_v38, %v7229_v37  ;;  %v3065_v58 = vpop.eup %3064  ;;  %v7234_v4 = vld [vmem:[#allocation74_spill] sm:$0xff]  ;;  %v1734_v57 = vmul.f32 0.0052083335, %v6012_v47 }
 0x20b   : > { %v2053_v39 = vmul.f32 %v3061_v38, %v7230_v13  ;;  %2660 = vst [vmem:[%s5690_s23 + $0x210] sm:$0xff] %v2464_v54  ;;  %2661 = vst.msk [vmem:[%s5690_s23 + $0x218] sm:$0xff] %vm413_vm0, %v2465_v5  ;;  %v2261_v49 = vmul.f32 %v4758_v34, %v2054_v22  ;;  %v2262_v23 = vmul.f32 %v4770_v1, %v2055_v31  ;;  %v7236_v5 = vld [vmem:[#allocation76_spill] sm:$0xff] }
 0x20c   : > { %v2058_v55 = vmul.f32 %v3063_v35, %v7231_v27  ;;  %v2059_v24 = vmul.f32 %v3063_v35, %v7232_v19  ;;  %v2462_v21 = vadd.f32 %v4791_v12, %v2255_v43  ;;  %v2463_v16 = vadd.f32 %v4827_v25, %v2256_v36  ;;  %v3067_v62 = vpop.eup %3066  ;;  %v1503_v38 = vpop.xlane.xlu1 %1502  ;;  %v7235_v35 = vld [vmem:[#allocation79_spill] sm:$0xff]  ;;  %v7237_v31 = vld [vmem:[#allocation80_spill] sm:$0xff]  ;;  %v7238_v36 = vld [vmem:[#allocation78_spill] sm:$0xff] }
 0x20d   : > { %v2259_v6 = vmul.f32 %v4758_v34, %v2052_v59  ;;  %v2260_v48 = vmul.f32 %v4770_v1, %v2053_v39  ;;  %v2468_v2 = vadd.f32 %v4791_v12, %v2261_v49  ;;  %v2469_v8 = vadd.f32 %v4827_v25, %v2262_v23  ;;  %v3069_v44 = vpop.eup %3068  ;;  %v1499_v10 = vpop.xlane.xlu0 %1498 }
 0x20e   : > { %v2265_v56 = vmul.f32 %v4758_v34, %v2058_v55  ;;  %v2266_v11 = vmul.f32 %v4770_v1, %v2059_v24  ;;  %2658 = vst [vmem:[%s5690_s23 + $0x200] sm:$0xff] %v2462_v21  ;;  %2659 = vst.msk [vmem:[%s5690_s23 + $0x208] sm:$0xff] %vm413_vm0, %v2463_v16  ;;  %v2056_v28 = vmul.f32 %v3065_v58, %v7233_v50  ;;  %v1829_v39 = vadd.f32 1e-06, %v5971_v7 }
 0x20f   : > { %v2466_v20 = vadd.f32 %v4791_v12, %v2259_v6  ;;  %v2467_v51 = vadd.f32 %v4827_v25, %v2260_v48  ;;  %v2057_v52 = vmul.f32 %v3065_v58, %v7234_v4  ;;  %2664 = vst [vmem:[%s5690_s23 + $0x230] sm:$0xff] %v2468_v2  ;;  %2665 = vst.msk [vmem:[%s5690_s23 + $0x238] sm:$0xff] %vm413_vm0, %v2469_v8  ;;  %v1733_v6 = vmul.f32 0.0052083335, %v5980_v26 }
 0x210   : > { %v2472_v9 = vadd.f32 %v4791_v12, %v2265_v56  ;;  %v2473_v29 = vadd.f32 %v4827_v25, %v2266_v11  ;;  %v2062_v54 = vmul.f32 %v3067_v62, %v7235_v35  ;;  %v2063_v14 = vmul.f32 %v3067_v62, %v7236_v5  ;;  %v1511_v58 = vpop.xlane.xlu1 %1510 }
 0x211   : > { %2662 = vst [vmem:[%s5690_s23 + $0x220] sm:$0xff] %v2466_v20  ;;  %2663 = vst.msk [vmem:[%s5690_s23 + $0x228] sm:$0xff] %vm413_vm0, %v2467_v51  ;;  %v2263_v22 = vmul.f32 %v4758_v34, %v2056_v28  ;;  %v2264_v61 = vmul.f32 %v4770_v1, %v2057_v52  ;;  %v2060_v43 = vmul.f32 %v3069_v44, %v7237_v31  ;;  %v1507_v19 = vpop.xlane.xlu0 %1506  ;;  %3074 = vrsqrt.f32 %v1829_v39 }
 0x212   : > { %v2061_v37 = vmul.f32 %v3069_v44, %v7238_v36  ;;  %2668 = vst [vmem:[%s5690_s23 + $0x250] sm:$0xff] %v2472_v9  ;;  %2669 = vst.msk [vmem:[%s5690_s23 + $0x258] sm:$0xff] %vm413_vm0, %v2473_v29  ;;  %v2269_v59 = vmul.f32 %v4758_v34, %v2062_v54  ;;  %v2270_v13 = vmul.f32 %v4770_v1, %v2063_v14  ;;  %3076 = vrsqrt.f32 %v1828_v60  ;;  %v7239_v36 = vld [vmem:[#allocation83_spill] sm:$0xff] }
 0x213   : > { %v2470_v49 = vadd.f32 %v4791_v12, %v2263_v22  ;;  %v2471_v23 = vadd.f32 %v4827_v25, %v2264_v61  ;;  %v2267_v27 = vmul.f32 %v4758_v34, %v2060_v43  ;;  %v1732_v48 = vmul.f32 0.0052083335, %v5986_v0 }
 0x214   : > { %v2268_v55 = vmul.f32 %v4770_v1, %v2061_v37  ;;  %v2476_v24 = vadd.f32 %v4791_v12, %v2269_v59  ;;  %v2477_v21 = vadd.f32 %v4827_v25, %v2270_v13  ;;  %v1519_v62 = vpop.xlane.xlu1 %1518  ;;  %v1831_v2 = vadd.f32 1e-06, %v1733_v6  ;;  %v7240_v59 = vld [vmem:[#allocation81_spill] sm:$0xff] }
 0x215   : > { %2666 = vst [vmem:[%s5690_s23 + $0x240] sm:$0xff] %v2470_v49  ;;  %2667 = vst.msk [vmem:[%s5690_s23 + $0x248] sm:$0xff] %vm413_vm0, %v2471_v23  ;;  %v2474_v7 = vadd.f32 %v4791_v12, %v2267_v27  ;;  %v1737_v8 = vmul.f32 0.0052083335, %v6032_v45  ;;  %v1736_v56 = vmul.f32 0.0052083335, %v6041_v17  ;;  %v1515_v26 = vpop.xlane.xlu0 %1514 }
 0x216   : > { %v2475_v16 = vadd.f32 %v4827_v25, %v2268_v55  ;;  %2672 = vst [vmem:[%s5690_s23 + $0x270] sm:$0xff] %v2476_v24  ;;  %2673 = vst.msk [vmem:[%s5690_s23 + $0x278] sm:$0xff] %vm413_vm0, %v2477_v21  ;;  %v1830_v11 = vadd.f32 1e-06, %v1732_v48  ;;  %v1833_v44 = vadd.f32 1e-06, %v1735_v33  ;;  %3078 = vrsqrt.f32 %v1831_v2 }
 0x217   : > { %2670 = vst [vmem:[%s5690_s23 + $0x260] sm:$0xff] %v2474_v7  ;;  %v1832_v20 = vadd.f32 1e-06, %v1734_v57  ;;  %v1835_v51 = vadd.f32 1e-06, %v1737_v8  ;;  %v7241_v21 = vld [vmem:[#allocation85_spill] sm:$0xff] }
 0x218   : > { %2671 = vst.msk [vmem:[%s5690_s23 + $0x268] sm:$0xff] %vm413_vm0, %v2475_v16  ;;  %v1834_v0 = vadd.f32 1e-06, %v1736_v56  ;;  %v1739_v50 = vmul.f32 0.0052083335, %v1503_v38  ;;  %3080 = vrsqrt.f32 %v1830_v11  ;;  %v1527_v4 = vpop.xlane.xlu1 %1526  ;;  %v3071_v38 = vpop.eup %3070  ;;  %v7242_v7 = vld [vmem:[#allocation82_spill] sm:$0xff] }
 0x219   : > { %v1738_v42 = vmul.f32 0.0052083335, %v1499_v10  ;;  %v1741_v47 = vmul.f32 0.0052083335, %v1511_v58  ;;  %v1740_v28 = vmul.f32 0.0052083335, %v1507_v19  ;;  %3082 = vrsqrt.f32 %v1833_v44  ;;  %v1523_v45 = vpop.xlane.xlu0 %1522  ;;  %v3073_v58 = vpop.eup %3072 }
 0x21a   : > { %v1837_v52 = vadd.f32 1e-06, %v1739_v50  ;;  %v1743_v9 = vmul.f32 0.0052083335, %v1519_v62  ;;  %v1742_v29 = vmul.f32 0.0052083335, %v1515_v26  ;;  %3084 = vrsqrt.f32 %v1832_v20 }
 0x21b   : > { %v1836_v17 = vadd.f32 1e-06, %v1738_v42  ;;  %3086 = vrsqrt.f32 %v1835_v51  ;;  %v1839_v35 = vadd.f32 1e-06, %v1741_v47  ;;  %v1745_v54 = vmul.f32 0.0052083335, %v1527_v4 }
 0x21c   : > { %3088 = vrsqrt.f32 %v1834_v0  ;;  %v1838_v5 = vadd.f32 1e-06, %v1740_v28  ;;  %v1744_v14 = vmul.f32 0.0052083335, %v1523_v45  ;;  %v1535_v22 = vpop.xlane.xlu1 %1534  ;;  %v1841_v10 = vadd.f32 1e-06, %v1743_v9 }
 0x21d   : > { %3090 = vrsqrt.f32 %v1837_v52  ;;  %v6111_v61 = vadd.f32 1e-06, %v1742_v29  ;;  %v1747_v31 = vmul.f32 0.0052083335, %v1535_v22  ;;  %v1531_v43 = vpop.xlane.xlu0 %1530  ;;  %v2066_v37 = vmul.f32 %v3071_v38, %v7239_v36  ;;  %v7243_v33 = vld [vmem:[#allocation86_spill] sm:$0xff]  ;;  %v7244_v62 = vld [vmem:[#allocation84_spill] sm:$0xff] }
 0x21e   : > { %v2067_v13 = vmul.f32 %v3071_v38, %v7240_v59  ;;  %3092 = vrsqrt.f32 %v1836_v17  ;;  %v6115_v39 = vadd.f32 1e-06, %v1745_v54  ;;  %v6117_v49 = vadd.f32 1e-06, %v1744_v14  ;;  %v3075_v55 = vpop.eup %3074  ;;  %v7245_v50 = vld [vmem:[#allocation90_spill] sm:$0xff]  ;;  %v7246_v47 = vld [vmem:[#allocation87_spill] sm:$0xff] }
 0x21f   : > { %3094 = vrsqrt.f32 %v1839_v35  ;;  %v6119_v23 = vadd.f32 1e-06, %v1747_v31  ;;  %v1746_v27 = vmul.f32 0.0052083335, %v1531_v43  ;;  %v2273_v19 = vmul.f32 %v4758_v34, %v2066_v37  ;;  %v3077_v48 = vpop.eup %3076  ;;  %v7248_v43 = vld [vmem:[#allocation88_spill] sm:$0xff] }
 0x220   : > { %v2274_v24 = vmul.f32 %v4770_v1, %v2067_v13  ;;  %v2064_v60 = vmul.f32 %v3073_v58, %v7241_v21  ;;  %v2065_v16 = vmul.f32 %v3073_v58, %v7242_v7  ;;  %v1543_v6 = vpop.xlane.xlu1 %1542  ;;  %v2070_v57 = vmul.f32 %v3075_v55, %v7243_v33  ;;  %v7249_v37 = vld [vmem:[#allocation92_spill] sm:$0xff]  ;;  %v7250_v13 = vld [vmem:[#allocation89_spill] sm:$0xff] }
 0x221   : > { %v2071_v2 = vmul.f32 %v3075_v55, %v7244_v62  ;;  %3096 = vrsqrt.f32 %v1838_v5  ;;  %v6127_v8 = vadd.f32 1e-06, %v1746_v27  ;;  %v6129_v56 = vpop.xlane.xlu0 %1538  ;;  %v2480_v26 = vadd.f32 %v4791_v12, %v2273_v19 }
 0x222   : > { %v2481_v11 = vadd.f32 %v4827_v25, %v2274_v24  ;;  %v2271_v44 = vmul.f32 %v4758_v34, %v2064_v60  ;;  %v2272_v20 = vmul.f32 %v4770_v1, %v2065_v16  ;;  %v2277_v51 = vmul.f32 %v4758_v34, %v2070_v57  ;;  %v7251_v24 = vld [vmem:[#allocation96_spill] sm:$0xff]  ;;  %v7252_v60 = vld [vmem:[#allocation93_spill] sm:$0xff] }
 0x223   : > { %v2278_v0 = vmul.f32 %v4770_v1, %v2071_v2  ;;  %v2068_v42 = vmul.f32 %v3077_v48, %v7245_v50  ;;  %v2069_v28 = vmul.f32 %v3077_v48, %v7246_v47  ;;  %v3079_v4 = vpop.eup %3078  ;;  %2676 = vst [vmem:[%s5690_s23 + $0x290] sm:$0xff] %v2480_v26  ;;  %3098 = vrsqrt.f32 %v1841_v10  ;;  %v7247_v10 = vld [vmem:[#allocation91_spill] sm:$0xff] }
 0x224   : > { %2677 = vst.msk [vmem:[%s5690_s23 + $0x298] sm:$0xff] %vm413_vm0, %v2481_v11  ;;  %v2478_v52 = vadd.f32 %v4791_v12, %v2271_v44  ;;  %v2479_v9 = vadd.f32 %v4827_v25, %v2272_v20  ;;  %v6144_v29 = vmul.f32 0.0052083335, %v1543_v6  ;;  %v6146_v45 = vpop.xlane.xlu1 %1550  ;;  %v2484_v35 = vadd.f32 %v4791_v12, %v2277_v51  ;;  %v7253_v44 = vld [vmem:[#allocation98_spill] sm:$0xff] }
 0x225   : > { %v3081_v17 = vpop.eup %3080  ;;  %v2485_v54 = vadd.f32 %v4827_v25, %v2278_v0  ;;  %v2275_v5 = vmul.f32 %v4758_v34, %v2068_v42  ;;  %v2276_v14 = vmul.f32 %v4770_v1, %v2069_v28  ;;  %v6152_v22 = vpop.xlane.xlu0 %1546  ;;  %v2074_v31 = vmul.f32 %v3079_v4, %v7247_v10  ;;  %v7254_v51 = vld [vmem:[#allocation94_spill] sm:$0xff] }
 0x226   : > { %v3083_v38 = vpop.eup %3082  ;;  %2674 = vst [vmem:[%s5690_s23 + $0x280] sm:$0xff] %v2478_v52  ;;  %2675 = vst.msk [vmem:[%s5690_s23 + $0x288] sm:$0xff] %vm413_vm0, %v2479_v9  ;;  %v2075_v36 = vmul.f32 %v3079_v4, %v7248_v43  ;;  %v2072_v59 = vmul.f32 %v3081_v17, %v7249_v37  ;;  %v2073_v58 = vmul.f32 %v3081_v17, %v7250_v13  ;;  %3100 = vrsqrt.f32 %v6111_v61 }
 0x227   : > { %v3085_v27 = vpop.eup %3084  ;;  %2680 = vst [vmem:[%s5690_s23 + $0x2b0] sm:$0xff] %v2484_v35  ;;  %2681 = vst.msk [vmem:[%s5690_s23 + $0x2b8] sm:$0xff] %vm413_vm0, %v2485_v54  ;;  %v2482_v55 = vadd.f32 %v4791_v12, %v2275_v5  ;;  %v2483_v19 = vadd.f32 %v4827_v25, %v2276_v14  ;;  %v2078_v21 = vmul.f32 %v3083_v38, %v7251_v24  ;;  %3102 = vrsqrt.f32 %v6115_v39 }
 0x228   : > { %v2079_v7 = vmul.f32 %v3083_v38, %v7252_v60  ;;  %v3087_v16 = vpop.eup %3086  ;;  %v2281_v6 = vmul.f32 %v4758_v34, %v2074_v31  ;;  %v2282_v48 = vmul.f32 %v4770_v1, %v2075_v36  ;;  %v2279_v33 = vmul.f32 %v4758_v34, %v2072_v59  ;;  %v6172_v62 = vpop.xlane.xlu1 %1558  ;;  %v7255_v38 = vld [vmem:[#allocation100_spill] sm:$0xff]  ;;  %v7256_v31 = vld [vmem:[#allocation95_spill] sm:$0xff]  ;;  %v7257_v36 = vld [vmem:[#allocation101_spill] sm:$0xff] }
 0x229   : > { %v2280_v57 = vmul.f32 %v4770_v1, %v2073_v58  ;;  %v3089_v2 = vpop.eup %3088  ;;  %2678 = vst [vmem:[%s5690_s23 + $0x2a0] sm:$0xff] %v2482_v55  ;;  %2679 = vst.msk [vmem:[%s5690_s23 + $0x2a8] sm:$0xff] %vm413_vm0, %v2483_v19  ;;  %v2285_v26 = vmul.f32 %v4758_v34, %v2078_v21  ;;  %v2076_v20 = vmul.f32 %v3085_v27, %v7253_v44  ;;  %v6181_v50 = vpop.xlane.xlu0 %1554  ;;  %v7258_v59 = vld [vmem:[#allocation97_spill] sm:$0xff]  ;;  %v7259_v19 = vld [vmem:[#allocation102_spill] sm:$0xff]  ;;  %v1748_v61 = vmul.f32 0.0052083335, %v6129_v56 }
 0x22a   : > { %v2286_v11 = vmul.f32 %v4770_v1, %v2079_v7  ;;  %v2077_v0 = vmul.f32 %v3085_v27, %v7254_v51  ;;  %v3091_v42 = vpop.eup %3090  ;;  %v2488_v47 = vadd.f32 %v4791_v12, %v2281_v6  ;;  %v2489_v28 = vadd.f32 %v4827_v25, %v2282_v48  ;;  %v7260_v21 = vld [vmem:[#allocation99_spill] sm:$0xff] }
 0x22b   : > { %v2486_v4 = vadd.f32 %v4791_v12, %v2279_v33  ;;  %v2487_v52 = vadd.f32 %v4827_v25, %v2280_v57  ;;  %v3093_v9 = vpop.eup %3092  ;;  %v2492_v17 = vadd.f32 %v4791_v12, %v2285_v26  ;;  %v2283_v54 = vmul.f32 %v4758_v34, %v2076_v20  ;;  %v7262_v20 = vld [vmem:[#allocation103_spill] sm:$0xff] }
 0x22c   : > { %v2493_v35 = vadd.f32 %v4827_v25, %v2286_v11  ;;  %v2284_v5 = vmul.f32 %v4770_v1, %v2077_v0  ;;  %v3095_v14 = vpop.eup %3094  ;;  %2684 = vst [vmem:[%s5690_s23 + $0x2d0] sm:$0xff] %v2488_v47  ;;  %2685 = vst.msk [vmem:[%s5690_s23 + $0x2d8] sm:$0xff] %vm413_vm0, %v2489_v28  ;;  %v2082_v10 = vmul.f32 %v3087_v16, %v7255_v38  ;;  %v6201_v58 = vpop.xlane.xlu1 %1566  ;;  %v7261_v11 = vld [vmem:[#allocation105_spill] sm:$0xff]  ;;  %v7263_v38 = vld [vmem:[#allocation107_spill] sm:$0xff]  ;;  %3104 = vrsqrt.f32 %v6117_v49 }
 0x22d   : > { %2682 = vst [vmem:[%s5690_s23 + $0x2c0] sm:$0xff] %v2486_v4  ;;  %2683 = vst.msk [vmem:[%s5690_s23 + $0x2c8] sm:$0xff] %vm413_vm0, %v2487_v52  ;;  %v2083_v43 = vmul.f32 %v3087_v16, %v7256_v31  ;;  %v2080_v37 = vmul.f32 %v3089_v2, %v7257_v36  ;;  %v2081_v13 = vmul.f32 %v3089_v2, %v7258_v59  ;;  %v6210_v7 = vpop.xlane.xlu0 %1562  ;;  %v7264_v31 = vld [vmem:[#allocation104_spill] sm:$0xff]  ;;  %v7266_v59 = vld [vmem:[#allocation106_spill] sm:$0xff]  ;;  %3106 = vrsqrt.f32 %v6119_v23 }
 0x22e   : > { %2688 = vst [vmem:[%s5690_s23 + $0x2f0] sm:$0xff] %v2492_v17  ;;  %2689 = vst.msk [vmem:[%s5690_s23 + $0x2f8] sm:$0xff] %vm413_vm0, %v2493_v35  ;;  %v2490_v27 = vadd.f32 %v4791_v12, %v2283_v54  ;;  %v2491_v55 = vadd.f32 %v4827_v25, %v2284_v5  ;;  %v2086_v24 = vmul.f32 %v3091_v42, %v7259_v19  ;;  %v3097_v16 = vpop.eup %3096  ;;  %v7265_v36 = vld [vmem:[#allocation108_spill] sm:$0xff]  ;;  %v7267_v19 = vld [vmem:[#allocation111_spill] sm:$0xff]  ;;  %v1846_v39 = vadd.f32 1e-06, %v1748_v61 }
 0x22f   : > { %v2087_v60 = vmul.f32 %v3091_v42, %v7260_v21  ;;  %v2289_v6 = vmul.f32 %v4758_v34, %v2082_v10  ;;  %v2290_v48 = vmul.f32 %v4770_v1, %v2083_v43  ;;  %v2287_v33 = vmul.f32 %v4758_v34, %v2080_v37  ;;  %v7268_v21 = vld [vmem:[#allocation109_spill] sm:$0xff]  ;;  %v7272_v61 = vld [vmem:[#allocation112_spill] sm:$0xff] }
 0x230   : > { %v2288_v57 = vmul.f32 %v4770_v1, %v2081_v13  ;;  %2686 = vst [vmem:[%s5690_s23 + $0x2e0] sm:$0xff] %v2490_v27  ;;  %2687 = vst.msk [vmem:[%s5690_s23 + $0x2e8] sm:$0xff] %vm413_vm0, %v2491_v55  ;;  %v2293_v2 = vmul.f32 %v4758_v34, %v2086_v24  ;;  %v2084_v44 = vmul.f32 %v3093_v9, %v7261_v11  ;;  %v6227_v4 = vpop.xlane.xlu1 %1574  ;;  %v3099_v52 = vpop.eup %3098  ;;  %v1752_v56 = vmul.f32 0.0052083335, %v6181_v50 }
 0x231   : > { %v2294_v26 = vmul.f32 %v4770_v1, %v2087_v60  ;;  %v2085_v51 = vmul.f32 %v3093_v9, %v7262_v20  ;;  %v2496_v0 = vadd.f32 %v4791_v12, %v2289_v6  ;;  %v2497_v42 = vadd.f32 %v4827_v25, %v2290_v48  ;;  %v1571_v5 = vpop.xlane.xlu0 %1570 }
 0x232   : > { %v2494_v47 = vadd.f32 %v4791_v12, %v2287_v33  ;;  %v2495_v28 = vadd.f32 %v4827_v25, %v2288_v57  ;;  %v2500_v17 = vadd.f32 %v4791_v12, %v2293_v2  ;;  %v2291_v54 = vmul.f32 %v4758_v34, %v2084_v44 }
 0x233   : > { %v2501_v35 = vadd.f32 %v4827_v25, %v2294_v26  ;;  %v2292_v9 = vmul.f32 %v4770_v1, %v2085_v51  ;;  %2692 = vst [vmem:[%s5690_s23 + $0x310] sm:$0xff] %v2496_v0  ;;  %2693 = vst.msk [vmem:[%s5690_s23 + $0x318] sm:$0xff] %vm413_vm0, %v2497_v42  ;;  %v2090_v10 = vmul.f32 %v3095_v14, %v7263_v38  ;;  %v1847_v26 = vadd.f32 1e-06, %v6144_v29 }
 0x234   : > { %2690 = vst [vmem:[%s5690_s23 + $0x300] sm:$0xff] %v2494_v47  ;;  %2691 = vst.msk [vmem:[%s5690_s23 + $0x308] sm:$0xff] %vm413_vm0, %v2495_v28  ;;  %v2091_v43 = vmul.f32 %v3095_v14, %v7264_v31  ;;  %v2088_v37 = vmul.f32 %v3097_v16, %v7265_v36  ;;  %v2089_v13 = vmul.f32 %v3097_v16, %v7266_v59  ;;  %v1583_v16 = vpop.xlane.xlu1 %1582  ;;  %v1751_v29 = vmul.f32 0.0052083335, %v6146_v45 }
 0x235   : > { %2696 = vst [vmem:[%s5690_s23 + $0x330] sm:$0xff] %v2500_v17  ;;  %2697 = vst.msk [vmem:[%s5690_s23 + $0x338] sm:$0xff] %vm413_vm0, %v2501_v35  ;;  %v2498_v27 = vadd.f32 %v4791_v12, %v2291_v54  ;;  %v2499_v55 = vadd.f32 %v4827_v25, %v2292_v9  ;;  %v2094_v24 = vmul.f32 %v3099_v52, %v7267_v19  ;;  %v1579_v11 = vpop.xlane.xlu0 %1578  ;;  %v1750_v28 = vmul.f32 0.0052083335, %v6152_v22  ;;  %v3101_v19 = vpop.eup %3100 }
 0x236   : > { %v2095_v60 = vmul.f32 %v3099_v52, %v7268_v21  ;;  %v2297_v6 = vmul.f32 %v4758_v34, %v2090_v10  ;;  %v2298_v48 = vmul.f32 %v4770_v1, %v2091_v43  ;;  %v2295_v14 = vmul.f32 %v4758_v34, %v2088_v37 }
 0x237   : > { %v2296_v33 = vmul.f32 %v4770_v1, %v2089_v13  ;;  %2694 = vst [vmem:[%s5690_s23 + $0x320] sm:$0xff] %v2498_v27  ;;  %2695 = vst.msk [vmem:[%s5690_s23 + $0x328] sm:$0xff] %vm413_vm0, %v2499_v55  ;;  %v2301_v57 = vmul.f32 %v4758_v34, %v2094_v24  ;;  %v1753_v52 = vmul.f32 0.0052083335, %v6172_v62  ;;  %v1755_v35 = vmul.f32 0.0052083335, %v6201_v58 }
 0x238   : > { %v2302_v2 = vmul.f32 %v4770_v1, %v2095_v60  ;;  %v2504_v44 = vadd.f32 %v4791_v12, %v2297_v6  ;;  %v2505_v20 = vadd.f32 %v4827_v25, %v2298_v48  ;;  %v2502_v51 = vadd.f32 %v4791_v12, %v2295_v14  ;;  %v1591_v17 = vpop.xlane.xlu1 %1590  ;;  %v7269_v6 = vld [vmem:[#allocation114_spill] sm:$0xff] }
 0x239   : > { %v2503_v0 = vadd.f32 %v4827_v25, %v2296_v33  ;;  %v2508_v42 = vadd.f32 %v4791_v12, %v2301_v57  ;;  %v1587_v54 = vpop.xlane.xlu0 %1586  ;;  %3108 = vrsqrt.f32 %v6127_v8  ;;  %v1849_v49 = vadd.f32 1e-06, %v1751_v29  ;;  %v7270_v14 = vld [vmem:[#allocation110_spill] sm:$0xff]  ;;  %v3103_v57 = vpop.eup %3102 }
 0x23a   : > { %v2509_v47 = vadd.f32 %v4827_v25, %v2302_v2  ;;  %2700 = vst [vmem:[%s5690_s23 + $0x350] sm:$0xff] %v2504_v44  ;;  %2701 = vst.msk [vmem:[%s5690_s23 + $0x358] sm:$0xff] %vm413_vm0, %v2505_v20  ;;  %v1848_v45 = vadd.f32 1e-06, %v1750_v28  ;;  %3110 = vrsqrt.f32 %v1847_v26  ;;  %v1851_v22 = vadd.f32 1e-06, %v1753_v52  ;;  %v3105_v20 = vpop.eup %3104 }
 0x23b   : > { %2698 = vst [vmem:[%s5690_s23 + $0x340] sm:$0xff] %v2502_v51  ;;  %2699 = vst.msk [vmem:[%s5690_s23 + $0x348] sm:$0xff] %vm413_vm0, %v2503_v0  ;;  %v1754_v62 = vmul.f32 0.0052083335, %v6210_v7  ;;  %3112 = vrsqrt.f32 %v1846_v39  ;;  %v1850_v9 = vadd.f32 1e-06, %v1752_v56  ;;  %v2092_v48 = vmul.f32 %v3101_v19, %v7269_v6  ;;  %v3107_v52 = vpop.eup %3106 }
 0x23c   : > { %2704 = vst [vmem:[%s5690_s23 + $0x370] sm:$0xff] %v2508_v42  ;;  %2705 = vst.msk [vmem:[%s5690_s23 + $0x378] sm:$0xff] %vm413_vm0, %v2509_v47  ;;  %v1757_v38 = vmul.f32 0.0052083335, %v6227_v4  ;;  %v1756_v10 = vmul.f32 0.0052083335, %v1571_v5  ;;  %v1599_v23 = vpop.xlane.xlu1 %1598  ;;  %3114 = vrsqrt.f32 %v1849_v49  ;;  %v2093_v33 = vmul.f32 %v3101_v19, %v7270_v14 }
 0x23d   : > { %v1853_v31 = vadd.f32 1e-06, %v1755_v35  ;;  %v1759_v50 = vmul.f32 0.0052083335, %v1583_v16  ;;  %v1595_v43 = vpop.xlane.xlu0 %1594  ;;  %3116 = vrsqrt.f32 %v1848_v45  ;;  %v1852_v58 = vadd.f32 1e-06, %v1754_v62 }
 0x23e   : > { %v1758_v36 = vmul.f32 0.0052083335, %v1579_v11  ;;  %v1761_v8 = vmul.f32 0.0052083335, %v1591_v17  ;;  %3118 = vrsqrt.f32 %v1851_v22  ;;  %v1855_v37 = vadd.f32 1e-06, %v1757_v38 }
 0x23f   : > { %v1760_v59 = vmul.f32 0.0052083335, %v1587_v54  ;;  %3120 = vrsqrt.f32 %v1850_v9  ;;  %v1854_v13 = vadd.f32 1e-06, %v1756_v10  ;;  %v1763_v7 = vmul.f32 0.0052083335, %v1599_v23 }
 0x240   : > { %v1762_v27 = vmul.f32 0.0052083335, %v1595_v43  ;;  %v1607_v55 = vpop.xlane.xlu1 %1606  ;;  %3122 = vrsqrt.f32 %v1853_v31  ;;  %v1857_v4 = vadd.f32 1e-06, %v1759_v50  ;;  %v6288_v24 = vadd.f32 1e-06, %v1758_v36 }
 0x241   : > { %v1603_v5 = vpop.xlane.xlu0 %1602  ;;  %3124 = vrsqrt.f32 %v1852_v58  ;;  %v6290_v21 = vadd.f32 1e-06, %v1761_v8  ;;  %v1765_v60 = vmul.f32 0.0052083335, %v1607_v55  ;;  %v6294_v16 = vadd.f32 1e-06, %v1760_v59 }
 0x242   : > { %3126 = vrsqrt.f32 %v1855_v37  ;;  %v6296_v2 = vadd.f32 1e-06, %v1763_v7  ;;  %v6298_v26 = vadd.f32 1e-06, %v1762_v27  ;;  %v6300_v11 = vmul.f32 0.0052083335, %v1603_v5 }
 0x243   : > { %3128 = vrsqrt.f32 %v1854_v13  ;;  %v2299_v51 = vmul.f32 %v4758_v34, %v2092_v48  ;;  %v2300_v0 = vmul.f32 %v4770_v1, %v2093_v33  ;;  %v7271_v42 = vld [vmem:[#allocation115_spill] sm:$0xff]  ;;  %v2099_v29 = vmul.f32 %v3103_v57, %v7272_v61  ;;  %v7273_v17 = vld [vmem:[#allocation116_spill] sm:$0xff]  ;;  %v7274_v56 = vld [vmem:[#allocation113_spill] sm:$0xff] }
 0x244   : > { %v6302_v44 = vpop.xlane.xlu1 %1614  ;;  %v2098_v47 = vmul.f32 %v3103_v57, %v7271_v42  ;;  %v2096_v39 = vmul.f32 %v3105_v20, %v7273_v17  ;;  %v2097_v35 = vmul.f32 %v3105_v20, %v7274_v56  ;;  %3130 = vrsqrt.f32 %v1857_v4  ;;  %v7275_v31 = vld [vmem:[#allocation119_spill] sm:$0xff]  ;;  %v7276_v43 = vld [vmem:[#allocation117_spill] sm:$0xff]  ;;  %v7277_v13 = vld [vmem:[#allocation122_spill] sm:$0xff] }
 0x245   : > { %v6308_v28 = vpop.xlane.xlu0 %1610  ;;  %v6312_v54 = vadd.f32 1e-06, %v1765_v60  ;;  %v2506_v45 = vadd.f32 %v4791_v12, %v2299_v51  ;;  %v2507_v22 = vadd.f32 %v4827_v25, %v2300_v0  ;;  %v2306_v9 = vmul.f32 %v4770_v1, %v2099_v29  ;;  %v7278_v27 = vld [vmem:[#allocation118_spill] sm:$0xff]  ;;  %v7279_v20 = vld [vmem:[#allocation123_spill] sm:$0xff]  ;;  %v7280_v0 = vld [vmem:[#allocation120_spill] sm:$0xff] }
 0x246   : > { %v3109_v49 = vpop.eup %3108  ;;  %v2305_v62 = vmul.f32 %v4758_v34, %v2098_v47  ;;  %v2303_v10 = vmul.f32 %v4758_v34, %v2096_v39  ;;  %v2304_v23 = vmul.f32 %v4770_v1, %v2097_v35  ;;  %v2102_v50 = vmul.f32 %v3107_v52, %v7275_v31  ;;  %v7282_v39 = vld [vmem:[#allocation121_spill] sm:$0xff] }
 0x247   : > { %v3111_v38 = vpop.eup %3110  ;;  %v2103_v58 = vmul.f32 %v3107_v52, %v7276_v43  ;;  %2702 = vst [vmem:[%s5690_s23 + $0x360] sm:$0xff] %v2506_v45  ;;  %2703 = vst.msk [vmem:[%s5690_s23 + $0x368] sm:$0xff] %vm413_vm0, %v2507_v22  ;;  %v2513_v59 = vadd.f32 %v4827_v25, %v2306_v9  ;;  %v2100_v7 = vmul.f32 %v3109_v49, %v7277_v13  ;;  %v7281_v52 = vld [vmem:[#allocation124_spill] sm:$0xff]  ;;  %3132 = vrsqrt.f32 %v6288_v24 }
 0x248   : > { %v6322_v36 = vpop.xlane.xlu1 %1622  ;;  %v3113_v8 = vpop.eup %3112  ;;  %v2512_v37 = vadd.f32 %v4791_v12, %v2305_v62  ;;  %v2101_v55 = vmul.f32 %v3109_v49, %v7278_v27  ;;  %v2510_v19 = vadd.f32 %v4791_v12, %v2303_v10  ;;  %v2511_v60 = vadd.f32 %v4827_v25, %v2304_v23 }
 0x249   : > { %v6331_v4 = vpop.xlane.xlu0 %1618  ;;  %v3115_v5 = vpop.eup %3114  ;;  %v2309_v6 = vmul.f32 %v4758_v34, %v2102_v50  ;;  %v2310_v48 = vmul.f32 %v4770_v1, %v2103_v58  ;;  %2709 = vst.msk [vmem:[%s5690_s23 + $0x398] sm:$0xff] %vm413_vm0, %v2513_v59  ;;  %v2307_v33 = vmul.f32 %v4758_v34, %v2100_v7  ;;  %v2106_v51 = vmul.f32 %v3111_v38, %v7279_v20  ;;  %v7283_v50 = vld [vmem:[#allocation127_spill] sm:$0xff]  ;;  %v7284_v58 = vld [vmem:[#allocation125_spill] sm:$0xff] }
 0x24a   : > { %v3117_v14 = vpop.eup %3116  ;;  %2708 = vst [vmem:[%s5690_s23 + $0x390] sm:$0xff] %v2512_v37  ;;  %v2308_v57 = vmul.f32 %v4770_v1, %v2101_v55  ;;  %v2107_v42 = vmul.f32 %v3111_v38, %v7280_v0  ;;  %2706 = vst [vmem:[%s5690_s23 + $0x380] sm:$0xff] %v2510_v19  ;;  %v2104_v17 = vmul.f32 %v3113_v8, %v7281_v52  ;;  %v7285_v7 = vld [vmem:[#allocation129_spill] sm:$0xff]  ;;  %v7286_v55 = vld [vmem:[#allocation126_spill] sm:$0xff]  ;;  %3134 = vrsqrt.f32 %v6290_v21 }
 0x24b   : > { %v3119_v47 = vpop.eup %3118  ;;  %2707 = vst.msk [vmem:[%s5690_s23 + $0x388] sm:$0xff] %vm413_vm0, %v2511_v60  ;;  %v2516_v61 = vadd.f32 %v4791_v12, %v2309_v6  ;;  %v2517_v29 = vadd.f32 %v4827_v25, %v2310_v48  ;;  %v2105_v56 = vmul.f32 %v3113_v8, %v7282_v39  ;;  %v2514_v45 = vadd.f32 %v4791_v12, %v2307_v33  ;;  %v7287_v0 = vld [vmem:[#allocation130_spill] sm:$0xff] }
 0x24c   : > { %v3121_v49 = vpop.eup %3120  ;;  %v2515_v22 = vadd.f32 %v4827_v25, %v2308_v57  ;;  %v2313_v62 = vmul.f32 %v4758_v34, %v2106_v51  ;;  %v2314_v9 = vmul.f32 %v4770_v1, %v2107_v42  ;;  %v2311_v23 = vmul.f32 %v4758_v34, %v2104_v17 }
 0x24d   : > { %v6351_v35 = vpop.xlane.xlu1 %1630  ;;  %v3123_v10 = vpop.eup %3122  ;;  %2712 = vst [vmem:[%s5690_s23 + $0x3b0] sm:$0xff] %v2516_v61  ;;  %2713 = vst.msk [vmem:[%s5690_s23 + $0x3b8] sm:$0xff] %vm413_vm0, %v2517_v29  ;;  %v2312_v31 = vmul.f32 %v4770_v1, %v2105_v56  ;;  %v2110_v43 = vmul.f32 %v3115_v5, %v7283_v50  ;;  %v2111_v8 = vmul.f32 %v3115_v5, %v7284_v58  ;;  %v7288_v61 = vld [vmem:[#allocation128_spill] sm:$0xff]  ;;  %v7289_v56 = vld [vmem:[#allocation134_spill] sm:$0xff]  ;;  %v1862_v24 = vadd.f32 1e-06, %v6300_v11 }
 0x24e   : > { %v6357_v38 = vpop.xlane.xlu0 %1626  ;;  %v3125_v37 = vpop.eup %3124  ;;  %2710 = vst [vmem:[%s5690_s23 + $0x3a0] sm:$0xff] %v2514_v45  ;;  %2711 = vst.msk [vmem:[%s5690_s23 + $0x3a8] sm:$0xff] %vm413_vm0, %v2515_v22  ;;  %v2520_v59 = vadd.f32 %v4791_v12, %v2313_v62  ;;  %v2521_v13 = vadd.f32 %v4827_v25, %v2314_v9  ;;  %v2108_v27 = vmul.f32 %v3117_v14, %v7285_v7  ;;  %v7290_v22 = vld [vmem:[#allocation131_spill] sm:$0xff]  ;;  %3136 = vrsqrt.f32 %v6294_v16 }
 0x24f   : > { %v2109_v19 = vmul.f32 %v3117_v14, %v7286_v55  ;;  %v3127_v60 = vpop.eup %3126  ;;  %v2518_v6 = vadd.f32 %v4791_v12, %v2311_v23  ;;  %v2519_v5 = vadd.f32 %v4827_v25, %v2312_v31  ;;  %v2317_v48 = vmul.f32 %v4758_v34, %v2110_v43 }
 0x250   : > { %v2318_v33 = vmul.f32 %v4770_v1, %v2111_v8  ;;  %v3129_v20 = vpop.eup %3128  ;;  %2716 = vst [vmem:[%s5690_s23 + $0x3d0] sm:$0xff] %v2520_v59  ;;  %2717 = vst.msk [vmem:[%s5690_s23 + $0x3d8] sm:$0xff] %vm413_vm0, %v2521_v13  ;;  %v2315_v51 = vmul.f32 %v4758_v34, %v2108_v27  ;;  %v2114_v42 = vmul.f32 %v3119_v47, %v7287_v0  ;;  %v7291_v8 = vld [vmem:[#allocation135_spill] sm:$0xff]  ;;  %v7292_v59 = vld [vmem:[#allocation132_spill] sm:$0xff]  ;;  %3138 = vrsqrt.f32 %v6296_v2 }
 0x251   : > { %v6377_v57 = vpop.xlane.xlu1 %1638  ;;  %v2316_v14 = vmul.f32 %v4770_v1, %v2109_v19  ;;  %v2115_v29 = vmul.f32 %v3119_v47, %v7288_v61  ;;  %2714 = vst [vmem:[%s5690_s23 + $0x3c0] sm:$0xff] %v2518_v6  ;;  %2715 = vst.msk [vmem:[%s5690_s23 + $0x3c8] sm:$0xff] %vm413_vm0, %v2519_v5  ;;  %v2524_v17 = vadd.f32 %v4791_v12, %v2317_v48  ;;  %v3131_v9 = vpop.eup %3130  ;;  %v7293_v19 = vld [vmem:[#allocation137_spill] sm:$0xff]  ;;  %v1771_v11 = vmul.f32 0.0052083335, %v6351_v35 }
 0x252   : > { %v6386_v52 = vpop.xlane.xlu0 %1634  ;;  %v2525_v39 = vadd.f32 %v4827_v25, %v2318_v33  ;;  %v2112_v45 = vmul.f32 %v3121_v49, %v7289_v56  ;;  %v2113_v62 = vmul.f32 %v3121_v49, %v7290_v22  ;;  %v2522_v23 = vadd.f32 %v4791_v12, %v2315_v51  ;;  %v7294_v5 = vld [vmem:[#allocation133_spill] sm:$0xff]  ;;  %v7297_v22 = vld [vmem:[#allocation140_spill] sm:$0xff] }
 0x253   : > { %v2523_v47 = vadd.f32 %v4827_v25, %v2316_v14  ;;  %v2321_v31 = vmul.f32 %v4758_v34, %v2114_v42  ;;  %v2322_v50 = vmul.f32 %v4770_v1, %v2115_v29  ;;  %2720 = vst [vmem:[%s5690_s23 + $0x3f0] sm:$0xff] %v2524_v17  ;;  %v2118_v49 = vmul.f32 %v3123_v10, %v7291_v8  ;;  %v7296_v17 = vld [vmem:[#allocation136_spill] sm:$0xff] }
 0x254   : > { %2721 = vst.msk [vmem:[%s5690_s23 + $0x3f8] sm:$0xff] %vm413_vm0, %v2525_v39  ;;  %v2319_v43 = vmul.f32 %v4758_v34, %v2112_v45  ;;  %v2320_v58 = vmul.f32 %v4770_v1, %v2113_v62  ;;  %v2119_v13 = vmul.f32 %v3123_v10, %v7292_v59  ;;  %2718 = vst [vmem:[%s5690_s23 + $0x3e0] sm:$0xff] %v2522_v23  ;;  %v7298_v23 = vld [vmem:[#allocation138_spill] sm:$0xff]  ;;  %v7299_v59 = vld [vmem:[#allocation143_spill] sm:$0xff]  ;;  %3140 = vrsqrt.f32 %v6298_v26 }
 0x255   : > { %v6406_v7 = vpop.xlane.xlu1 %1646  ;;  %2719 = vst.msk [vmem:[%s5690_s23 + $0x3e8] sm:$0xff] %vm413_vm0, %v2523_v47  ;;  %v2528_v27 = vadd.f32 %v4791_v12, %v2321_v31  ;;  %v2529_v55 = vadd.f32 %v4827_v25, %v2322_v50  ;;  %v2116_v6 = vmul.f32 %v3125_v37, %v7293_v19  ;;  %v2117_v48 = vmul.f32 %v3125_v37, %v7294_v5  ;;  %v7295_v37 = vld [vmem:[#allocation139_spill] sm:$0xff] }
 0x256   : > { %v6415_v33 = vpop.xlane.xlu0 %1642  ;;  %v2526_v51 = vadd.f32 %v4791_v12, %v2319_v43  ;;  %v2527_v10 = vadd.f32 %v4827_v25, %v2320_v58  ;;  %v2325_v14 = vmul.f32 %v4758_v34, %v2118_v49  ;;  %v2326_v0 = vmul.f32 %v4770_v1, %v2119_v13  ;;  %v7300_v13 = vld [vmem:[#allocation141_spill] sm:$0xff] }
 0x257   : > { %2724 = vst [vmem:[%s5690_s23 + $0x410] sm:$0xff] %v2528_v27  ;;  %2725 = vst.msk [vmem:[%s5690_s23 + $0x418] sm:$0xff] %vm413_vm0, %v2529_v55  ;;  %v2323_v42 = vmul.f32 %v4758_v34, %v2116_v6  ;;  %v2324_v61 = vmul.f32 %v4770_v1, %v2117_v48  ;;  %v2122_v29 = vmul.f32 %v3127_v60, %v7295_v37  ;;  %v1767_v6 = vmul.f32 0.0052083335, %v6302_v44 }
 0x258   : > { %v2123_v39 = vmul.f32 %v3127_v60, %v7296_v17  ;;  %2722 = vst [vmem:[%s5690_s23 + $0x400] sm:$0xff] %v2526_v51  ;;  %2723 = vst.msk [vmem:[%s5690_s23 + $0x408] sm:$0xff] %vm413_vm0, %v2527_v10  ;;  %v2532_v56 = vadd.f32 %v4791_v12, %v2325_v14  ;;  %v2533_v45 = vadd.f32 %v4827_v25, %v2326_v0  ;;  %v1766_v44 = vmul.f32 0.0052083335, %v6308_v28 }
 0x259   : > { %v2120_v62 = vmul.f32 %v3129_v20, %v7297_v22  ;;  %v2121_v47 = vmul.f32 %v3129_v20, %v7298_v23  ;;  %v1655_v31 = vpop.xlane.xlu1 %1654  ;;  %v2530_v50 = vadd.f32 %v4791_v12, %v2323_v42  ;;  %v2531_v43 = vadd.f32 %v4827_v25, %v2324_v61 }
 0x25a   : > { %v2329_v60 = vmul.f32 %v4758_v34, %v2122_v29  ;;  %v2330_v58 = vmul.f32 %v4770_v1, %v2123_v39  ;;  %2728 = vst [vmem:[%s5690_s23 + $0x430] sm:$0xff] %v2532_v56  ;;  %2729 = vst.msk [vmem:[%s5690_s23 + $0x438] sm:$0xff] %vm413_vm0, %v2533_v45  ;;  %v2126_v20 = vmul.f32 %v3131_v9, %v7299_v59  ;;  %v1651_v5 = vpop.xlane.xlu0 %1650  ;;  %v1769_v14 = vmul.f32 0.0052083335, %v6322_v36 }
 0x25b   : > { %v2327_v8 = vmul.f32 %v4758_v34, %v2120_v62  ;;  %v2328_v49 = vmul.f32 %v4770_v1, %v2121_v47  ;;  %v2127_v27 = vmul.f32 %v3131_v9, %v7300_v13  ;;  %2726 = vst [vmem:[%s5690_s23 + $0x420] sm:$0xff] %v2530_v50  ;;  %2727 = vst.msk [vmem:[%s5690_s23 + $0x428] sm:$0xff] %vm413_vm0, %v2531_v43  ;;  %v1768_v37 = vmul.f32 0.0052083335, %v6331_v4 }
 0x25c   : > { %v2536_v55 = vadd.f32 %v4791_v12, %v2329_v60  ;;  %v2537_v19 = vadd.f32 %v4827_v25, %v2330_v58  ;;  %v2333_v9 = vmul.f32 %v4758_v34, %v2126_v20  ;;  %v1865_v21 = vadd.f32 1e-06, %v1767_v6  ;;  %v7301_v60 = vld [vmem:[#allocation145_spill] sm:$0xff] }
 0x25d   : > { %v2534_v48 = vadd.f32 %v4791_v12, %v2327_v8  ;;  %v2535_v51 = vadd.f32 %v4827_v25, %v2328_v49  ;;  %v2334_v10 = vmul.f32 %v4770_v1, %v2127_v27  ;;  %v1663_v0 = vpop.xlane.xlu1 %1662  ;;  %v1864_v28 = vadd.f32 1e-06, %v1766_v44 }
 0x25e   : > { %2732 = vst [vmem:[%s5690_s23 + $0x450] sm:$0xff] %v2536_v55  ;;  %2733 = vst.msk [vmem:[%s5690_s23 + $0x458] sm:$0xff] %vm413_vm0, %v2537_v19  ;;  %v2540_v42 = vadd.f32 %v4791_v12, %v2333_v9  ;;  %v1770_v36 = vmul.f32 0.0052083335, %v6357_v38  ;;  %3142 = vrsqrt.f32 %v6312_v54  ;;  %v1867_v29 = vadd.f32 1e-06, %v1769_v14  ;;  %v1659_v17 = vpop.xlane.xlu0 %1658 }
 0x25f   : > { %2730 = vst [vmem:[%s5690_s23 + $0x440] sm:$0xff] %v2534_v48  ;;  %2731 = vst.msk [vmem:[%s5690_s23 + $0x448] sm:$0xff] %vm413_vm0, %v2535_v51  ;;  %v2541_v61 = vadd.f32 %v4827_v25, %v2334_v10  ;;  %v1773_v16 = vmul.f32 0.0052083335, %v6377_v57  ;;  %3144 = vrsqrt.f32 %v1862_v24  ;;  %v1866_v4 = vadd.f32 1e-06, %v1768_v37 }
 0x260   : > { %2736 = vst [vmem:[%s5690_s23 + $0x470] sm:$0xff] %v2540_v42  ;;  %v1772_v2 = vmul.f32 0.0052083335, %v6386_v52  ;;  %3146 = vrsqrt.f32 %v1865_v21  ;;  %v1869_v35 = vadd.f32 1e-06, %v1771_v11  ;;  %v3133_v52 = vpop.eup %3132  ;;  %v7304_v51 = vld [vmem:[#allocation144_spill] sm:$0xff] }
 0x261   : > { %2737 = vst.msk [vmem:[%s5690_s23 + $0x478] sm:$0xff] %vm413_vm0, %v2541_v61  ;;  %v1775_v39 = vmul.f32 0.0052083335, %v6406_v7  ;;  %v1671_v56 = vpop.xlane.xlu1 %1670  ;;  %3148 = vrsqrt.f32 %v1864_v28  ;;  %v1868_v26 = vadd.f32 1e-06, %v1770_v36  ;;  %v3135_v59 = vpop.eup %3134  ;;  %v7305_v24 = vld [vmem:[#allocation150_spill] sm:$0xff] }
 0x262   : > { %v1774_v45 = vmul.f32 0.0052083335, %v6415_v33  ;;  %v1777_v38 = vmul.f32 0.0052083335, %v1655_v31  ;;  %3150 = vrsqrt.f32 %v1867_v29  ;;  %v1871_v54 = vadd.f32 1e-06, %v1773_v16  ;;  %v1667_v47 = vpop.xlane.xlu0 %1666  ;;  %v3137_v55 = vpop.eup %3136 }
 0x263   : > { %3152 = vrsqrt.f32 %v1866_v4  ;;  %v1870_v22 = vadd.f32 1e-06, %v1772_v2  ;;  %v1776_v57 = vmul.f32 0.0052083335, %v1651_v5  ;;  %v1779_v62 = vmul.f32 0.0052083335, %v1663_v0  ;;  %v3139_v10 = vpop.eup %3138 }
 0x264   : > { %3154 = vrsqrt.f32 %v1869_v35  ;;  %v1873_v23 = vadd.f32 1e-06, %v1775_v39  ;;  %v6483_v50 = vadd.f32 1e-06, %v1774_v45  ;;  %v6485_v7 = vadd.f32 1e-06, %v1777_v38  ;;  %v3141_v61 = vpop.eup %3140 }
 0x265   : > { %3156 = vrsqrt.f32 %v1868_v26  ;;  %v6487_v43 = vmul.f32 0.0052083335, %v1659_v17  ;;  %v2124_v33 = vmul.f32 %v3133_v52, %v7301_v60  ;;  %v7302_v31 = vld [vmem:[#allocation142_spill] sm:$0xff]  ;;  %v6491_v8 = vmul.f32 0.0052083335, %v1671_v56  ;;  %v1679_v49 = vpop.xlane.xlu1 %1678  ;;  %v7306_v14 = vld [vmem:[#allocation147_spill] sm:$0xff] }
 0x266   : > { %v2125_v58 = vmul.f32 %v3133_v52, %v7302_v31  ;;  %3158 = vrsqrt.f32 %v1871_v54  ;;  %v6493_v20 = vadd.f32 1e-06, %v1776_v57  ;;  %v6495_v13 = vadd.f32 1e-06, %v1779_v62  ;;  %v7303_v5 = vld [vmem:[#allocation146_spill] sm:$0xff]  ;;  %v7307_v17 = vld [vmem:[#allocation151_spill] sm:$0xff] }
 0x267   : > { %3160 = vrsqrt.f32 %v1870_v22  ;;  %v6497_v27 = vmul.f32 0.0052083335, %v1667_v47  ;;  %v2331_v19 = vmul.f32 %v4758_v34, %v2124_v33  ;;  %v2130_v48 = vmul.f32 %v3135_v59, %v7303_v5  ;;  %v7308_v2 = vld [vmem:[#allocation148_spill] sm:$0xff]  ;;  %v7309_v45 = vld [vmem:[#allocation153_spill] sm:$0xff] }
 0x268   : > { %v2332_v6 = vmul.f32 %v4770_v1, %v2125_v58  ;;  %v2131_v9 = vmul.f32 %v3135_v59, %v7304_v51  ;;  %v2128_v44 = vmul.f32 %v3137_v55, %v7305_v24  ;;  %v2129_v0 = vmul.f32 %v3137_v55, %v7306_v14  ;;  %v7310_v54 = vld [vmem:[#allocation149_spill] sm:$0xff]  ;;  %v7311_v58 = vld [vmem:[#allocation154_spill] sm:$0xff]  ;;  %v7312_v59 = vld [vmem:[#allocation152_spill] sm:$0xff] }
 0x269   : > { %3162 = vrsqrt.f32 %v1873_v23  ;;  %v6505_v42 = vmul.f32 0.0052083335, %v1679_v49  ;;  %v2538_v37 = vadd.f32 %v4791_v12, %v2331_v19  ;;  %v2337_v11 = vmul.f32 %v4758_v34, %v2130_v48  ;;  %v7313_v51 = vld [vmem:[#allocation155_spill] sm:$0xff] }
 0x26a   : > { %v2539_v21 = vadd.f32 %v4827_v25, %v2332_v6  ;;  %v2338_v28 = vmul.f32 %v4770_v1, %v2131_v9  ;;  %v2335_v29 = vmul.f32 %v4758_v34, %v2128_v44  ;;  %v2336_v16 = vmul.f32 %v4770_v1, %v2129_v0 }
 0x26b   : > { %v3143_v36 = vpop.eup %3142  ;;  %v2134_v4 = vmul.f32 %v3139_v10, %v7307_v17  ;;  %v2135_v35 = vmul.f32 %v3139_v10, %v7308_v2  ;;  %2734 = vst [vmem:[%s5690_s23 + $0x460] sm:$0xff] %v2538_v37  ;;  %v2544_v56 = vadd.f32 %v4791_v12, %v2337_v11  ;;  %v2132_v38 = vmul.f32 %v3141_v61, %v7309_v45 }
 0x26c   : > { %v3145_v39 = vpop.eup %3144  ;;  %2735 = vst.msk [vmem:[%s5690_s23 + $0x468] sm:$0xff] %vm413_vm0, %v2539_v21  ;;  %v2545_v26 = vadd.f32 %v4827_v25, %v2338_v28  ;;  %v2133_v22 = vmul.f32 %v3141_v61, %v7310_v54  ;;  %v2542_v62 = vadd.f32 %v4791_v12, %v2335_v29  ;;  %v2543_v23 = vadd.f32 %v4827_v25, %v2336_v16  ;;  %v7314_v21 = vld [vmem:[#allocation159_spill] sm:$0xff]  ;;  %v7315_v28 = vld [vmem:[#allocation156_spill] sm:$0xff] }
 0x26d   : > { %v3147_v57 = vpop.eup %3146  ;;  %v2341_v47 = vmul.f32 %v4758_v34, %v2134_v4  ;;  %v2342_v52 = vmul.f32 %v4770_v1, %v2135_v35  ;;  %2740 = vst [vmem:[%s5690_s23 + $0x490] sm:$0xff] %v2544_v56  ;;  %v2339_v33 = vmul.f32 %v4758_v34, %v2132_v38  ;;  %v2138_v49 = vmul.f32 %v3143_v36, %v7311_v58  ;;  %v7316_v4 = vld [vmem:[#allocation161_spill] sm:$0xff]  ;;  %v7320_v58 = vld [vmem:[#allocation163_spill] sm:$0xff] }
 0x26e   : > { %v3149_v60 = vpop.eup %3148  ;;  %2741 = vst.msk [vmem:[%s5690_s23 + $0x498] sm:$0xff] %vm413_vm0, %v2545_v26  ;;  %v2340_v31 = vmul.f32 %v4770_v1, %v2133_v22  ;;  %v2139_v55 = vmul.f32 %v3143_v36, %v7312_v59  ;;  %2738 = vst [vmem:[%s5690_s23 + $0x480] sm:$0xff] %v2542_v62  ;;  %v2136_v48 = vmul.f32 %v3145_v39, %v5356_v41  ;;  %v7317_v35 = vld [vmem:[#allocation157_spill] sm:$0xff]  ;;  %v7321_v59 = vld [vmem:[#allocation160_spill] sm:$0xff]  ;;  %3164 = vrsqrt.f32 %v6483_v50 }
 0x26f   : > { %v3151_v19 = vpop.eup %3150  ;;  %2739 = vst.msk [vmem:[%s5690_s23 + $0x488] sm:$0xff] %vm413_vm0, %v2543_v23  ;;  %v2548_v6 = vadd.f32 %v4791_v12, %v2341_v47  ;;  %v2549_v5 = vadd.f32 %v4827_v25, %v2342_v52  ;;  %v2137_v9 = vmul.f32 %v3145_v39, %v7313_v51  ;;  %v2546_v24 = vadd.f32 %v4791_v12, %v2339_v33  ;;  %v7318_v23 = vld [vmem:[#allocation162_spill] sm:$0xff] }
 0x270   : > { %v3153_v10 = vpop.eup %3152  ;;  %v2547_v44 = vadd.f32 %v4827_v25, %v2340_v31  ;;  %v2345_v14 = vmul.f32 %v4758_v34, %v2138_v49  ;;  %v2346_v0 = vmul.f32 %v4770_v1, %v2139_v55  ;;  %v2343_v37 = vmul.f32 %v4758_v34, %v2136_v48  ;;  %v7319_v52 = vld [vmem:[#allocation158_spill] sm:$0xff] }
 0x271   : > { %v3155_v61 = vpop.eup %3154  ;;  %2744 = vst [vmem:[%s5690_s23 + $0x4b0] sm:$0xff] %v2548_v6  ;;  %2745 = vst.msk [vmem:[%s5690_s23 + $0x4b8] sm:$0xff] %vm413_vm0, %v2549_v5  ;;  %v2344_v41 = vmul.f32 %v4770_v1, %v2137_v9  ;;  %v2142_v11 = vmul.f32 %v3147_v57, %v7314_v21  ;;  %v2143_v36 = vmul.f32 %v3147_v57, %v7315_v28  ;;  %v7324_v21 = vld [vmem:[#allocation167_spill] sm:$0xff]  ;;  %v7325_v28 = vld [vmem:[#allocation165_spill] sm:$0xff]  ;;  %3166 = vrsqrt.f32 %v6485_v7 }
 0x272   : > { %v3157_v29 = vpop.eup %3156  ;;  %2742 = vst [vmem:[%s5690_s23 + $0x4a0] sm:$0xff] %v2546_v24  ;;  %2743 = vst.msk [vmem:[%s5690_s23 + $0x4a8] sm:$0xff] %vm413_vm0, %v2547_v44  ;;  %v2552_v16 = vadd.f32 %v4791_v12, %v2345_v14  ;;  %v2553_v17 = vadd.f32 %v4827_v25, %v2346_v0  ;;  %v2140_v2 = vmul.f32 %v3149_v60, %v7316_v4  ;;  %v7322_v44 = vld [vmem:[#allocation166_spill] sm:$0xff]  ;;  %v7323_v14 = vld [vmem:[#allocation164_spill] sm:$0xff]  ;;  %v1879_v50 = vadd.f32 1e-06, %v6491_v8 }
 0x273   : > { %v2141_v39 = vmul.f32 %v3149_v60, %v7317_v35  ;;  %v3159_v56 = vpop.eup %3158  ;;  %v2550_v26 = vadd.f32 %v4791_v12, %v2343_v37  ;;  %v2551_v45 = vadd.f32 %v4827_v25, %v2344_v41  ;;  %v2349_v38 = vmul.f32 %v4758_v34, %v2142_v11 }
 0x274   : > { %v2350_v54 = vmul.f32 %v4770_v1, %v2143_v36  ;;  %v3161_v22 = vpop.eup %3160  ;;  %2748 = vst [vmem:[%s5690_s23 + $0x4d0] sm:$0xff] %v2552_v16  ;;  %2749 = vst.msk [vmem:[%s5690_s23 + $0x4d8] sm:$0xff] %vm413_vm0, %v2553_v17  ;;  %v2347_v57 = vmul.f32 %v4758_v34, %v2140_v2  ;;  %v2146_v47 = vmul.f32 %v3151_v19, %v7318_v23  ;;  %v7328_v23 = vld [vmem:[#allocation169_spill] sm:$0xff]  ;;  %3168 = vrsqrt.f32 %v6493_v20 }
 0x275   : > { %v2348_v62 = vmul.f32 %v4770_v1, %v2141_v39  ;;  %v2147_v60 = vmul.f32 %v3151_v19, %v7319_v52  ;;  %2746 = vst [vmem:[%s5690_s23 + $0x4c0] sm:$0xff] %v2550_v26  ;;  %2747 = vst.msk [vmem:[%s5690_s23 + $0x4c8] sm:$0xff] %vm413_vm0, %v2551_v45  ;;  %v2556_v33 = vadd.f32 %v4791_v12, %v2349_v38  ;;  %v1675_v45 = vpop.xlane.xlu0 %1674  ;;  %3170 = vrsqrt.f32 %v6495_v13 }
 0x276   : > { %v2557_v31 = vadd.f32 %v4827_v25, %v2350_v54  ;;  %v2144_v49 = vmul.f32 %v3153_v10, %v7320_v58  ;;  %v2145_v55 = vmul.f32 %v3153_v10, %v7321_v59  ;;  %v3163_v6 = vpop.eup %3162  ;;  %v2554_v5 = vadd.f32 %v4791_v12, %v2347_v57  ;;  %v7327_v57 = vld [vmem:[#allocation173_spill] sm:$0xff]  ;;  %v7329_v58 = vld [vmem:[#allocation174_spill] sm:$0xff] }
 0x277   : > { %v2555_v48 = vadd.f32 %v4827_v25, %v2348_v62  ;;  %v2353_v19 = vmul.f32 %v4758_v34, %v2146_v47  ;;  %v2354_v51 = vmul.f32 %v4770_v1, %v2147_v60  ;;  %2752 = vst [vmem:[%s5690_s23 + $0x4f0] sm:$0xff] %v2556_v33  ;;  %v2150_v10 = vmul.f32 %v3155_v61, %v7322_v44 }
 0x278   : > { %2753 = vst.msk [vmem:[%s5690_s23 + $0x4f8] sm:$0xff] %vm413_vm0, %v2557_v31  ;;  %v2351_v9 = vmul.f32 %v4758_v34, %v2144_v49  ;;  %v2352_v24 = vmul.f32 %v4770_v1, %v2145_v55  ;;  %v2151_v0 = vmul.f32 %v3155_v61, %v7323_v14  ;;  %2750 = vst [vmem:[%s5690_s23 + $0x4e0] sm:$0xff] %v2554_v5  ;;  %v1782_v44 = vmul.f32 0.0052083335, %v1675_v45 }
 0x279   : > { %2751 = vst.msk [vmem:[%s5690_s23 + $0x4e8] sm:$0xff] %vm413_vm0, %v2555_v48  ;;  %v2560_v37 = vadd.f32 %v4791_v12, %v2353_v19  ;;  %v2561_v41 = vadd.f32 %v4827_v25, %v2354_v51  ;;  %v2148_v11 = vmul.f32 %v3157_v29, %v7324_v21  ;;  %v2149_v36 = vmul.f32 %v3157_v29, %v7325_v28  ;;  %v7326_v29 = vld [vmem:[#allocation168_spill] sm:$0xff]  ;;  %v7332_v28 = vld [vmem:[#allocation171_spill] sm:$0xff] }
 0x27a   : > { %v2558_v16 = vadd.f32 %v4791_v12, %v2351_v9  ;;  %v2559_v17 = vadd.f32 %v4827_v25, %v2352_v24  ;;  %v2357_v4 = vmul.f32 %v4758_v34, %v2150_v10  ;;  %v2358_v61 = vmul.f32 %v4770_v1, %v2151_v0  ;;  %v1687_v24 = vpop.xlane.xlu1 %1686 }
 0x27b   : > { %2756 = vst [vmem:[%s5690_s23 + $0x510] sm:$0xff] %v2560_v37  ;;  %2757 = vst.msk [vmem:[%s5690_s23 + $0x518] sm:$0xff] %vm413_vm0, %v2561_v41  ;;  %v2355_v2 = vmul.f32 %v4758_v34, %v2148_v11  ;;  %v2356_v35 = vmul.f32 %v4770_v1, %v2149_v36  ;;  %v2154_v39 = vmul.f32 %v3159_v56, %v5471_v46  ;;  %v1876_v48 = vadd.f32 1e-06, %v6487_v43  ;;  %v1683_v43 = vpop.xlane.xlu0 %1682  ;;  %v3165_v20 = vpop.eup %3164 }
 0x27c   : > { %v2155_v26 = vmul.f32 %v3159_v56, %v7326_v29  ;;  %2754 = vst [vmem:[%s5690_s23 + $0x500] sm:$0xff] %v2558_v16  ;;  %2755 = vst.msk [vmem:[%s5690_s23 + $0x508] sm:$0xff] %vm413_vm0, %v2559_v17  ;;  %v2564_v38 = vadd.f32 %v4791_v12, %v2357_v4  ;;  %v2565_v54 = vadd.f32 %v4827_v25, %v2358_v61  ;;  %v1878_v0 = vadd.f32 1e-06, %v6497_v27  ;;  %v7331_v27 = vld [vmem:[#allocation176_spill] sm:$0xff]  ;;  %v7333_v61 = vld [vmem:[#allocation177_spill] sm:$0xff] }
 0x27d   : > { %v2152_v62 = vmul.f32 %v3161_v22, %v7327_v57  ;;  %v2153_v47 = vmul.f32 %v3161_v22, %v7328_v23  ;;  %v2562_v52 = vadd.f32 %v4791_v12, %v2355_v2  ;;  %v2563_v46 = vadd.f32 %v4827_v25, %v2356_v35  ;;  %v7330_v22 = vld [vmem:[#allocation170_spill] sm:$0xff]  ;;  %v7334_v35 = vld [vmem:[#allocation172_spill] sm:$0xff] }
 0x27e   : > { %v2361_v56 = vmul.f32 %v4758_v34, %v2154_v39  ;;  %v2362_v60 = vmul.f32 %v4770_v1, %v2155_v26  ;;  %2760 = vst [vmem:[%s5690_s23 + $0x530] sm:$0xff] %v2564_v38  ;;  %2761 = vst.msk [vmem:[%s5690_s23 + $0x538] sm:$0xff] %vm413_vm0, %v2565_v54  ;;  %v2158_v49 = vmul.f32 %v3163_v6, %v7329_v58  ;;  %v1785_v37 = vmul.f32 0.0052083335, %v1687_v24  ;;  %v3167_v16 = vpop.eup %3166  ;;  %v7335_v26 = vld [vmem:[#allocation179_spill] sm:$0xff] }
 0x27f   : > { %v2359_v33 = vmul.f32 %v4758_v34, %v2152_v62  ;;  %v2360_v31 = vmul.f32 %v4770_v1, %v2153_v47  ;;  %v2159_v59 = vmul.f32 %v3163_v6, %v7330_v22  ;;  %2758 = vst [vmem:[%s5690_s23 + $0x520] sm:$0xff] %v2562_v52  ;;  %2759 = vst.msk [vmem:[%s5690_s23 + $0x528] sm:$0xff] %vm413_vm0, %v2563_v46  ;;  %3172 = vrsqrt.f32 %v1876_v48  ;;  %v7336_v38 = vld [vmem:[#allocation175_spill] sm:$0xff] }
 0x280   : > { %v2568_v55 = vadd.f32 %v4791_v12, %v2361_v56  ;;  %v2569_v5 = vadd.f32 %v4827_v25, %v2362_v60  ;;  %v2365_v9 = vmul.f32 %v4758_v34, %v2158_v49  ;;  %v1881_v7 = vadd.f32 1e-06, %v6505_v42 }
 0x281   : > { %v2566_v19 = vadd.f32 %v4791_v12, %v2359_v33  ;;  %v2567_v51 = vadd.f32 %v4827_v25, %v2360_v31  ;;  %v2366_v6 = vmul.f32 %v4770_v1, %v2159_v59  ;;  %v1784_v8 = vmul.f32 0.0052083335, %v1683_v43  ;;  %v3169_v17 = vpop.eup %3168  ;;  %v7337_v31 = vld [vmem:[#allocation178_spill] sm:$0xff] }
 0x282   : > { %2764 = vst [vmem:[%s5690_s23 + $0x550] sm:$0xff] %v2568_v55  ;;  %2765 = vst.msk [vmem:[%s5690_s23 + $0x558] sm:$0xff] %vm413_vm0, %v2569_v5  ;;  %v2572_v10 = vadd.f32 %v4791_v12, %v2365_v9  ;;  %3174 = vrsqrt.f32 %v1879_v50  ;;  %v1880_v41 = vadd.f32 1e-06, %v1782_v44  ;;  %v1883_v21 = vadd.f32 1e-06, %v1785_v37  ;;  %v3171_v29 = vpop.eup %3170 }
 0x283   : > { %2762 = vst [vmem:[%s5690_s23 + $0x540] sm:$0xff] %v2566_v19  ;;  %2763 = vst.msk [vmem:[%s5690_s23 + $0x548] sm:$0xff] %vm413_vm0, %v2567_v51  ;;  %v2573_v14 = vadd.f32 %v4827_v25, %v2366_v6  ;;  %3176 = vrsqrt.f32 %v1878_v0  ;;  %v1882_v11 = vadd.f32 1e-06, %v1784_v8  ;;  %v2156_v13 = vmul.f32 %v3165_v20, %v7331_v27  ;;  %v7340_v37 = vld [vmem:[#allocation181_spill] sm:$0xff] }
 0x284   : > { %2768 = vst [vmem:[%s5690_s23 + $0x570] sm:$0xff] %v2572_v10  ;;  %3178 = vrsqrt.f32 %v1881_v7  ;;  %v2157_v36 = vmul.f32 %v3165_v20, %v7332_v28  ;;  %v2162_v2 = vmul.f32 %v3167_v16, %v7333_v61  ;;  %v2163_v39 = vmul.f32 %v3167_v16, %v7334_v35  ;;  %v7343_v61 = vld [vmem:[#allocation186_spill] sm:$0xff]  ;;  %v7344_v35 = vld [vmem:[#allocation184_spill] sm:$0xff] }
 0x285   : > { %2769 = vst.msk [vmem:[%s5690_s23 + $0x578] sm:$0xff] %vm413_vm0, %v2573_v14  ;;  %3180 = vrsqrt.f32 %v1880_v41  ;;  %v2363_v4 = vmul.f32 %v4758_v34, %v2156_v13  ;;  %v2160_v45 = vmul.f32 %v3169_v17, %v7335_v26  ;;  %v2161_v54 = vmul.f32 %v3169_v17, %v7336_v38  ;;  %v7339_v14 = vld [vmem:[#allocation182_spill] sm:$0xff]  ;;  %v7341_v13 = vld [vmem:[#allocation185_spill] sm:$0xff] }
 0x286   : > { %3182 = vrsqrt.f32 %v1883_v21  ;;  %v2364_v42 = vmul.f32 %v4770_v1, %v2157_v36  ;;  %v2369_v47 = vmul.f32 %v4758_v34, %v2162_v2  ;;  %v2370_v52 = vmul.f32 %v4770_v1, %v2163_v39  ;;  %v7342_v36 = vld [vmem:[#allocation183_spill] sm:$0xff] }
 0x287   : > { %3184 = vrsqrt.f32 %v1882_v11  ;;  %v2570_v62 = vadd.f32 %v4791_v12, %v2363_v4  ;;  %v2367_v56 = vmul.f32 %v4758_v34, %v2160_v45  ;;  %v2368_v60 = vmul.f32 %v4770_v1, %v2161_v54 }
 0x288   : > { %v2571_v23 = vadd.f32 %v4827_v25, %v2364_v42  ;;  %v2166_v33 = vmul.f32 %v3171_v29, %v5530_v30  ;;  %v2167_v58 = vmul.f32 %v3171_v29, %v7337_v31  ;;  %v2576_v22 = vadd.f32 %v4791_v12, %v2369_v47 }
 0x289   : > { %2766 = vst [vmem:[%s5690_s23 + $0x560] sm:$0xff] %v2570_v62  ;;  %v2577_v59 = vadd.f32 %v4827_v25, %v2370_v52  ;;  %v2574_v48 = vadd.f32 %v4791_v12, %v2367_v56  ;;  %v2575_v30 = vadd.f32 %v4827_v25, %v2368_v60 }
 0x28a   : > { %2767 = vst.msk [vmem:[%s5690_s23 + $0x568] sm:$0xff] %vm413_vm0, %v2571_v23  ;;  %v2373_v19 = vmul.f32 %v4758_v34, %v2166_v33  ;;  %v2374_v51 = vmul.f32 %v4770_v1, %v2167_v58  ;;  %2772 = vst [vmem:[%s5690_s23 + $0x590] sm:$0xff] %v2576_v22 }
 0x28b   : > { %2773 = vst.msk [vmem:[%s5690_s23 + $0x598] sm:$0xff] %vm413_vm0, %v2577_v59  ;;  %2770 = vst [vmem:[%s5690_s23 + $0x580] sm:$0xff] %v2574_v48 }
 0x28c   : > { %v3173_v57 = vpop.eup %3172  ;;  %2771 = vst.msk [vmem:[%s5690_s23 + $0x588] sm:$0xff] %vm413_vm0, %v2575_v30  ;;  %v2580_v43 = vadd.f32 %v4791_v12, %v2373_v19  ;;  %v2581_v10 = vadd.f32 %v4827_v25, %v2374_v51 }
 0x28d   : > { %v2164_v55 = vmul.f32 %v3173_v57, %v5549_v32  ;;  %v2165_v5 = vmul.f32 %v3173_v57, %v5536_v3  ;;  %v7338_v3 = vld [vmem:[#allocation180_spill] sm:$0xff] }
 0x28e   : > { %2776 = vst [vmem:[%s5690_s23 + $0x5b0] sm:$0xff] %v2580_v43  ;;  %2777 = vst.msk [vmem:[%s5690_s23 + $0x5b8] sm:$0xff] %vm413_vm0, %v2581_v10 }
 0x28f   : > { %v3175_v46 = vpop.eup %3174  ;;  %v2371_v6 = vmul.f32 %v4758_v34, %v2164_v55  ;;  %v2372_v24 = vmul.f32 %v4770_v1, %v2165_v5 }
 0x290   : > { %v3177_v49 = vpop.eup %3176  ;;  %v2170_v32 = vmul.f32 %v3175_v46, %v5576_v15  ;;  %v2171_v50 = vmul.f32 %v3175_v46, %v7338_v3 }
 0x291   : > { %v3179_v9 = vpop.eup %3178  ;;  %v2168_v0 = vmul.f32 %v3177_v49, %v7339_v14  ;;  %v2169_v7 = vmul.f32 %v3177_v49, %v7340_v37  ;;  %v2578_v8 = vadd.f32 %v4791_v12, %v2371_v6  ;;  %v2579_v15 = vadd.f32 %v4827_v25, %v2372_v24 }
 0x292   : > { %v3181_v44 = vpop.eup %3180  ;;  %v2377_v41 = vmul.f32 %v4758_v34, %v2170_v32  ;;  %v2378_v21 = vmul.f32 %v4770_v1, %v2171_v50  ;;  %v2174_v28 = vmul.f32 %v3179_v9, %v7341_v13  ;;  %v2175_v16 = vmul.f32 %v3179_v9, %v7342_v36 }
 0x293   : > { %v3183_v11 = vpop.eup %3182  ;;  %v2375_v20 = vmul.f32 %v4758_v34, %v2168_v0  ;;  %v2376_v27 = vmul.f32 %v4770_v1, %v2169_v7  ;;  %2774 = vst [vmem:[%s5690_s23 + $0x5a0] sm:$0xff] %v2578_v8  ;;  %2775 = vst.msk [vmem:[%s5690_s23 + $0x5a8] sm:$0xff] %vm413_vm0, %v2579_v15  ;;  %v2172_v2 = vmul.f32 %v3181_v44, %v7343_v61 }
 0x294   : > { %v3185_v17 = vpop.eup %3184  ;;  %v2584_v4 = vadd.f32 %v4791_v12, %v2377_v41  ;;  %v2585_v42 = vadd.f32 %v4827_v25, %v2378_v21  ;;  %v2173_v39 = vmul.f32 %v3181_v44, %v7344_v35  ;;  %v2381_v45 = vmul.f32 %v4758_v34, %v2174_v28 }
 0x295   : > { %v2582_v29 = vadd.f32 %v4791_v12, %v2375_v20  ;;  %v2583_v26 = vadd.f32 %v4827_v25, %v2376_v27  ;;  %v2382_v38 = vmul.f32 %v4770_v1, %v2175_v16  ;;  %v2379_v54 = vmul.f32 %v4758_v34, %v2172_v2 }
 0x296   : > { %2780 = vst [vmem:[%s5690_s23 + $0x5d0] sm:$0xff] %v2584_v4  ;;  %2781 = vst.msk [vmem:[%s5690_s23 + $0x5d8] sm:$0xff] %vm413_vm0, %v2585_v42  ;;  %v2380_v57 = vmul.f32 %v4770_v1, %v2173_v39  ;;  %v2178_v62 = vmul.f32 %v3183_v11, %v5630_v40  ;;  %v2179_v23 = vmul.f32 %v3183_v11, %v5616_v63 }
 0x297   : > { %2778 = vst [vmem:[%s5690_s23 + $0x5c0] sm:$0xff] %v2582_v29  ;;  %2779 = vst.msk [vmem:[%s5690_s23 + $0x5c8] sm:$0xff] %vm413_vm0, %v2583_v26  ;;  %v2588_v47 = vadd.f32 %v4791_v12, %v2381_v45  ;;  %v2589_v52 = vadd.f32 %v4827_v25, %v2382_v38  ;;  %v2176_v46 = vmul.f32 %v3185_v17, %v5633_v18 }
 0x298   : > { %v2177_v56 = vmul.f32 %v3185_v17, %v5623_v53  ;;  %v2586_v60 = vadd.f32 %v4791_v12, %v2379_v54  ;;  %v2587_v40 = vadd.f32 %v4827_v25, %v2380_v57  ;;  %v2385_v63 = vmul.f32 %v4758_v34, %v2178_v62 }
 0x299   : > { %v2386_v33 = vmul.f32 %v4770_v1, %v2179_v23  ;;  %2784 = vst [vmem:[%s5690_s23 + $0x5f0] sm:$0xff] %v2588_v47  ;;  %2785 = vst.msk [vmem:[%s5690_s23 + $0x5f8] sm:$0xff] %vm413_vm0, %v2589_v52  ;;  %v2383_v18 = vmul.f32 %v4758_v34, %v2176_v46 }
 0x29a   : > { %v2384_v53 = vmul.f32 %v4770_v1, %v2177_v56  ;;  %2782 = vst [vmem:[%s5690_s23 + $0x5e0] sm:$0xff] %v2586_v60  ;;  %2783 = vst.msk [vmem:[%s5690_s23 + $0x5e8] sm:$0xff] %vm413_vm0, %v2587_v40  ;;  %v2592_v31 = vadd.f32 %v4791_v12, %v2385_v63 }
 0x29b   : > { %v2593_v58 = vadd.f32 %v4827_v25, %v2386_v33  ;;  %v2590_v49 = vadd.f32 %v4791_v12, %v2383_v18 }
 0x29c   : > { %v2591_v22 = vadd.f32 %v4827_v25, %v2384_v53  ;;  %2788 = vst [vmem:[%s5690_s23 + $0x610] sm:$0xff] %v2592_v31 }
 0x29d   : > { %2789 = vst.msk [vmem:[%s5690_s23 + $0x618] sm:$0xff] %vm413_vm0, %v2593_v58  ;;  %2786 = vst [vmem:[%s5690_s23 + $0x600] sm:$0xff] %v2590_v49 }
 0x29e   : > { %2787 = vst.msk [vmem:[%s5690_s23 + $0x608] sm:$0xff] %vm413_vm0, %v2591_v22 }
 0x29f   : > { %3465 = shalt.err (!%p3462_p12)
}
 0x2a0   : > { %s3466_s20 = scalar_lea.hbm %s6747_s6, 25088  ;;  %s3470_s4 = scalar_lea.hbm %s6802_s3, 100352 }
 0x2a1   : > { %p3467_p6 = scmp.ne.s32.totalorder %s6747_s6, %s3466_s20  ;;  %p3471_p13 = scmp.lt.s32.totalorder %s6747_s6, %s6802_s3 }
 0x2a2   : > { %p3472_p3 = scmp.lt.s32.totalorder %s3470_s4, %s3466_s20 }
 0x2a3   : > { %p3468_p0 = pnand %p3467_p6, %p7345_p1 }
 0x2a4   : > { %p3473_p7 = por %p3472_p3, %p3471_p13 }
 0x2a5   : > { %p3469_p11 = pneg %p3468_p0 }
 0x2a7   : > { %p3474_p10 = pnand %p3473_p7, %p3469_p11 }
 0x2a9   : > { %3477 = shalt.err (!%p3474_p10)
}
 0x2aa   : > { %s3528_s10 = smov 256   ;;  %s3529_s23 = smov 16  }
 0x2ab   : > { %2929 = dma.vmem_to_hbm [thread:$0]  (%p7345_p1), %s6751_s16, 25088, %s6747_s6, %s2791_s29, %s3528_s10, %s3528_s10, %s3529_s23  }
 0x2ac PF: > { %p2951_p5 = scmp.ge.s32.totalorder %s3520_s15, 2  ;;  %s2820_s26 = sand.u32 1, %s3508_s12  }
 0x2ad   : > { %p7346_p2 = scmp.ne.s32.totalorder %s6985_s25, 0  ;;  %s2821_s30 = scalar_lea.sflag [#allocation4], %s2820_s26 }
 0x2af   : > { %p2943_p8 = pnand %p2951_p5, %p7346_p2 }
 0x2b1   : > { %p2944_p9 = pneg %p2943_p8 }
 0x2b3   : > { %3503 = dma.done.wait (%p2944_p9), %s2821_s30, 25088  }
 0x2b4   : > { %3505 = vsyncadd (%p2944_p9), %s2821_s30, 4294942208  ;;  %p17_p4 = scmp.ge.s32.totalorder %s3575_s18, 6   ;;  %s7347_s12 = smov %s3512_s13 }
 0x2b5   : > { %s7348_s13 = smov %s3516_s14  ;;  %s7349_s14 = smov %s3587_s21 }
 0x2b6   : > { %s7350_s15 = smov %s3575_s18  ;;  %19 = sbr.rel (!%p17_p4) target bundleno = 6 (0x6), region = 85 }
 0x2bb   :  { %2826 = vsyncpa [#allocation3], 1 }
 0x2bc   :  { %2828 = vsyncpa [#allocation3 + $0x1], 1 }
 0x2bd   :  { %2829 = vsyncpa [#allocation6], 1 }
 0x2be   :  { %2830 = vsyncpa [#allocation4], 1 }
 0x2bf   :  { %2832 = vsyncpa [#allocation4 + $0x1], 1 }

</bundles_post_ra>
